<compile_context>
chip_gen: v6e
topology: v6e:2x2x1
jax: 0.10.0
libtpu: 0.0.40
codegen_flags: <defaults>
</compile_context>

<pallas_src>
import jax
import jax.numpy as jnp
from jax import lax
from jax.experimental import pallas as pl
from jax.experimental.pallas import tpu as pltpu

F32 = jnp.float32
BN_EPS = 1e-5

BATCH = 2
C_IN = 4            # input_shape[1]
L_IN = 64           # input_shape[0] (power of two, divisible by 32)
NUM_CLASSES = 8
LF = L_IN // 32     # width of features_up / features_down outputs

# Architecture of the PyTorch module.
UP_CH = [(C_IN, 8), (8, 16), (16, 32), (32, 64), (64, 64), (64, 1)]
DOWN_DIMS = [(C_IN * L_IN, 64), (64, 16), (16, LF)]

WPAD = 64           # lane width of the packed parameter buffers


# ------------------------------ packing layout -------------------------------
def _round_up(n, m):
    return ((n + m - 1) // m) * m


def _conv_offsets():
    offs, off = [], 0
    for ci, _ in UP_CH:
        offs.append(off)
        off += _round_up(3 * ci, 8)
    return tuple(offs)


def _lin_offsets():
    ks = [DOWN_DIMS[0][0], DOWN_DIMS[1][0], DOWN_DIMS[2][0], LF]
    offs, off = [], 0
    for k in ks:
        offs.append(off)
        off += _round_up(k, 8)
    return tuple(offs)


# --------------------------------- kernel ------------------------------------
def _make_kernel(G):
    """Kernel processing G samples stacked along the sublane axis."""
    conv_offs = _conv_offsets()
    lin_offs = _lin_offsets()

    def kernel(x_ref, xflat_ref, wconv_ref, wlin_ref, vec_ref, o_ref):
        # ------------------------- features_up ------------------------------
        h = x_ref[...]                                   # (G*L, C_IN)
        seg = L_IN                                       # per-sample length
        vrow = 0
        for li, (ci, co) in enumerate(UP_CH):
            rows = G * seg
            # Conv1d(k=3, padding=1): gather taps with sublane rolls, zero them
            # at per-sample boundaries, then ONE fused (rows,3ci)@(3ci,co) dot.
            pos = lax.broadcasted_iota(jnp.int32, (rows, 1), 0) & (seg - 1)
            xm1 = jnp.where(pos != 0,
                            pltpu.roll(h, shift=1, axis=0), 0.0)
            xp1 = jnp.where(pos != seg - 1,
                            pltpu.roll(h, shift=rows - 1, axis=0), 0.0)
            xcat = jnp.concatenate([xm1, h, xp1], axis=-1)        # (rows, 3*ci)
            w = wconv_ref[conv_offs[li]:conv_offs[li] + 3 * ci, :co]
            h = jnp.dot(xcat, w, preferred_element_type=F32)      # (rows, co)
            if li < 5:
                scale = vec_ref[vrow:vrow + 1, :co]
                shift = vec_ref[vrow + 1:vrow + 2, :co]
                vrow += 2
                h = jnp.maximum(h * scale + shift, 0.0)           # BN(eval)+ReLU
                # MaxPool1d(2): pair-max via roll, keep even rows with one 0/1
                # selection matmul (pairs never straddle a sample boundary).
                m = jnp.maximum(h, pltpu.roll(h, shift=rows - 1, axis=0))
                half = rows // 2
                er = lax.broadcasted_iota(jnp.int32, (half, rows), 0)
                ec = lax.broadcasted_iota(jnp.int32, (half, rows), 1)
                h = jnp.dot((ec == 2 * er).astype(F32), m,
                            preferred_element_type=F32)           # (rows//2, co)
                seg //= 2
            else:
                h = h + vec_ref[vrow:vrow + 1, :co]               # conv bias
                vrow += 1

        # Flatten the (G*LF, 1) column into (G, LF) rows: mask each row onto its
        # within-sample position, then group-sum with a tiny selector matmul.
        rows = G * LF
        kk = lax.broadcasted_iota(jnp.int32, (rows, LF), 0)
        jj = lax.broadcasted_iota(jnp.int32, (rows, LF), 1)
        spread = h * ((kk & (LF - 1)) == jj).astype(F32)          # (rows, LF)
        gb = lax.broadcasted_iota(jnp.int32, (G, rows), 0)
        gk = lax.broadcasted_iota(jnp.int32, (G, rows), 1)
        gsel = ((gk >= gb * LF) & (gk < gb * LF + LF)).astype(F32)
        out_up = jnp.dot(gsel, spread, preferred_element_type=F32)  # (G, LF)

        # ------------------------ features_down -----------------------------
        z = xflat_ref[0]                                  # (G, C_IN*L_IN)
        for di, (fi, fo) in enumerate(DOWN_DIMS):
            w = wlin_ref[lin_offs[di]:lin_offs[di] + fi, :fo]
            # K=256 linear kept at HIGHEST (only G rows -> essentially free);
            # everything else uses default MXU precision.
            prec = lax.Precision.HIGHEST if di == 0 else None
            z = jnp.dot(z, w, preferred_element_type=F32, precision=prec)
            if di < 2:
                scale = vec_ref[vrow:vrow + 1, :fo]
                shift = vec_ref[vrow + 1:vrow + 2, :fo]
                vrow += 2
                z = jnp.maximum(z * scale + shift, 0.0)           # BN(eval)+ReLU
            else:
                z = z + vec_ref[vrow:vrow + 1, :fo]
                vrow += 1

        # --------------------------- classifier -----------------------------
        wc = wlin_ref[lin_offs[3]:lin_offs[3] + LF, :NUM_CLASSES]
        bc = vec_ref[vrow:vrow + 1, :NUM_CLASSES]
        o_ref[0] = jnp.dot(out_up + z, wc, preferred_element_type=F32) + bc

    return kernel


# --------------------------- host-side param packing --------------------------
def _pack_params(P):
    def pad_block(mat, rows):
        k, n = mat.shape
        return jnp.zeros((rows, WPAD), F32).at[:k, :n].set(mat)

    # Conv weights: PyTorch (Co, Ci, 3) -> packed (3*Ci, Co) so that row t*Ci+ci
    # multiplies tap t (t=0 -> x[l-1], t=1 -> x[l], t=2 -> x[l+1]).
    conv_blocks = []
    for (ci, co), stage in zip(UP_CH, P["up"]):
        wp = jnp.transpose(stage[0], (2, 1, 0)).reshape(3 * ci, co)
        conv_blocks.append(pad_block(wp, _round_up(3 * ci, 8)))
    wconv = jnp.concatenate(conv_blocks, axis=0)                  # (568, 64)

    # Linear + classifier weights: PyTorch (out, in) -> (in, out), stacked.
    lin_mats = [jnp.transpose(P["down"][0][0]),
                jnp.transpose(P["down"][1][0]),
                jnp.transpose(P["down"][2][0]),
                jnp.transpose(P["cls"][0])]
    lin_blocks = [pad_block(m, _round_up(m.shape[0], 8)) for m in lin_mats]
    wlin = jnp.concatenate(lin_blocks, axis=0)                    # (344, 64)

    # Per-channel row vectors: eval-mode BN scale + (bias folded into shift).
    def pad_row(v):
        return jnp.zeros((WPAD,), F32).at[:v.shape[0]].set(v)

    rows = []
    for i in range(5):
        _, b, s, t = P["up"][i]
        rows.append(pad_row(s))
        rows.append(pad_row(s * b + t))
    rows.append(pad_row(P["up"][5][1]))
    for i in range(2):
        _, b, s, t = P["down"][i]
        rows.append(pad_row(s))
        rows.append(pad_row(s * b + t))
    rows.append(pad_row(P["down"][2][1]))
    rows.append(pad_row(P["cls"][1]))
    vecs = jnp.stack(rows)                                        # (17, 64)
    return wconv, wlin, vecs


# ------------------------------ parameter init --------------------------------
def make_params(key):
    ks = iter(jax.random.split(key, 64))

    def nrm(shape, scale):
        return (scale * jax.random.normal(next(ks), shape)).astype(F32)

    inv_sqrt_bn = 1.0 / float(jnp.sqrt(jnp.asarray(1.0 + BN_EPS)))

    up = []
    for i, (ci, co) in enumerate(UP_CH):
        w = nrm((co, ci, 3), 1.0 / (ci * 3) ** 0.5)   # PyTorch Conv1d layout
        b = nrm((co,), 0.05)
        if i < 5:
            gamma = 1.0 + nrm((co,), 0.1)
            beta = nrm((co,), 0.1)
            # eval-mode BN with default running stats (mean=0, var=1)
            up.append((w, b, gamma * inv_sqrt_bn, beta))
        else:
            up.append((w, b))

    down = []
    for i, (fi, fo) in enumerate(DOWN_DIMS):
        w = nrm((fo, fi), 1.0 / fi ** 0.5)            # PyTorch Linear layout
        b = nrm((fo,), 0.05)
        if i < 2:
            gamma = 1.0 + nrm((fo,), 0.1)
            beta = nrm((fo,), 0.1)
            down.append((w, b, gamma * inv_sqrt_bn, beta))
        else:
            down.append((w, b))

    wc = nrm((NUM_CLASSES, LF), 1.0 / LF ** 0.5)
    bc = nrm((NUM_CLASSES,), 0.05)
    return {"up": up, "down": down, "cls": (wc, bc)}


# ------------------------------- glue / wrapper --------------------------------
def _default_samples_per_step(batch):
    try:
        kind = jax.devices()[0].device_kind.lower()
    except Exception:
        kind = ""
    # v7x has 2 TensorCores: keep one sample per step so the parallel grid axis
    # is split across cores.  Single-TC v5e/v6e: fold the whole batch into one
    # grid step (no per-step overhead, full sublane occupancy in the matmuls).
    return 1 if "v7" in kind else batch


def zolotyh_forward(x, P, samples_per_step=None):
    B, C, L = x.shape
    assert C == C_IN and L == L_IN and (L & (L - 1)) == 0 and L % 32 == 0
    G = samples_per_step if samples_per_step is not None else _default_samples_per_step(B)
    G = max(1, min(G, B))
    while B % G:
        G -= 1
    steps = B // G

    x_stack = jnp.transpose(x, (0, 2, 1)).reshape(B * L, C)   # (B*L, C) length-major
    x_flat = x.reshape(steps, G, C * L)                        # PyTorch flatten order
    wconv, wlin, vecs = _pack_params(P)

    out = pl.pallas_call(
        _make_kernel(G),
        out_shape=jax.ShapeDtypeStruct((steps, G, NUM_CLASSES), F32),
        grid_spec=pltpu.PrefetchScalarGridSpec(
            num_scalar_prefetch=0,
            grid=(steps,),
            in_specs=[
                pl.BlockSpec((G * L, C), lambda g: (g, 0)),
                pl.BlockSpec((1, G, C * L), lambda g: (g, 0, 0)),
                pl.BlockSpec(wconv.shape, lambda g: (0, 0)),
                pl.BlockSpec(wlin.shape, lambda g: (0, 0)),
                pl.BlockSpec(vecs.shape, lambda g: (0, 0)),
            ],
            out_specs=pl.BlockSpec((1, G, NUM_CLASSES), lambda g: (g, 0, 0)),
        ),
        compiler_params=pltpu.CompilerParams(dimension_semantics=("parallel",)),
    )(x_stack, x_flat, wconv, wlin, vecs)
    return out.reshape(B, NUM_CLASSES)


# ------------------------------ pure-JAX reference -----------------------------
def ref_forward(x, P):
    def conv1d(h, w, b):
        y = lax.conv_general_dilated(
            h, w, window_strides=(1,), padding=((1, 1),),
            dimension_numbers=("NCH", "OIH", "NCH"),
            preferred_element_type=F32)
        return y + b[None, :, None]

    h = x
    for i in range(5):
        w, b, s, sh = P["up"][i]
        h = conv1d(h, w, b)
        h = h * s[None, :, None] + sh[None, :, None]
        h = jnp.maximum(h, 0.0)
        h = lax.reduce_window(h, -jnp.inf, lax.max, (1, 1, 2), (1, 1, 2), "VALID")
    w, b = P["up"][5]
    h = conv1d(h, w, b)
    up = h.reshape(h.shape[0], -1)

    z = x.reshape(x.shape[0], -1)
    for i in range(2):
        w, b, s, sh = P["down"][i]
        z = jnp.dot(z, w.T) + b
        z = z * s + sh
        z = jnp.maximum(z, 0.0)
    w, b = P["down"][2]
    z = jnp.dot(z, w.T) + b

    wc, bc = P["cls"]
    return jnp.dot(up + z, wc.T) + bc


# ------------------------------------ main --------------------------------------
if __name__ == "__main__":
    key = jax.random.PRNGKey(0)
    kp, kx = jax.random.split(key)
    params = make_params(kp)
    # x corresponds to ZolotyhNet_EXTRA_LAYER(input_shape=(64, 4), num_classes=8)
    x = jax.random.normal(kx, (BATCH, C_IN, L_IN), dtype=F32)   # NCL like PyTorch

    out = jax.block_until_ready(zolotyh_forward(x, params))
    assert out.shape == (BATCH, NUM_CLASSES)

    ref = ref_forward(x, params)
    # Kernel matmuls run at default MXU precision (bf16 passes), so allow ~1e-2
    # divergence from the XLA reference.
    if not jnp.allclose(out, ref, rtol=2e-2, atol=2e-2):
        raise SystemExit("kernel/reference mismatch")

    print("KERNEL_OK")
</pallas_src>

<mosaic_0001>
module attributes {stable_mosaic.version = 11 : i64} {
  func.func @kernel(%arg0: i32, %arg1: memref<128x4xf32, #tpu.memory_space<vmem>>, %arg2: memref<1x2x256xf32, #tpu.memory_space<vmem>>, %arg3: memref<568x64xf32, #tpu.memory_space<vmem>>, %arg4: memref<344x64xf32, #tpu.memory_space<vmem>>, %arg5: memref<17x64xf32, #tpu.memory_space<vmem>>, %arg6: memref<1x2x8xf32, #tpu.memory_space<vmem>>) attributes {dimension_semantics = [#tpu.dimension_semantics<parallel>], iteration_bounds = array<i64: 1>, scalar_prefetch = 0 : i64, scratch_operands = 0 : i64, tpu.core_type = #tpu.core_type<tc>, window_params = [{transform_indices = @transform_0, window_bounds = array<i64: 128, 4>}, {transform_indices = @transform_1, window_bounds = array<i64: 1, 2, 256>}, {pipeline_mode = #tpu.pipeline_mode<synchronous>, transform_indices = @transform_2, window_bounds = array<i64: 568, 64>}, {pipeline_mode = #tpu.pipeline_mode<synchronous>, transform_indices = @transform_3, window_bounds = array<i64: 344, 64>}, {pipeline_mode = #tpu.pipeline_mode<synchronous>, transform_indices = @transform_4, window_bounds = array<i64: 17, 64>}, {transform_indices = @transform_5, window_bounds = array<i64: 1, 2, 8>}]} {
    %c0 = arith.constant 0 : index
    %c0_0 = arith.constant 0 : index
    %0 = vector.load %arg1[%c0, %c0_0] : memref<128x4xf32, #tpu.memory_space<vmem>>, vector<128x4xf32>
    %1 = tpu.iota {dimensions = array<i32: 0>} : vector<128x1xi32>
    %c63_i32 = arith.constant 63 : i32
    %2 = vector.broadcast %c63_i32 : i32 to vector<128x1xi32>
    %3 = arith.andi %1, %2 : vector<128x1xi32>
    %c0_i32 = arith.constant 0 : i32
    %4 = vector.broadcast %c0_i32 : i32 to vector<128x1xi32>
    %5 = arith.cmpi ne, %3, %4 : vector<128x1xi32>
    %c1_i32 = arith.constant 1 : i32
    %6 = tpu.dynamic_rotate %0 by %c1_i32 dim 0 : vector<128x4xf32>, i32 -> vector<128x4xf32>
    %cst = arith.constant 0.000000e+00 : f32
    %7 = vector.shape_cast %5 : vector<128x1xi1> to vector<128x1xi1>
    %8 = vector.broadcast %7 : vector<128x1xi1> to vector<128x4xi1>
    %9 = vector.broadcast %cst : f32 to vector<128x4xf32>
    %10 = arith.select %8, %6, %9 : vector<128x4xi1>, vector<128x4xf32>
    %c63_i32_1 = arith.constant 63 : i32
    %11 = vector.broadcast %c63_i32_1 : i32 to vector<128x1xi32>
    %12 = arith.cmpi ne, %3, %11 : vector<128x1xi32>
    %c127_i32 = arith.constant 127 : i32
    %13 = tpu.dynamic_rotate %0 by %c127_i32 dim 0 : vector<128x4xf32>, i32 -> vector<128x4xf32>
    %cst_2 = arith.constant 0.000000e+00 : f32
    %14 = vector.shape_cast %12 : vector<128x1xi1> to vector<128x1xi1>
    %15 = vector.broadcast %14 : vector<128x1xi1> to vector<128x4xi1>
    %16 = vector.broadcast %cst_2 : f32 to vector<128x4xf32>
    %17 = arith.select %15, %13, %16 : vector<128x4xi1>, vector<128x4xf32>
    %18 = tpu.concatenate %10, %0, %17 in 1 : vector<128x4xf32>, vector<128x4xf32>, vector<128x4xf32> -> vector<128x12xf32>
    %c0_3 = arith.constant 0 : index
    %c0_4 = arith.constant 0 : index
    %19 = vector.load %arg3[%c0_3, %c0_4] : memref<568x64xf32, #tpu.memory_space<vmem>>, vector<12x8xf32>
    %cst_5 = arith.constant dense<0.000000e+00> : vector<128x8xf32>
    %20 = tpu.matmul %18, %19, %cst_5 {dimension_numbers = #tpu.dot_dimension_numbers<[1], [0], [0], [1], [0, 0, 1, 1], [], []>} : vector<128x12xf32>, vector<12x8xf32>, vector<128x8xf32> -> vector<128x8xf32>
    %c0_6 = arith.constant 0 : index
    %c0_7 = arith.constant 0 : index
    %21 = vector.load %arg5[%c0_6, %c0_7] : memref<17x64xf32, #tpu.memory_space<vmem>>, vector<1x8xf32>
    %c1 = arith.constant 1 : index
    %c0_8 = arith.constant 0 : index
    %22 = vector.load %arg5[%c1, %c0_8] : memref<17x64xf32, #tpu.memory_space<vmem>>, vector<1x8xf32>
    %23 = vector.broadcast %21 : vector<1x8xf32> to vector<128x8xf32>
    %24 = arith.mulf %20, %23 : vector<128x8xf32>
    %25 = vector.broadcast %22 : vector<1x8xf32> to vector<128x8xf32>
    %26 = arith.addf %24, %25 : vector<128x8xf32>
    %cst_9 = arith.constant 0.000000e+00 : f32
    %27 = vector.broadcast %cst_9 : f32 to vector<128x8xf32>
    %28 = arith.maximumf %26, %27 : vector<128x8xf32>
    %c127_i32_10 = arith.constant 127 : i32
    %29 = tpu.dynamic_rotate %28 by %c127_i32_10 dim 0 : vector<128x8xf32>, i32 -> vector<128x8xf32>
    %30 = arith.maximumf %28, %29 : vector<128x8xf32>
    %31 = tpu.iota {dimensions = array<i32: 0>} : vector<64x128xi32>
    %32 = tpu.iota {dimensions = array<i32: 1>} : vector<64x128xi32>
    %c2_i32 = arith.constant 2 : i32
    %33 = vector.broadcast %c2_i32 : i32 to vector<64x128xi32>
    %34 = arith.muli %33, %31 : vector<64x128xi32>
    %35 = arith.cmpi eq, %32, %34 : vector<64x128xi32>
    %36 = arith.extui %35 : vector<64x128xi1> to vector<64x128xi32>
    %37 = arith.sitofp %36 : vector<64x128xi32> to vector<64x128xf32>
    %cst_11 = arith.constant dense<0.000000e+00> : vector<64x8xf32>
    %38 = tpu.matmul %37, %30, %cst_11 {dimension_numbers = #tpu.dot_dimension_numbers<[1], [0], [0], [1], [0, 0, 1, 1], [], []>} : vector<64x128xf32>, vector<128x8xf32>, vector<64x8xf32> -> vector<64x8xf32>
    %39 = tpu.iota {dimensions = array<i32: 0>} : vector<64x1xi32>
    %c31_i32 = arith.constant 31 : i32
    %40 = vector.broadcast %c31_i32 : i32 to vector<64x1xi32>
    %41 = arith.andi %39, %40 : vector<64x1xi32>
    %c0_i32_12 = arith.constant 0 : i32
    %42 = vector.broadcast %c0_i32_12 : i32 to vector<64x1xi32>
    %43 = arith.cmpi ne, %41, %42 : vector<64x1xi32>
    %c1_i32_13 = arith.constant 1 : i32
    %44 = tpu.dynamic_rotate %38 by %c1_i32_13 dim 0 : vector<64x8xf32>, i32 -> vector<64x8xf32>
    %cst_14 = arith.constant 0.000000e+00 : f32
    %45 = vector.shape_cast %43 : vector<64x1xi1> to vector<64x1xi1>
    %46 = vector.broadcast %45 : vector<64x1xi1> to vector<64x8xi1>
    %47 = vector.broadcast %cst_14 : f32 to vector<64x8xf32>
    %48 = arith.select %46, %44, %47 : vector<64x8xi1>, vector<64x8xf32>
    %c31_i32_15 = arith.constant 31 : i32
    %49 = vector.broadcast %c31_i32_15 : i32 to vector<64x1xi32>
    %50 = arith.cmpi ne, %41, %49 : vector<64x1xi32>
    %c63_i32_16 = arith.constant 63 : i32
    %51 = tpu.dynamic_rotate %38 by %c63_i32_16 dim 0 : vector<64x8xf32>, i32 -> vector<64x8xf32>
    %cst_17 = arith.constant 0.000000e+00 : f32
    %52 = vector.shape_cast %50 : vector<64x1xi1> to vector<64x1xi1>
    %53 = vector.broadcast %52 : vector<64x1xi1> to vector<64x8xi1>
    %54 = vector.broadcast %cst_17 : f32 to vector<64x8xf32>
    %55 = arith.select %53, %51, %54 : vector<64x8xi1>, vector<64x8xf32>
    %56 = tpu.concatenate %48, %38, %55 in 1 : vector<64x8xf32>, vector<64x8xf32>, vector<64x8xf32> -> vector<64x24xf32>
    %c16 = arith.constant 16 : index
    %c0_18 = arith.constant 0 : index
    %57 = vector.load %arg3[%c16, %c0_18] : memref<568x64xf32, #tpu.memory_space<vmem>>, vector<24x16xf32>
    %cst_19 = arith.constant dense<0.000000e+00> : vector<64x16xf32>
    %58 = tpu.matmul %56, %57, %cst_19 {dimension_numbers = #tpu.dot_dimension_numbers<[1], [0], [0], [1], [0, 0, 1, 1], [], []>} : vector<64x24xf32>, vector<24x16xf32>, vector<64x16xf32> -> vector<64x16xf32>
    %c2 = arith.constant 2 : index
    %c0_20 = arith.constant 0 : index
    %59 = vector.load %arg5[%c2, %c0_20] : memref<17x64xf32, #tpu.memory_space<vmem>>, vector<1x16xf32>
    %c3 = arith.constant 3 : index
    %c0_21 = arith.constant 0 : index
    %60 = vector.load %arg5[%c3, %c0_21] : memref<17x64xf32, #tpu.memory_space<vmem>>, vector<1x16xf32>
    %61 = vector.broadcast %59 : vector<1x16xf32> to vector<64x16xf32>
    %62 = arith.mulf %58, %61 : vector<64x16xf32>
    %63 = vector.broadcast %60 : vector<1x16xf32> to vector<64x16xf32>
    %64 = arith.addf %62, %63 : vector<64x16xf32>
    %cst_22 = arith.constant 0.000000e+00 : f32
    %65 = vector.broadcast %cst_22 : f32 to vector<64x16xf32>
    %66 = arith.maximumf %64, %65 : vector<64x16xf32>
    %c63_i32_23 = arith.constant 63 : i32
    %67 = tpu.dynamic_rotate %66 by %c63_i32_23 dim 0 : vector<64x16xf32>, i32 -> vector<64x16xf32>
    %68 = arith.maximumf %66, %67 : vector<64x16xf32>
    %69 = tpu.iota {dimensions = array<i32: 0>} : vector<32x64xi32>
    %70 = tpu.iota {dimensions = array<i32: 1>} : vector<32x64xi32>
    %c2_i32_24 = arith.constant 2 : i32
    %71 = vector.broadcast %c2_i32_24 : i32 to vector<32x64xi32>
    %72 = arith.muli %71, %69 : vector<32x64xi32>
    %73 = arith.cmpi eq, %70, %72 : vector<32x64xi32>
    %74 = arith.extui %73 : vector<32x64xi1> to vector<32x64xi32>
    %75 = arith.sitofp %74 : vector<32x64xi32> to vector<32x64xf32>
    %cst_25 = arith.constant dense<0.000000e+00> : vector<32x16xf32>
    %76 = tpu.matmul %75, %68, %cst_25 {dimension_numbers = #tpu.dot_dimension_numbers<[1], [0], [0], [1], [0, 0, 1, 1], [], []>} : vector<32x64xf32>, vector<64x16xf32>, vector<32x16xf32> -> vector<32x16xf32>
    %77 = tpu.iota {dimensions = array<i32: 0>} : vector<32x1xi32>
    %c15_i32 = arith.constant 15 : i32
    %78 = vector.broadcast %c15_i32 : i32 to vector<32x1xi32>
    %79 = arith.andi %77, %78 : vector<32x1xi32>
    %c0_i32_26 = arith.constant 0 : i32
    %80 = vector.broadcast %c0_i32_26 : i32 to vector<32x1xi32>
    %81 = arith.cmpi ne, %79, %80 : vector<32x1xi32>
    %c1_i32_27 = arith.constant 1 : i32
    %82 = tpu.dynamic_rotate %76 by %c1_i32_27 dim 0 : vector<32x16xf32>, i32 -> vector<32x16xf32>
    %cst_28 = arith.constant 0.000000e+00 : f32
    %83 = vector.shape_cast %81 : vector<32x1xi1> to vector<32x1xi1>
    %84 = vector.broadcast %83 : vector<32x1xi1> to vector<32x16xi1>
    %85 = vector.broadcast %cst_28 : f32 to vector<32x16xf32>
    %86 = arith.select %84, %82, %85 : vector<32x16xi1>, vector<32x16xf32>
    %c15_i32_29 = arith.constant 15 : i32
    %87 = vector.broadcast %c15_i32_29 : i32 to vector<32x1xi32>
    %88 = arith.cmpi ne, %79, %87 : vector<32x1xi32>
    %c31_i32_30 = arith.constant 31 : i32
    %89 = tpu.dynamic_rotate %76 by %c31_i32_30 dim 0 : vector<32x16xf32>, i32 -> vector<32x16xf32>
    %cst_31 = arith.constant 0.000000e+00 : f32
    %90 = vector.shape_cast %88 : vector<32x1xi1> to vector<32x1xi1>
    %91 = vector.broadcast %90 : vector<32x1xi1> to vector<32x16xi1>
    %92 = vector.broadcast %cst_31 : f32 to vector<32x16xf32>
    %93 = arith.select %91, %89, %92 : vector<32x16xi1>, vector<32x16xf32>
    %94 = tpu.concatenate %86, %76, %93 in 1 : vector<32x16xf32>, vector<32x16xf32>, vector<32x16xf32> -> vector<32x48xf32>
    %c40 = arith.constant 40 : index
    %c0_32 = arith.constant 0 : index
    %95 = vector.load %arg3[%c40, %c0_32] : memref<568x64xf32, #tpu.memory_space<vmem>>, vector<48x32xf32>
    %cst_33 = arith.constant dense<0.000000e+00> : vector<32x32xf32>
    %96 = tpu.matmul %94, %95, %cst_33 {dimension_numbers = #tpu.dot_dimension_numbers<[1], [0], [0], [1], [0, 0, 1, 1], [], []>} : vector<32x48xf32>, vector<48x32xf32>, vector<32x32xf32> -> vector<32x32xf32>
    %c4 = arith.constant 4 : index
    %c0_34 = arith.constant 0 : index
    %97 = vector.load %arg5[%c4, %c0_34] : memref<17x64xf32, #tpu.memory_space<vmem>>, vector<1x32xf32>
    %c5 = arith.constant 5 : index
    %c0_35 = arith.constant 0 : index
    %98 = vector.load %arg5[%c5, %c0_35] : memref<17x64xf32, #tpu.memory_space<vmem>>, vector<1x32xf32>
    %99 = vector.broadcast %97 : vector<1x32xf32> to vector<32x32xf32>
    %100 = arith.mulf %96, %99 : vector<32x32xf32>
    %101 = vector.broadcast %98 : vector<1x32xf32> to vector<32x32xf32>
    %102 = arith.addf %100, %101 : vector<32x32xf32>
    %cst_36 = arith.constant 0.000000e+00 : f32
    %103 = vector.broadcast %cst_36 : f32 to vector<32x32xf32>
    %104 = arith.maximumf %102, %103 : vector<32x32xf32>
    %c31_i32_37 = arith.constant 31 : i32
    %105 = tpu.dynamic_rotate %104 by %c31_i32_37 dim 0 : vector<32x32xf32>, i32 -> vector<32x32xf32>
    %106 = arith.maximumf %104, %105 : vector<32x32xf32>
    %107 = tpu.iota {dimensions = array<i32: 0>} : vector<16x32xi32>
    %108 = tpu.iota {dimensions = array<i32: 1>} : vector<16x32xi32>
    %c2_i32_38 = arith.constant 2 : i32
    %109 = vector.broadcast %c2_i32_38 : i32 to vector<16x32xi32>
    %110 = arith.muli %109, %107 : vector<16x32xi32>
    %111 = arith.cmpi eq, %108, %110 : vector<16x32xi32>
    %112 = arith.extui %111 : vector<16x32xi1> to vector<16x32xi32>
    %113 = arith.sitofp %112 : vector<16x32xi32> to vector<16x32xf32>
    %cst_39 = arith.constant dense<0.000000e+00> : vector<16x32xf32>
    %114 = tpu.matmul %113, %106, %cst_39 {dimension_numbers = #tpu.dot_dimension_numbers<[1], [0], [0], [1], [0, 0, 1, 1], [], []>} : vector<16x32xf32>, vector<32x32xf32>, vector<16x32xf32> -> vector<16x32xf32>
    %115 = tpu.iota {dimensions = array<i32: 0>} : vector<16x1xi32>
    %c7_i32 = arith.constant 7 : i32
    %116 = vector.broadcast %c7_i32 : i32 to vector<16x1xi32>
    %117 = arith.andi %115, %116 : vector<16x1xi32>
    %c0_i32_40 = arith.constant 0 : i32
    %118 = vector.broadcast %c0_i32_40 : i32 to vector<16x1xi32>
    %119 = arith.cmpi ne, %117, %118 : vector<16x1xi32>
    %c1_i32_41 = arith.constant 1 : i32
    %120 = tpu.dynamic_rotate %114 by %c1_i32_41 dim 0 : vector<16x32xf32>, i32 -> vector<16x32xf32>
    %cst_42 = arith.constant 0.000000e+00 : f32
    %121 = vector.shape_cast %119 : vector<16x1xi1> to vector<16x1xi1>
    %122 = vector.broadcast %121 : vector<16x1xi1> to vector<16x32xi1>
    %123 = vector.broadcast %cst_42 : f32 to vector<16x32xf32>
    %124 = arith.select %122, %120, %123 : vector<16x32xi1>, vector<16x32xf32>
    %c7_i32_43 = arith.constant 7 : i32
    %125 = vector.broadcast %c7_i32_43 : i32 to vector<16x1xi32>
    %126 = arith.cmpi ne, %117, %125 : vector<16x1xi32>
    %c15_i32_44 = arith.constant 15 : i32
    %127 = tpu.dynamic_rotate %114 by %c15_i32_44 dim 0 : vector<16x32xf32>, i32 -> vector<16x32xf32>
    %cst_45 = arith.constant 0.000000e+00 : f32
    %128 = vector.shape_cast %126 : vector<16x1xi1> to vector<16x1xi1>
    %129 = vector.broadcast %128 : vector<16x1xi1> to vector<16x32xi1>
    %130 = vector.broadcast %cst_45 : f32 to vector<16x32xf32>
    %131 = arith.select %129, %127, %130 : vector<16x32xi1>, vector<16x32xf32>
    %132 = tpu.concatenate %124, %114, %131 in 1 : vector<16x32xf32>, vector<16x32xf32>, vector<16x32xf32> -> vector<16x96xf32>
    %c88 = arith.constant 88 : index
    %c0_46 = arith.constant 0 : index
    %133 = vector.load %arg3[%c88, %c0_46] : memref<568x64xf32, #tpu.memory_space<vmem>>, vector<96x64xf32>
    %cst_47 = arith.constant dense<0.000000e+00> : vector<16x64xf32>
    %134 = tpu.matmul %132, %133, %cst_47 {dimension_numbers = #tpu.dot_dimension_numbers<[1], [0], [0], [1], [0, 0, 1, 1], [], []>} : vector<16x96xf32>, vector<96x64xf32>, vector<16x64xf32> -> vector<16x64xf32>
    %c6 = arith.constant 6 : index
    %c0_48 = arith.constant 0 : index
    %135 = vector.load %arg5[%c6, %c0_48] : memref<17x64xf32, #tpu.memory_space<vmem>>, vector<1x64xf32>
    %c7 = arith.constant 7 : index
    %c0_49 = arith.constant 0 : index
    %136 = vector.load %arg5[%c7, %c0_49] : memref<17x64xf32, #tpu.memory_space<vmem>>, vector<1x64xf32>
    %137 = vector.broadcast %135 : vector<1x64xf32> to vector<16x64xf32>
    %138 = arith.mulf %134, %137 : vector<16x64xf32>
    %139 = vector.broadcast %136 : vector<1x64xf32> to vector<16x64xf32>
    %140 = arith.addf %138, %139 : vector<16x64xf32>
    %cst_50 = arith.constant 0.000000e+00 : f32
    %141 = vector.broadcast %cst_50 : f32 to vector<16x64xf32>
    %142 = arith.maximumf %140, %141 : vector<16x64xf32>
    %c15_i32_51 = arith.constant 15 : i32
    %143 = tpu.dynamic_rotate %142 by %c15_i32_51 dim 0 : vector<16x64xf32>, i32 -> vector<16x64xf32>
    %144 = arith.maximumf %142, %143 : vector<16x64xf32>
    %145 = tpu.iota {dimensions = array<i32: 0>} : vector<8x16xi32>
    %146 = tpu.iota {dimensions = array<i32: 1>} : vector<8x16xi32>
    %c2_i32_52 = arith.constant 2 : i32
    %147 = vector.broadcast %c2_i32_52 : i32 to vector<8x16xi32>
    %148 = arith.muli %147, %145 : vector<8x16xi32>
    %149 = arith.cmpi eq, %146, %148 : vector<8x16xi32>
    %150 = arith.extui %149 : vector<8x16xi1> to vector<8x16xi32>
    %151 = arith.sitofp %150 : vector<8x16xi32> to vector<8x16xf32>
    %cst_53 = arith.constant dense<0.000000e+00> : vector<8x64xf32>
    %152 = tpu.matmul %151, %144, %cst_53 {dimension_numbers = #tpu.dot_dimension_numbers<[1], [0], [0], [1], [0, 0, 1, 1], [], []>} : vector<8x16xf32>, vector<16x64xf32>, vector<8x64xf32> -> vector<8x64xf32>
    %153 = tpu.iota {dimensions = array<i32: 0>} : vector<8x1xi32>
    %c3_i32 = arith.constant 3 : i32
    %154 = vector.broadcast %c3_i32 : i32 to vector<8x1xi32>
    %155 = arith.andi %153, %154 : vector<8x1xi32>
    %c0_i32_54 = arith.constant 0 : i32
    %156 = vector.broadcast %c0_i32_54 : i32 to vector<8x1xi32>
    %157 = arith.cmpi ne, %155, %156 : vector<8x1xi32>
    %c1_i32_55 = arith.constant 1 : i32
    %158 = tpu.dynamic_rotate %152 by %c1_i32_55 dim 0 : vector<8x64xf32>, i32 -> vector<8x64xf32>
    %cst_56 = arith.constant 0.000000e+00 : f32
    %159 = vector.shape_cast %157 : vector<8x1xi1> to vector<8x1xi1>
    %160 = vector.broadcast %159 : vector<8x1xi1> to vector<8x64xi1>
    %161 = vector.broadcast %cst_56 : f32 to vector<8x64xf32>
    %162 = arith.select %160, %158, %161 : vector<8x64xi1>, vector<8x64xf32>
    %c3_i32_57 = arith.constant 3 : i32
    %163 = vector.broadcast %c3_i32_57 : i32 to vector<8x1xi32>
    %164 = arith.cmpi ne, %155, %163 : vector<8x1xi32>
    %c7_i32_58 = arith.constant 7 : i32
    %165 = tpu.dynamic_rotate %152 by %c7_i32_58 dim 0 : vector<8x64xf32>, i32 -> vector<8x64xf32>
    %cst_59 = arith.constant 0.000000e+00 : f32
    %166 = vector.shape_cast %164 : vector<8x1xi1> to vector<8x1xi1>
    %167 = vector.broadcast %166 : vector<8x1xi1> to vector<8x64xi1>
    %168 = vector.broadcast %cst_59 : f32 to vector<8x64xf32>
    %169 = arith.select %167, %165, %168 : vector<8x64xi1>, vector<8x64xf32>
    %170 = tpu.concatenate %162, %152, %169 in 1 : vector<8x64xf32>, vector<8x64xf32>, vector<8x64xf32> -> vector<8x192xf32>
    %c184 = arith.constant 184 : index
    %c0_60 = arith.constant 0 : index
    %171 = vector.load %arg3[%c184, %c0_60] : memref<568x64xf32, #tpu.memory_space<vmem>>, vector<192x64xf32>
    %cst_61 = arith.constant dense<0.000000e+00> : vector<8x64xf32>
    %172 = tpu.matmul %170, %171, %cst_61 {dimension_numbers = #tpu.dot_dimension_numbers<[1], [0], [0], [1], [0, 0, 1, 1], [], []>} : vector<8x192xf32>, vector<192x64xf32>, vector<8x64xf32> -> vector<8x64xf32>
    %c8 = arith.constant 8 : index
    %c0_62 = arith.constant 0 : index
    %173 = vector.load %arg5[%c8, %c0_62] : memref<17x64xf32, #tpu.memory_space<vmem>>, vector<1x64xf32>
    %c9 = arith.constant 9 : index
    %c0_63 = arith.constant 0 : index
    %174 = vector.load %arg5[%c9, %c0_63] : memref<17x64xf32, #tpu.memory_space<vmem>>, vector<1x64xf32>
    %175 = vector.broadcast %173 : vector<1x64xf32> to vector<8x64xf32>
    %176 = arith.mulf %172, %175 : vector<8x64xf32>
    %177 = vector.broadcast %174 : vector<1x64xf32> to vector<8x64xf32>
    %178 = arith.addf %176, %177 : vector<8x64xf32>
    %cst_64 = arith.constant 0.000000e+00 : f32
    %179 = vector.broadcast %cst_64 : f32 to vector<8x64xf32>
    %180 = arith.maximumf %178, %179 : vector<8x64xf32>
    %c7_i32_65 = arith.constant 7 : i32
    %181 = tpu.dynamic_rotate %180 by %c7_i32_65 dim 0 : vector<8x64xf32>, i32 -> vector<8x64xf32>
    %182 = arith.maximumf %180, %181 : vector<8x64xf32>
    %183 = tpu.iota {dimensions = array<i32: 0>} : vector<4x8xi32>
    %184 = tpu.iota {dimensions = array<i32: 1>} : vector<4x8xi32>
    %c2_i32_66 = arith.constant 2 : i32
    %185 = vector.broadcast %c2_i32_66 : i32 to vector<4x8xi32>
    %186 = arith.muli %185, %183 : vector<4x8xi32>
    %187 = arith.cmpi eq, %184, %186 : vector<4x8xi32>
    %188 = arith.extui %187 : vector<4x8xi1> to vector<4x8xi32>
    %189 = arith.sitofp %188 : vector<4x8xi32> to vector<4x8xf32>
    %cst_67 = arith.constant dense<0.000000e+00> : vector<4x64xf32>
    %190 = tpu.matmul %189, %182, %cst_67 {dimension_numbers = #tpu.dot_dimension_numbers<[1], [0], [0], [1], [0, 0, 1, 1], [], []>} : vector<4x8xf32>, vector<8x64xf32>, vector<4x64xf32> -> vector<4x64xf32>
    %191 = tpu.iota {dimensions = array<i32: 0>} : vector<4x1xi32>
    %c1_i32_68 = arith.constant 1 : i32
    %192 = vector.broadcast %c1_i32_68 : i32 to vector<4x1xi32>
    %193 = arith.andi %191, %192 : vector<4x1xi32>
    %c0_i32_69 = arith.constant 0 : i32
    %194 = vector.broadcast %c0_i32_69 : i32 to vector<4x1xi32>
    %195 = arith.cmpi ne, %193, %194 : vector<4x1xi32>
    %c1_i32_70 = arith.constant 1 : i32
    %196 = tpu.dynamic_rotate %190 by %c1_i32_70 dim 0 : vector<4x64xf32>, i32 -> vector<4x64xf32>
    %cst_71 = arith.constant 0.000000e+00 : f32
    %197 = vector.shape_cast %195 : vector<4x1xi1> to vector<4x1xi1>
    %198 = vector.broadcast %197 : vector<4x1xi1> to vector<4x64xi1>
    %199 = vector.broadcast %cst_71 : f32 to vector<4x64xf32>
    %200 = arith.select %198, %196, %199 : vector<4x64xi1>, vector<4x64xf32>
    %c1_i32_72 = arith.constant 1 : i32
    %201 = vector.broadcast %c1_i32_72 : i32 to vector<4x1xi32>
    %202 = arith.cmpi ne, %193, %201 : vector<4x1xi32>
    %c3_i32_73 = arith.constant 3 : i32
    %203 = tpu.dynamic_rotate %190 by %c3_i32_73 dim 0 : vector<4x64xf32>, i32 -> vector<4x64xf32>
    %cst_74 = arith.constant 0.000000e+00 : f32
    %204 = vector.shape_cast %202 : vector<4x1xi1> to vector<4x1xi1>
    %205 = vector.broadcast %204 : vector<4x1xi1> to vector<4x64xi1>
    %206 = vector.broadcast %cst_74 : f32 to vector<4x64xf32>
    %207 = arith.select %205, %203, %206 : vector<4x64xi1>, vector<4x64xf32>
    %208 = tpu.concatenate %200, %190, %207 in 1 : vector<4x64xf32>, vector<4x64xf32>, vector<4x64xf32> -> vector<4x192xf32>
    %c376 = arith.constant 376 : index
    %c0_75 = arith.constant 0 : index
    %209 = vector.load %arg3[%c376, %c0_75] : memref<568x64xf32, #tpu.memory_space<vmem>>, vector<192x1xf32>
    %cst_76 = arith.constant dense<0.000000e+00> : vector<4x1xf32>
    %210 = tpu.matmul %208, %209, %cst_76 {dimension_numbers = #tpu.dot_dimension_numbers<[1], [0], [0], [1], [0, 0, 1, 1], [], []>} : vector<4x192xf32>, vector<192x1xf32>, vector<4x1xf32> -> vector<4x1xf32>
    %c10 = arith.constant 10 : index
    %c0_77 = arith.constant 0 : index
    %211 = vector.load %arg5[%c10, %c0_77] : memref<17x64xf32, #tpu.memory_space<vmem>>, vector<1x1xf32>
    %212 = vector.broadcast %211 : vector<1x1xf32> to vector<4x1xf32>
    %213 = arith.addf %210, %212 : vector<4x1xf32>
    %214 = tpu.iota {dimensions = array<i32: 0>} : vector<4x2xi32>
    %215 = tpu.iota {dimensions = array<i32: 1>} : vector<4x2xi32>
    %c1_i32_78 = arith.constant 1 : i32
    %216 = vector.broadcast %c1_i32_78 : i32 to vector<4x2xi32>
    %217 = arith.andi %214, %216 : vector<4x2xi32>
    %218 = arith.cmpi eq, %217, %215 : vector<4x2xi32>
    %219 = arith.extui %218 : vector<4x2xi1> to vector<4x2xi32>
    %220 = arith.sitofp %219 : vector<4x2xi32> to vector<4x2xf32>
    %221 = vector.broadcast %213 : vector<4x1xf32> to vector<4x2xf32>
    %222 = arith.mulf %221, %220 : vector<4x2xf32>
    %223 = tpu.iota {dimensions = array<i32: 0>} : vector<2x4xi32>
    %224 = tpu.iota {dimensions = array<i32: 1>} : vector<2x4xi32>
    %c2_i32_79 = arith.constant 2 : i32
    %225 = vector.broadcast %c2_i32_79 : i32 to vector<2x4xi32>
    %226 = arith.muli %223, %225 : vector<2x4xi32>
    %227 = arith.cmpi sge, %224, %226 : vector<2x4xi32>
    %c2_i32_80 = arith.constant 2 : i32
    %228 = vector.broadcast %c2_i32_80 : i32 to vector<2x4xi32>
    %229 = arith.muli %223, %228 : vector<2x4xi32>
    %c2_i32_81 = arith.constant 2 : i32
    %230 = vector.broadcast %c2_i32_81 : i32 to vector<2x4xi32>
    %231 = arith.addi %229, %230 : vector<2x4xi32>
    %232 = arith.cmpi slt, %224, %231 : vector<2x4xi32>
    %233 = arith.andi %227, %232 : vector<2x4xi1>
    %234 = arith.extui %233 : vector<2x4xi1> to vector<2x4xi32>
    %235 = arith.sitofp %234 : vector<2x4xi32> to vector<2x4xf32>
    %cst_82 = arith.constant dense<0.000000e+00> : vector<2x2xf32>
    %236 = tpu.matmul %235, %222, %cst_82 {dimension_numbers = #tpu.dot_dimension_numbers<[1], [0], [0], [1], [0, 0, 1, 1], [], []>} : vector<2x4xf32>, vector<4x2xf32>, vector<2x2xf32> -> vector<2x2xf32>
    %c0_83 = arith.constant 0 : index
    %c0_84 = arith.constant 0 : index
    %c0_85 = arith.constant 0 : index
    %237 = vector.load %arg2[%c0_83, %c0_84, %c0_85] : memref<1x2x256xf32, #tpu.memory_space<vmem>>, vector<1x2x256xf32>
    %238 = vector.shape_cast %237 : vector<1x2x256xf32> to vector<2x256xf32>
    %c0_86 = arith.constant 0 : index
    %c0_87 = arith.constant 0 : index
    %239 = vector.load %arg4[%c0_86, %c0_87] : memref<344x64xf32, #tpu.memory_space<vmem>>, vector<256x64xf32>
    %cst_88 = arith.constant dense<0.000000e+00> : vector<2x64xf32>
    %240 = tpu.matmul %238, %239, %cst_88 {dimension_numbers = #tpu.dot_dimension_numbers<[1], [0], [0], [1], [0, 0, 1, 1], [], []>, precision = #tpu.contract_precision<fp32>} : vector<2x256xf32>, vector<256x64xf32>, vector<2x64xf32> -> vector<2x64xf32>
    %c11 = arith.constant 11 : index
    %c0_89 = arith.constant 0 : index
    %241 = vector.load %arg5[%c11, %c0_89] : memref<17x64xf32, #tpu.memory_space<vmem>>, vector<1x64xf32>
    %c12 = arith.constant 12 : index
    %c0_90 = arith.constant 0 : index
    %242 = vector.load %arg5[%c12, %c0_90] : memref<17x64xf32, #tpu.memory_space<vmem>>, vector<1x64xf32>
    %243 = vector.broadcast %241 : vector<1x64xf32> to vector<2x64xf32>
    %244 = arith.mulf %240, %243 : vector<2x64xf32>
    %245 = vector.broadcast %242 : vector<1x64xf32> to vector<2x64xf32>
    %246 = arith.addf %244, %245 : vector<2x64xf32>
    %cst_91 = arith.constant 0.000000e+00 : f32
    %247 = vector.broadcast %cst_91 : f32 to vector<2x64xf32>
    %248 = arith.maximumf %246, %247 : vector<2x64xf32>
    %c256 = arith.constant 256 : index
    %c0_92 = arith.constant 0 : index
    %249 = vector.load %arg4[%c256, %c0_92] : memref<344x64xf32, #tpu.memory_space<vmem>>, vector<64x16xf32>
    %cst_93 = arith.constant dense<0.000000e+00> : vector<2x16xf32>
    %250 = tpu.matmul %248, %249, %cst_93 {dimension_numbers = #tpu.dot_dimension_numbers<[1], [0], [0], [1], [0, 0, 1, 1], [], []>} : vector<2x64xf32>, vector<64x16xf32>, vector<2x16xf32> -> vector<2x16xf32>
    %c13 = arith.constant 13 : index
    %c0_94 = arith.constant 0 : index
    %251 = vector.load %arg5[%c13, %c0_94] : memref<17x64xf32, #tpu.memory_space<vmem>>, vector<1x16xf32>
    %c14 = arith.constant 14 : index
    %c0_95 = arith.constant 0 : index
    %252 = vector.load %arg5[%c14, %c0_95] : memref<17x64xf32, #tpu.memory_space<vmem>>, vector<1x16xf32>
    %253 = vector.broadcast %251 : vector<1x16xf32> to vector<2x16xf32>
    %254 = arith.mulf %250, %253 : vector<2x16xf32>
    %255 = vector.broadcast %252 : vector<1x16xf32> to vector<2x16xf32>
    %256 = arith.addf %254, %255 : vector<2x16xf32>
    %cst_96 = arith.constant 0.000000e+00 : f32
    %257 = vector.broadcast %cst_96 : f32 to vector<2x16xf32>
    %258 = arith.maximumf %256, %257 : vector<2x16xf32>
    %c320 = arith.constant 320 : index
    %c0_97 = arith.constant 0 : index
    %259 = vector.load %arg4[%c320, %c0_97] : memref<344x64xf32, #tpu.memory_space<vmem>>, vector<16x2xf32>
    %cst_98 = arith.constant dense<0.000000e+00> : vector<2x2xf32>
    %260 = tpu.matmul %258, %259, %cst_98 {dimension_numbers = #tpu.dot_dimension_numbers<[1], [0], [0], [1], [0, 0, 1, 1], [], []>} : vector<2x16xf32>, vector<16x2xf32>, vector<2x2xf32> -> vector<2x2xf32>
    %c15 = arith.constant 15 : index
    %c0_99 = arith.constant 0 : index
    %261 = vector.load %arg5[%c15, %c0_99] : memref<17x64xf32, #tpu.memory_space<vmem>>, vector<1x2xf32>
    %262 = vector.broadcast %261 : vector<1x2xf32> to vector<2x2xf32>
    %263 = arith.addf %260, %262 : vector<2x2xf32>
    %c336 = arith.constant 336 : index
    %c0_100 = arith.constant 0 : index
    %264 = vector.load %arg4[%c336, %c0_100] : memref<344x64xf32, #tpu.memory_space<vmem>>, vector<2x8xf32>
    %c16_101 = arith.constant 16 : index
    %c0_102 = arith.constant 0 : index
    %265 = vector.load %arg5[%c16_101, %c0_102] : memref<17x64xf32, #tpu.memory_space<vmem>>, vector<1x8xf32>
    %266 = arith.addf %236, %263 : vector<2x2xf32>
    %cst_103 = arith.constant dense<0.000000e+00> : vector<2x8xf32>
    %267 = tpu.matmul %266, %264, %cst_103 {dimension_numbers = #tpu.dot_dimension_numbers<[1], [0], [0], [1], [0, 0, 1, 1], [], []>} : vector<2x2xf32>, vector<2x8xf32>, vector<2x8xf32> -> vector<2x8xf32>
    %268 = vector.broadcast %265 : vector<1x8xf32> to vector<2x8xf32>
    %269 = arith.addf %267, %268 : vector<2x8xf32>
    %c0_104 = arith.constant 0 : index
    %c0_105 = arith.constant 0 : index
    %c0_106 = arith.constant 0 : index
    %270 = vector.load %arg6[%c0_104, %c0_105, %c0_106] : memref<1x2x8xf32, #tpu.memory_space<vmem>>, vector<1x2x8xf32>
    %271 = vector.shape_cast %270 : vector<1x2x8xf32> to vector<2x8xf32>
    %272 = vector.shape_cast %269 : vector<2x8xf32> to vector<1x2x8xf32>
    tpu.vector_store %arg6[%c0_104, %c0_105, %c0_106], %272 {strides = array<i32>} : memref<1x2x8xf32, #tpu.memory_space<vmem>>, vector<1x2x8xf32>,
    return
  }
  func.func @transform_0(%arg0: i32) -> (i32, i32) {
    %c0_i32 = arith.constant 0 : i32
    %c0_i32_0 = arith.constant 0 : i32
    return %arg0, %c0_i32 : i32, i32
  }
  func.func @transform_1(%arg0: i32) -> (i32, i32, i32) {
    %c0_i32 = arith.constant 0 : i32
    %c0_i32_0 = arith.constant 0 : i32
    %c0_i32_1 = arith.constant 0 : i32
    return %arg0, %c0_i32, %c0_i32_0 : i32, i32, i32
  }
  func.func @transform_2(%arg0: i32) -> (i32, i32) {
    %c0_i32 = arith.constant 0 : i32
    %c0_i32_0 = arith.constant 0 : i32
    %c0_i32_1 = arith.constant 0 : i32
    return %c0_i32, %c0_i32_0 : i32, i32
  }
  func.func @transform_3(%arg0: i32) -> (i32, i32) {
    %c0_i32 = arith.constant 0 : i32
    %c0_i32_0 = arith.constant 0 : i32
    %c0_i32_1 = arith.constant 0 : i32
    return %c0_i32, %c0_i32_0 : i32, i32
  }
  func.func @transform_4(%arg0: i32) -> (i32, i32) {
    %c0_i32 = arith.constant 0 : i32
    %c0_i32_0 = arith.constant 0 : i32
    %c0_i32_1 = arith.constant 0 : i32
    return %c0_i32, %c0_i32_0 : i32, i32
  }
  func.func @transform_5(%arg0: i32) -> (i32, i32, i32) {
    %c0_i32 = arith.constant 0 : i32
    %c0_i32_0 = arith.constant 0 : i32
    %c0_i32_1 = arith.constant 0 : i32
    return %arg0, %c0_i32, %c0_i32_0 : i32, i32, i32
  }
}

</mosaic_0001>

<bundles_post_ra>
// kernel: tpu_custom_call.1
= control target key start
LH: loop header
LB: loop body
LE: loop exit
PB: predicated region body
PF: predicated region fallthrough
CT: control target
= control target key end

     0   :  { %v37_v2 = vlaneseq  ;;  %s4157_s24 = smov 4   ;;  %s4158_s27 = smov 8   ;;  %s6058_s0 = inlined_call_operand.vmem [shape: f32[128,4], index: 0, kind: input, shape index: {}]   ;;  %s6059_s1 = inlined_call_operand.vmem [shape: f32[1,2,256], index: 1, kind: input, shape index: {}]   ;;  %s6060_s2 = inlined_call_operand.vmem [shape: f32[568,64], index: 2, kind: input, shape index: {}]   ;;  %s6061_s3 = inlined_call_operand.vmem [shape: f32[344,64], index: 3, kind: input, shape index: {}]   ;;  %s6062_s4 = inlined_call_operand.vmem [shape: f32[17,64], index: 4, kind: input, shape index: {}]   ;;  %s6063_s5 = inlined_call_operand.hbm [shape: f32[1,2,8], index: 5, kind: output, shape index: {}]  }
   0x1   :  { %v4200_v0 = vld [vmem:[%s6058_s0] sm:$0xff]  ;;  %v22_v1 = vld [vmem:[%s6058_s0 + $0x8] sm:$0xff]  ;;  %v23_v3 = vld [vmem:[%s6058_s0 + $0x10] sm:$0xff] }
   0x2   :  { %280 = vrot.lane.b32.xlu0 %v4200_v0, %s4157_s24  ;;  %v183_v4 = vrot.slane %v4200_v0, 1  ;;  %v184_v5 = vrot.slane %v22_v1, 1  ;;  %v4212_v6 = vshrl.u32 %v37_v2, 7  ;;  %v185_v7 = vrot.slane %v23_v3, 1  ;;  %v24_v8 = vld [vmem:[%s6058_s0 + $0x18] sm:$0xff]  ;;  %v25_v12 = vld [vmem:[%s6058_s0 + $0x20] sm:$0xff] }
   0x3   :  { %v186_v10 = vrot.slane %v24_v8, 1 }
   0x4   :  { %vm199_vm0 = vcmp.lt.s32.totalorder %v4212_v6, 7 }
   0x5   :  { %v214_v9 = vsel %vm199_vm0, %v183_v4, %v184_v5  ;;  %v213_v11 = vsel %vm199_vm0, %v184_v5, %v185_v7 }
   0x6   :  { %282 = vrot.lane.b32.xlu0 %v22_v1, %s4157_s24  ;;  %344 = vrot.lane.b32.xlu1 %v214_v9, %s4158_s27 }
   0x7   :  { %10 = vsyncpa [#allocation3], 0  ;;  %v87_v13 = vrot.slane %v22_v1, 7  ;;  %v212_v14 = vsel %vm199_vm0, %v185_v7, %v186_v10  ;;  %v26_v15 = vld [vmem:[%s6058_s0 + $0x28] sm:$0xff]  ;;  %v187_v16 = vrot.slane %v25_v12, 1  ;;  %v86_v17 = vrot.slane %v4200_v0, 7 }
   0x8   :  { %v88_v18 = vrot.slane %v23_v3, 7  ;;  %v427_v19 = vld [vmem:[%s6060_s2 + $0x8] sm:$0xf]  ;;  %v188_v20 = vrot.slane %v26_v15, 1  ;;  %vm102_vm1 = vcmp.lt.s32.totalorder %v4212_v6, 1  ;;  %v90_v21 = vrot.slane %v25_v12, 7 }
   0x9   :  { %v27_v22 = vld [vmem:[%s6058_s0 + $0x30] sm:$0xff]  ;;  %v29_v23 = vld [vmem:[%s6058_s0 + $0x40] sm:$0xff]  ;;  %v4253_v24 = vsel %vm102_vm1, %v86_v17, %v87_v13  ;;  %vm477_vm2 = vcmask 1043456   ;;  %v211_v26 = vsel %vm199_vm0, %v186_v10, %v187_v16  ;;  %v28_v29 = vld [vmem:[%s6058_s0 + $0x38] sm:$0xff]  ;;  %v89_v31 = vrot.slane %v24_v8, 7  ;;  %s4160_s16 = smov 16  }
   0xa   :  { %284 = vrot.lane.b32.xlu0 %v23_v3, %s4157_s24  ;;  %346 = vrot.lane.b32.xlu1 %v213_v11, %s4158_s27  ;;  %v426_v25 = vld [vmem:[%s6060_s2] sm:$0xff]  ;;  %v92_v27 = vrot.slane %v27_v22, 7  ;;  %v94_v28 = vrot.slane %v29_v23, 7  ;;  %v4267_v30 = vsel %vm102_vm1, %v87_v13, %v88_v18  ;;  %v91_v32 = vrot.slane %v26_v15, 7  ;;  %v31_v43 = vld [vmem:[%s6058_s0 + $0x50] sm:$0xff]  ;;  %s4166_s11 = smov [#allocation2]  }
   0xb   :  { %3908 = vmatprep.subr.msk.mxu0 %vm477_vm2, %v427_v19  ;;  %v210_v33 = vsel %vm199_vm0, %v187_v16, %v188_v20  ;;  %v93_v34 = vrot.slane %v28_v29, 7  ;;  %v4275_v35 = vsel %vm102_vm1, %v88_v18, %v89_v31  ;;  %v4279_v36 = vsel %vm102_vm1, %v89_v31, %v90_v21  ;;  %v30_v44 = vld [vmem:[%s6058_s0 + $0x48] sm:$0xff]  ;;  %v33_v55 = vld [vmem:[%s6058_s0 + $0x60] sm:$0xff]  ;;  %v32_v56 = vld [vmem:[%s6058_s0 + $0x58] sm:$0xff]  ;;  %s3491_s12 = sshll.u32 %s4166_s11, 4  ;;  %s3492_s12 = int_to_ptr.vmem [resolvable:$true] %s3491_s12 }
   0xc   :  { %3909 = vmatpush3.msk.msra.mxu0 %vm477_vm2, %v427_v19  ;;  %v4283_v37 = vsel %vm102_vm1, %v90_v21, %v91_v32  ;;  %v189_v38 = vrot.slane %v27_v22, 1  ;;  %v4287_v39 = vsel %vm102_vm1, %v91_v32, %v92_v27  ;;  %v4298_v42 = vadd.s32 56, %v4212_v6  ;;  %v4348_v3 = vld [vmem:[%s6058_s0 + $0x70] sm:$0xff]  ;;  %v34_v5 = vld [vmem:[%s6058_s0 + $0x68] sm:$0xff]  ;;  %p4140_p1 = scmp.lt.s32.totalorder %s3492_s12, %s3492_s12 }
   0xd   :  { %3910 = vmatprep.subr.mxu0 %v426_v25  ;;  %v4291_v40 = vsel %vm102_vm1, %v92_v27, %v93_v34  ;;  %v4295_v41 = vsel %vm102_vm1, %v93_v34, %v94_v28  ;;  %v96_v45 = vrot.slane %v31_v43, 7  ;;  %v190_v46 = vrot.slane %v28_v29, 1 }
   0xe   :  { %348 = vrot.lane.b32.xlu0 %v212_v14, %s4158_s27  ;;  %286 = vrot.lane.b32.xlu1 %v24_v8, %s4157_s24  ;;  %v95_v47 = vrot.slane %v30_v44, 7  ;;  %v209_v48 = vsel %vm199_vm0, %v188_v20, %v189_v38  ;;  %v191_v49 = vrot.slane %v29_v23, 1  ;;  %v61_v50 = vand.u32 63, %v4298_v42  ;;  %v4384_v20 = vld [vmem:[%s6058_s0 + $0x78] sm:$0xff] }
   0xf   :  { %3911 = vmatpush3.msra.mxu0 %v426_v25  ;;  %v208_v53 = vsel %vm199_vm0, %v189_v38, %v190_v46  ;;  %v98_v57 = vrot.slane %v33_v55, 7  ;;  %v192_v58 = vrot.slane %v30_v44, 1  ;;  %v97_v59 = vrot.slane %v32_v56, 7 }
  0x10   :  { %v4313_v51 = vsel %vm102_vm1, %v94_v28, %v95_v47  ;;  %v4318_v52 = vsel %vm102_vm1, %v95_v47, %v96_v45  ;;  %vm174_vm3 = vcmp.ne.s32.totalorder %v61_v50, 63  ;;  %v207_v54 = vsel %vm199_vm0, %v190_v46, %v191_v49 }
  0x11   :  { %v255_v60 = vsel %vm174_vm3, %v207_v54, 0.0  ;;  %v4335_v61 = vsel %vm102_vm1, %v96_v45, %v97_v59  ;;  %v4340_v62 = vsel %vm102_vm1, %v97_v59, %v98_v57  ;;  %v206_v63 = vsel %vm199_vm0, %v191_v49, %v192_v58 }
  0x12   :  { %288 = vrot.lane.b32.xlu0 %v25_v12, %s4157_s24  ;;  %350 = vrot.lane.b32.xlu1 %v211_v26, %s4158_s27  ;;  %v193_v1 = vrot.slane %v31_v43, 1  ;;  %v100_v7 = vrot.slane %v4348_v3, 7  ;;  %v194_v8 = vrot.slane %v32_v56, 1  ;;  %v99_v9 = vrot.slane %v34_v5, 7 }
  0x13   :  { %v195_v14 = vrot.slane %v33_v55, 1  ;;  %v197_v19 = vrot.slane %v4348_v3, 1  ;;  %v53_v21 = vadd.s32 120, %v4212_v6  ;;  %v101_v31 = vrot.slane %v4384_v20, 7 }
  0x14   :  { %v205_v10 = vsel %vm199_vm0, %v192_v58, %v193_v1  ;;  %v4360_v11 = vsel %vm102_vm1, %v98_v57, %v99_v9  ;;  %v4367_v12 = vsel %vm102_vm1, %v99_v9, %v100_v7  ;;  %v204_v13 = vsel %vm199_vm0, %v193_v1, %v194_v8 }
  0x15   :  { %v203_v16 = vsel %vm199_vm0, %v194_v8, %v195_v14  ;;  %v69_v25 = vand.u32 63, %v53_v21  ;;  %vm392_vm6 = vcmask 31744   ;;  %vm409_vm7 = vcmask 64512  }
  0x16   :  { %352 = vrot.lane.b32.xlu0 %v210_v33, %s4158_s27  ;;  %290 = vrot.lane.b32.xlu1 %v26_v15, %s4157_s24  ;;  %v196_v15 = vrot.slane %v34_v5, 1  ;;  %vm428_vm8 = vcmask 97280   ;;  %v46_v57 = vadd.s32 64, %v4212_v6 }
  0x17   :  { %vm182_vm4 = vcmp.ne.s32.totalorder %v69_v25, 63 }
  0x18   :  { %v202_v18 = vsel %vm199_vm0, %v195_v14, %v196_v15 }
  0x1a   :  { %292 = vrot.lane.b32.xlu0 %v27_v22, %s4157_s24  ;;  %354 = vrot.lane.b32.xlu1 %v209_v48, %s4158_s27  ;;  %v198_v22 = vrot.slane %v4384_v20, 1 }
  0x1c   :  { %v200_v26 = vsel %vm199_vm0, %v197_v19, %v198_v22  ;;  %v215_v27 = vsel %vm199_vm0, %v198_v22, %v183_v4  ;;  %v118_v4 = vsel %vm102_vm1, %v101_v31, %v86_v17 }
  0x1d   :  { %v263_v28 = vsel %vm182_vm4, %v215_v27, 0.0 }
  0x1e   :  { %356 = vrot.lane.b32.xlu0 %v208_v53, %s4158_s27  ;;  %294 = vrot.lane.b32.xlu1 %v28_v29, %s4157_s24  ;;  %v54_v29 = vand.u32 63, %v4212_v6 }
  0x20   :  { %vm70_vm5 = vcmp.ne.s32.totalorder %v54_v29, 0 }
  0x21   :  { %v151_v33 = vsel %vm70_vm5, %v118_v4, 0.0 }
  0x22   :  { %296 = vrot.lane.b32.xlu0 %v29_v23, %s4157_s24  ;;  %358 = vrot.lane.b32.xlu1 %v255_v60, %s4158_s27  ;;  %v201_v23 = vsel %vm199_vm0, %v196_v15, %v197_v19 }
  0x26   :  { %360 = vrot.lane.b32.xlu0 %v206_v63, %s4158_s27  ;;  %298 = vrot.lane.b32.xlu1 %v30_v44, %s4157_s24  ;;  %v62_v63 = vand.u32 63, %v46_v57 }
  0x28   :  { %vm78_vm9 = vcmp.ne.s32.totalorder %v62_v63, 0 }
  0x2a   :  { %300 = vrot.lane.b32.xlu0 %v31_v43, %s4157_s24  ;;  %362 = vrot.lane.b32.xlu1 %v205_v10, %s4158_s27 }
  0x2e   :  { %364 = vrot.lane.b32.xlu0 %v204_v13, %s4158_s27  ;;  %302 = vrot.lane.b32.xlu1 %v32_v56, %s4157_s24  ;;  %v159_v13 = vsel %vm78_vm9, %v4295_v41, 0.0 }
  0x32   :  { %304 = vrot.lane.b32.xlu0 %v33_v55, %s4157_s24  ;;  %366 = vrot.lane.b32.xlu1 %v203_v16, %s4158_s27 }
  0x36   :  { %368 = vrot.lane.b32.xlu0 %v202_v18, %s4158_s27  ;;  %306 = vrot.lane.b32.xlu1 %v34_v5, %s4157_s24 }
  0x3a   :  { %308 = vrot.lane.b32.xlu0 %v4348_v3, %s4157_s24  ;;  %370 = vrot.lane.b32.xlu1 %v201_v23, %s4158_s27  ;;  %v4159_v3 = vmov 1.0  }
  0x3e   :  { %372 = vrot.lane.b32.xlu0 %v200_v26, %s4158_s27  ;;  %310 = vrot.lane.b32.xlu1 %v4384_v20, %s4157_s24  ;;  %s4162_s24 = smov 32  }
  0x42   :  { %374 = vrot.lane.b32.xlu1 %v263_v28, %s4158_s27 }
  0x74   :  { %v281_v32 = vpop.permute.xlu0 %280 }
  0x75   :  { %v393_v34 = vsel %vm392_vm6, %v151_v33, %v281_v32 }
  0x78   :  { %v283_v38 = vpop.permute.xlu0 %282  ;;  %v345_v43 = vpop.permute.xlu1 %344 }
  0x79   :  { %v410_v44 = vsel %vm409_vm7, %v393_v34, %v345_v43  ;;  %v394_v45 = vsel %vm392_vm6, %v4253_v24, %v283_v38 }
  0x7a   :  { %3912 = vmatprep.mubr.msk.f32.mxu0 %vm428_vm8, %v410_v44 }
  0x7c   :  { %v285_v0 = vpop.permute.xlu0 %284  ;;  %v347_v46 = vpop.permute.xlu1 %346 }
  0x7d   :  { %v395_v17 = vsel %vm392_vm6, %v4267_v30, %v285_v0  ;;  %v411_v47 = vsel %vm409_vm7, %v394_v45, %v347_v46 }
  0x7e   :  { %3913 = vmatmul.mubr.msk.f32.vlgmr.msra.gmra.mxu0 %vm428_vm8, %v411_v47  ;;  %v103_v47 = vsel %vm102_vm1, %v100_v7, %v101_v31 }
  0x80   :  { %v349_v48 = vpop.permute.xlu0 %348  ;;  %v287_v50 = vpop.permute.xlu1 %286 }
  0x81   :  { %v412_v49 = vsel %vm409_vm7, %v395_v17, %v349_v48  ;;  %v396_v24 = vsel %vm392_vm6, %v4275_v35, %v287_v50  ;;  %v4486_v50 = vmul.u32 2, %v4212_v6 }
  0x82   :  { %3915 = vmatprep.mubr.msk.f32.mxu0 %vm428_vm8, %v412_v49  ;;  %v4483_v49 = vand.u32 127, %v37_v2 }
  0x83   :  { %6162 = vst [vmem:[#allocation6_spill] sm:$0xff] %v4486_v50 }
  0x84   :  { %v289_v53 = vpop.permute.xlu0 %288  ;;  %v351_v54 = vpop.permute.xlu1 %350  ;;  %6161 = vst [vmem:[#allocation5_spill] sm:$0xff] %v4483_v49  ;;  %vm742_vm10 = vcmp.eq.s32.totalorder %v4483_v49, %v4486_v50  ;;  %v2136_v50 = vld [vmem:[%s6060_s2 + $0x230] sm:$0xff] }
  0x85   :  { %v397_v55 = vsel %vm392_vm6, %v4279_v36, %v289_v53  ;;  %v413_v30 = vsel %vm409_vm7, %v396_v24, %v351_v54  ;;  %3968 = vmatprep.mubr.msk.f32.mxu1 %vm742_vm10, %v4159_v3 }
  0x86   :  { %3916 = vmatmul.mubr.msk.f32.gmra.mxu0 %vm428_vm8, %v413_v30 }
  0x88   :  { %v353_v56 = vpop.permute.xlu0 %352  ;;  %v291_v59 = vpop.permute.xlu1 %290 }
  0x89   :  { %v414_v58 = vsel %vm409_vm7, %v397_v55, %v353_v56  ;;  %v398_v35 = vsel %vm392_vm6, %v4283_v37, %v291_v59 }
  0x8a   :  { %3918 = vmatprep.mubr.msk.f32.mxu0 %vm428_vm8, %v414_v58 }
  0x8c   :  { %v293_v60 = vpop.permute.xlu0 %292  ;;  %v355_v1 = vpop.permute.xlu1 %354 }
  0x8d   :  { %v399_v36 = vsel %vm392_vm6, %v4287_v39, %v293_v60  ;;  %v415_v5 = vsel %vm409_vm7, %v398_v35, %v355_v1  ;;  %v4503_v60 = vld [vmem:[%s6062_s4] ss:$0 sm:$0xff]  ;;  %v4509_v1 = vld [vmem:[%s6062_s4 + $0x1] ss:$0 sm:$0xff] }
  0x8e   :  { %3919 = vmatmul.mubr.msk.f32.gmra.mxu0 %vm428_vm8, %v415_v5 }
  0x90   :  { %v357_v8 = vpop.permute.xlu0 %356  ;;  %v295_v10 = vpop.permute.xlu1 %294 }
  0x91   :  { %v416_v9 = vsel %vm409_vm7, %v399_v36, %v357_v8  ;;  %v400_v37 = vsel %vm392_vm6, %v4291_v40, %v295_v10 }
  0x92   :  { %3921 = vmatprep.mubr.msk.f32.mxu0 %vm428_vm8, %v416_v9 }
  0x94   :  { %v297_v14 = vpop.permute.xlu0 %296  ;;  %v359_v15 = vpop.permute.xlu1 %358 }
  0x95   :  { %v401_v39 = vsel %vm392_vm6, %v159_v13, %v297_v14  ;;  %v417_v16 = vsel %vm409_vm7, %v400_v37, %v359_v15 }
  0x96   :  { %3922 = vmatmul.mubr.msk.f32.gmra.mxu0 %vm428_vm8, %v417_v16 }
  0x98   :  { %v361_v18 = vpop.permute.xlu0 %360  ;;  %v299_v21 = vpop.permute.xlu1 %298 }
  0x99   :  { %v418_v19 = vsel %vm409_vm7, %v401_v39, %v361_v18  ;;  %v402_v41 = vsel %vm392_vm6, %v4313_v51, %v299_v21 }
  0x9a   :  { %3924 = vmatprep.mubr.msk.f32.mxu0 %vm428_vm8, %v418_v19 }
  0x9c   :  { %v301_v22 = vpop.permute.xlu0 %300  ;;  %v363_v23 = vpop.permute.xlu1 %362 }
  0x9d   :  { %v403_v40 = vsel %vm392_vm6, %v4318_v52, %v301_v22  ;;  %v419_v25 = vsel %vm409_vm7, %v402_v41, %v363_v23 }
  0x9e   :  { %3925 = vmatmul.mubr.msk.f32.gmra.mxu0 %vm428_vm8, %v419_v25 }
  0xa0   :  { %v365_v26 = vpop.permute.xlu0 %364  ;;  %v303_v28 = vpop.permute.xlu1 %302 }
  0xa1   :  { %v420_v27 = vsel %vm409_vm7, %v403_v40, %v365_v26  ;;  %v404_v4 = vsel %vm392_vm6, %v4335_v61, %v303_v28 }
  0xa2   :  { %3927 = vmatprep.mubr.msk.f32.mxu0 %vm428_vm8, %v420_v27 }
  0xa4   :  { %v305_v29 = vpop.permute.xlu0 %304  ;;  %v367_v32 = vpop.permute.xlu1 %366 }
  0xa5   :  { %v405_v51 = vsel %vm392_vm6, %v4340_v62, %v305_v29  ;;  %v421_v52 = vsel %vm409_vm7, %v404_v4, %v367_v32 }
  0xa6   :  { %3928 = vmatmul.mubr.msk.f32.gmra.mxu0 %vm428_vm8, %v421_v52 }
  0xa8   :  { %v369_v33 = vpop.permute.xlu0 %368  ;;  %v307_v38 = vpop.permute.xlu1 %306 }
  0xa9   :  { %v422_v34 = vsel %vm409_vm7, %v405_v51, %v369_v33  ;;  %v406_v44 = vsel %vm392_vm6, %v4360_v11, %v307_v38 }
  0xaa   :  { %3930 = vmatprep.mubr.msk.f32.mxu0 %vm428_vm8, %v422_v34 }
  0xac   :  { %v309_v43 = vpop.permute.xlu0 %308  ;;  %v371_v45 = vpop.permute.xlu1 %370 }
  0xad   :  { %v407_v61 = vsel %vm392_vm6, %v4367_v12, %v309_v43  ;;  %v423_v62 = vsel %vm409_vm7, %v406_v44, %v371_v45 }
  0xae   :  { %3931 = vmatmul.mubr.msk.f32.gmra.mxu0 %vm428_vm8, %v423_v62 }
  0xb0   :  { %v373_v0 = vpop.permute.xlu0 %372  ;;  %v311_v17 = vpop.permute.xlu1 %310 }
  0xb1   :  { %v424_v46 = vsel %vm409_vm7, %v407_v61, %v373_v0  ;;  %v408_v11 = vsel %vm392_vm6, %v103_v47, %v311_v17 }
  0xb2   :  { %3933 = vmatprep.mubr.msk.f32.mxu0 %vm428_vm8, %v424_v46 }
  0xb4   :  { %v375_v12 = vpop.permute.xlu1 %374 }
  0xb5   :  { %v425_v48 = vsel %vm409_vm7, %v408_v11, %v375_v12 }
  0xb6   :  { %3934 = vmatmul.mubr.msk.f32.gmra.mxu0 %vm428_vm8, %v425_v48 }
 0x13e   :  { %v4494_v7 = vpop.f32.mrf.mxu0 }
 0x140   :  { %v547_v20 = vpop.f32.mrf.mxu0 }
 0x141   :  { %v632_v63 = vmul.f32 %v4503_v60, %v547_v20 }
 0x143   :  { %v4514_v8 = vadd.f32 %v4509_v1, %v632_v63 }
 0x145   :  { %v668_v39 = vmax.f32 %v4514_v8, 0.0  ;;  %v44_v8 = vadd.s32 48, %v4212_v6 }
 0x146   :  { %v4496_v31 = vpop.f32.mrf.mxu0 }
 0x147   :  { %v4531_v28 = vrot.slane %v668_v39, 1 }
 0x148   :  { %v4498_v53 = vpop.f32.mrf.mxu0 }
 0x14e   :  { %v3920_v2 = vpop.f32.mrf.mxu0 }
 0x14f   :  { %v637_v0 = vmul.f32 %v3920_v2, %v4503_v60 }
 0x150   :  { %v567_v24 = vpop.f32.mrf.mxu0 }
 0x151   :  { %v636_v46 = vmul.f32 %v4503_v60, %v567_v24 }
 0x153   :  { %v656_v63 = vadd.f32 %v4509_v1, %v636_v46 }
 0x156   :  { %v3923_v54 = vpop.f32.mrf.mxu0 }
 0x157   :  { %v639_v29 = vmul.f32 %v3923_v54, %v4503_v60 }
 0x158   :  { %v577_v55 = vpop.f32.mrf.mxu0 }
 0x159   :  { %v638_v4 = vmul.f32 %v4503_v60, %v577_v55  ;;  %v659_v11 = vadd.f32 %v4509_v1, %v639_v29 }
 0x15b   :  { %v658_v12 = vadd.f32 %v4509_v1, %v638_v4 }
 0x15e   :  { %v3926_v30 = vpop.f32.mrf.mxu0 }
 0x15f   :  { %v641_v21 = vmul.f32 %v3926_v30, %v4503_v60 }
 0x160   :  { %v587_v56 = vpop.f32.mrf.mxu0 }
 0x161   :  { %v640_v22 = vmul.f32 %v4503_v60, %v587_v56  ;;  %v661_v52 = vadd.f32 %v4509_v1, %v641_v21  ;;  %v635_v56 = vmul.f32 %v4496_v31, %v4503_v60 }
 0x163   :  { %v660_v33 = vadd.f32 %v4509_v1, %v640_v22  ;;  %v677_v48 = vmax.f32 %v661_v52, 0.0 }
 0x165   :  { %v676_v54 = vmax.f32 %v660_v33, 0.0 }
 0x166   :  { %v3929_v57 = vpop.f32.mrf.mxu0 }
 0x167   :  { %v643_v9 = vmul.f32 %v3929_v57, %v4503_v60  ;;  %v634_v57 = vmul.f32 %v4503_v60, %v4498_v53 }
 0x168   :  { %v597_v58 = vpop.f32.mrf.mxu0 }
 0x169   :  { %v642_v10 = vmul.f32 %v4503_v60, %v597_v58  ;;  %v663_v41 = vadd.f32 %v4509_v1, %v643_v9  ;;  %v693_v9 = vrot.slane %v677_v48, 1 }
 0x16b   :  { %v662_v23 = vadd.f32 %v4509_v1, %v642_v10  ;;  %v679_v34 = vmax.f32 %v663_v41, 0.0  ;;  %v692_v10 = vrot.slane %v676_v54, 1 }
 0x16d   :  { %v678_v38 = vmax.f32 %v662_v23, 0.0  ;;  %v695_v55 = vrot.slane %v679_v34, 1  ;;  %v706_v41 = vsel %vm199_vm0, %v692_v10, %v693_v9 }
 0x16e   :  { %v3932_v59 = vpop.f32.mrf.mxu0 }
 0x16f   :  { %v645_v36 = vmul.f32 %v3932_v59, %v4503_v60  ;;  %v694_v30 = vrot.slane %v678_v38, 1  ;;  %v657_v59 = vadd.f32 %v4509_v1, %v637_v0  ;;  %v4582_v0 = vadd.s32 8, %v4212_v6 }
 0x170   :  { %v607_v35 = vpop.f32.mrf.mxu0 }
 0x171   :  { %v644_v5 = vmul.f32 %v4503_v60, %v607_v35  ;;  %v665_v14 = vadd.f32 %v4509_v1, %v645_v36  ;;  %v675_v35 = vmax.f32 %v659_v11, 0.0  ;;  %v704_v31 = vsel %vm199_vm0, %v694_v30, %v695_v55 }
 0x173   :  { %v664_v37 = vadd.f32 %v4509_v1, %v644_v5  ;;  %v681_v40 = vmax.f32 %v665_v14, 0.0  ;;  %v674_v5 = vmax.f32 %v658_v12, 0.0  ;;  %v705_v14 = vsel %vm199_vm0, %v693_v9, %v694_v30  ;;  %v1056_v9 = vld [vmem:[%s6060_s2 + $0x10] sm:$0xff] }
 0x174   :  { %v691_v21 = vrot.slane %v675_v35, 1  ;;  %v4598_v30 = vadd.s32 32, %v4212_v6 }
 0x175   :  { %v680_v25 = vmax.f32 %v664_v37, 0.0  ;;  %v697_v43 = vrot.slane %v681_v40, 1  ;;  %v655_v37 = vadd.f32 %v4509_v1, %v635_v56  ;;  %v690_v22 = vrot.slane %v674_v5, 1 }
 0x176   :  { %v3935_v13 = vpop.f32.mrf.mxu0  ;;  %v43_v56 = vadd.s32 40, %v4212_v6 }
 0x177   :  { %v647_v15 = vmul.f32 %v3935_v13, %v4503_v60  ;;  %v696_v44 = vrot.slane %v680_v25, 1  ;;  %v633_v13 = vmul.f32 %v4494_v7, %v4503_v60  ;;  %v725_v7 = vmax.f32 %v677_v48, %v705_v14 }
 0x178   :  { %v617_v16 = vpop.f32.mrf.mxu0  ;;  %v708_v4 = vsel %vm199_vm0, %v690_v22, %v691_v21  ;;  %v735_v48 = vmul.u32 2, %v4582_v0 }
 0x179   :  { %v667_v18 = vadd.f32 %v4509_v1, %v647_v15  ;;  %v646_v19 = vmul.f32 %v4503_v60, %v617_v16  ;;  %v702_v2 = vsel %vm199_vm0, %v696_v44, %v697_v43  ;;  %v703_v58 = vsel %vm199_vm0, %v695_v55, %v696_v44 }
 0x17a   :  { %v728_v36 = vmax.f32 %v680_v25, %v702_v2  ;;  %v727_v53 = vmax.f32 %v679_v34, %v703_v58  ;;  %v654_v15 = vadd.f32 %v4509_v1, %v634_v57  ;;  %v673_v16 = vmax.f32 %v657_v59, 0.0  ;;  %v1442_v57 = vld [vmem:[%s6060_s2 + $0x48] sm:$0xff] }
 0x17b   :  { %v683_v26 = vmax.f32 %v667_v18, 0.0  ;;  %v666_v27 = vadd.f32 %v4509_v1, %v646_v19  ;;  %v726_v18 = vmax.f32 %v678_v38, %v704_v31  ;;  %v672_v19 = vmax.f32 %v656_v63, 0.0 }
 0x17c   :  { %v707_v60 = vsel %vm199_vm0, %v691_v21, %v692_v10  ;;  %v653_v23 = vadd.f32 %v4509_v1, %v633_v13  ;;  %v724_v25 = vmax.f32 %v676_v54, %v706_v41  ;;  %v722_v52 = vmax.f32 %v674_v5, %v708_v4  ;;  %v1057_v5 = vld [vmem:[%s6060_s2 + $0x18] sm:$0xff] }
 0x17d   :  { %v699_v32 = vrot.slane %v683_v26, 1  ;;  %v682_v51 = vmax.f32 %v666_v27, 0.0  ;;  %v689_v27 = vrot.slane %v673_v16, 1  ;;  %v688_v29 = vrot.slane %v672_v19, 1 }
 0x17e   :  { %v669_v33 = vmax.f32 %v653_v23, 0.0  ;;  %vm4603_vm11 = vcmp.eq.s32.totalorder %v4483_v49, %v735_v48  ;;  %v738_v58 = vmul.u32 2, %v4598_v30  ;;  %v739_v59 = vmul.u32 2, %v43_v56 }
 0x17f   :  { %v698_v45 = vrot.slane %v682_v51, 1  ;;  %v715_v61 = vsel %vm199_vm0, %v699_v32, %v4531_v28  ;;  %v710_v38 = vsel %vm199_vm0, %v688_v29, %v689_v27  ;;  %v740_v63 = vmul.u32 2, %v44_v8 }
 0x180   :  { %v731_v62 = vmax.f32 %v683_v26, %v715_v61  ;;  %v670_v26 = vmax.f32 %v654_v15, 0.0  ;;  %v685_v61 = vrot.slane %v669_v33, 1  ;;  %vm746_vm14 = vcmp.eq.s32.totalorder %v4483_v49, %v738_v58 }
 0x181   :  { %v700_v17 = vsel %vm199_vm0, %v698_v45, %v699_v32  ;;  %v701_v47 = vsel %vm199_vm0, %v697_v43, %v698_v45  ;;  %v723_v32 = vmax.f32 %v675_v35, %v707_v60  ;;  %v720_v45 = vmax.f32 %v672_v19, %v710_v38 }
 0x182   :  { %3936 = vmatprep.subr.mxu1 %v731_v62  ;;  %v730_v20 = vmax.f32 %v682_v51, %v700_v17  ;;  %v729_v24 = vmax.f32 %v681_v40, %v701_v47  ;;  %v671_v40 = vmax.f32 %v655_v37, 0.0  ;;  %v709_v51 = vsel %vm199_vm0, %v689_v27, %v690_v22 }
 0x183   :  { %3937 = vmatpush3.msra.mxu1 %v731_v62  ;;  %v686_v34 = vrot.slane %v670_v26, 1  ;;  %v721_v43 = vmax.f32 %v673_v16, %v709_v51  ;;  %v4585_v17 = vadd.s32 16, %v4212_v6  ;;  %v714_v12 = vsel %vm199_vm0, %v4531_v28, %v685_v61  ;;  %v1443_v28 = vld [vmem:[%s6060_s2 + $0x50] sm:$0xff] }
 0x184   :  { %3938 = vmatprep.subr.mxu1 %v730_v20  ;;  %v687_v1 = vrot.slane %v671_v40, 1  ;;  %v716_v2 = vmax.f32 %v668_v39, %v714_v12  ;;  %vm747_vm15 = vcmp.eq.s32.totalorder %v4483_v49, %v739_v59  ;;  %v741_v35 = vmul.u32 2, %v4298_v42  ;;  %v1440_v39 = vld [vmem:[%s6060_s2 + $0x38] sm:$0xff] }
 0x185   :  { %3939 = vmatpush3.msra.mxu1 %v730_v20  ;;  %v713_v47 = vsel %vm199_vm0, %v685_v61, %v686_v34  ;;  %v4594_v20 = vadd.s32 24, %v4212_v6  ;;  %v736_v55 = vmul.u32 2, %v4585_v17  ;;  %vm748_vm3 = vcmp.eq.s32.totalorder %v4483_v49, %v740_v63 }
 0x186   :  { %3940 = vmatprep.subr.mxu1 %v729_v24  ;;  %v711_v44 = vsel %vm199_vm0, %v687_v1, %v688_v29  ;;  %v712_v62 = vsel %vm199_vm0, %v686_v34, %v687_v1  ;;  %v717_v54 = vmax.f32 %v669_v33, %v713_v47  ;;  %vm749_vm4 = vcmp.eq.s32.totalorder %v4483_v49, %v741_v35 }
 0x187   :  { %3941 = vmatpush3.msra.mxu1 %v729_v24  ;;  %v719_v46 = vmax.f32 %v671_v40, %v711_v44  ;;  %v718_v11 = vmax.f32 %v670_v26, %v712_v62  ;;  %v737_v24 = vmul.u32 2, %v4594_v20  ;;  %vm4610_vm12 = vcmp.eq.s32.totalorder %v4483_v49, %v736_v55 }
 0x188   :  { %3942 = vmatprep.subr.mxu1 %v728_v36  ;;  %v874_v51 = vand.u32 31, %v4594_v20 }
 0x189   :  { %3943 = vmatpush3.msra.mxu1 %v728_v36  ;;  %vm4623_vm13 = vcmp.eq.s32.totalorder %v4483_v49, %v737_v24  ;;  %v1058_v36 = vld [vmem:[%s6060_s2 + $0x20] sm:$0xff] }
 0x18a   :  { %3944 = vmatprep.subr.mxu1 %v727_v53  ;;  %3980 = vmatprep.subr.mxu0 %v1058_v36  ;;  %vm930_vm5 = vcmp.ne.s32.totalorder %v874_v51, 31 }
 0x18b   :  { %3945 = vmatpush3.msra.mxu1 %v727_v53  ;;  %3981 = vmatpush3.msra.mxu0 %v1058_v36 }
 0x18c   :  { %3946 = vmatprep.subr.mxu1 %v726_v18  ;;  %3982 = vmatprep.subr.mxu0 %v1057_v5 }
 0x18d   :  { %3947 = vmatpush3.msra.mxu1 %v726_v18  ;;  %3983 = vmatpush3.msra.mxu0 %v1057_v5 }
 0x18e   :  { %3948 = vmatprep.subr.mxu1 %v725_v7  ;;  %3984 = vmatprep.subr.mxu0 %v1056_v9 }
 0x18f   :  { %3949 = vmatpush3.msra.mxu1 %v725_v7  ;;  %3985 = vmatpush3.msra.mxu0 %v1056_v9 }
 0x190   :  { %3950 = vmatprep.subr.mxu1 %v724_v25  ;;  %4020 = vmatprep.subr.mxu0 %v1443_v28 }
 0x191   :  { %3951 = vmatpush3.msra.mxu1 %v724_v25 }
 0x192   :  { %3952 = vmatprep.subr.mxu1 %v723_v32 }
 0x193   :  { %3953 = vmatpush3.msra.mxu1 %v723_v32 }
 0x194   :  { %3954 = vmatprep.subr.mxu1 %v722_v52 }
 0x195   :  { %3955 = vmatpush3.msra.mxu1 %v722_v52 }
 0x196   :  { %3956 = vmatprep.subr.mxu1 %v721_v43 }
 0x197   :  { %3957 = vmatpush3.msra.mxu1 %v721_v43 }
 0x198   :  { %3958 = vmatprep.subr.mxu1 %v720_v45 }
 0x199   :  { %3959 = vmatpush3.msra.mxu1 %v720_v45 }
 0x19a   :  { %3960 = vmatprep.subr.mxu1 %v719_v46 }
 0x19b   :  { %3961 = vmatpush3.msra.mxu1 %v719_v46  ;;  %v878_v46 = vand.u32 31, %v4298_v42 }
 0x19c   :  { %3962 = vmatprep.subr.mxu1 %v718_v11 }
 0x19d   :  { %3963 = vmatpush3.msra.mxu1 %v718_v11  ;;  %vm934_vm8 = vcmp.ne.s32.totalorder %v878_v46, 31 }
 0x19e   :  { %3964 = vmatprep.subr.mxu1 %v717_v54 }
 0x19f   :  { %3965 = vmatpush3.msra.mxu1 %v717_v54  ;;  %v871_v54 = vand.u32 31, %v4212_v6 }
 0x1a0   :  { %3966 = vmatprep.subr.mxu1 %v716_v2 }
 0x1a1   :  { %3967 = vmatpush3.msra.mxu1 %v716_v2  ;;  %vm879_vm9 = vcmp.ne.s32.totalorder %v871_v54, 0 }
 0x1a2   :  { %3969 = vmatmul.mubr.msk.f32.vlgmr.msra.gmra.mxu1 %vm4603_vm11, %v4159_v3 }
 0x1a3   :  { %3971 = vmatprep.mubr.msk.f32.mxu1 %vm4610_vm12, %v4159_v3 }
 0x1a6   :  { %3972 = vmatmul.mubr.msk.f32.gmra.mxu1 %vm4623_vm13, %v4159_v3 }
 0x1a7   :  { %3974 = vmatprep.mubr.msk.f32.mxu1 %vm746_vm14, %v4159_v3  ;;  %vm1047_vm14 = vcmask 130048  }
 0x1aa   :  { %3975 = vmatmul.mubr.msk.f32.gmra.mxu1 %vm747_vm15, %v4159_v3  ;;  %vm1059_vm15 = vcmask 195584  }
 0x1ab   :  { %3977 = vmatprep.mubr.msk.f32.mxu1 %vm748_vm3, %v4159_v3 }
 0x1ae   :  { %3978 = vmatmul.mubr.msk.f32.gmra.mxu1 %vm749_vm4, %v4159_v3  ;;  %vm1247_vm4 = vcmask 523264  }
 0x262   :  { %v3970_v10 = vpop.f32.mrf.mxu1 }
 0x263   :  { %985 = vrot.lane.b32.xlu1 %v3970_v10, %s4158_s27  ;;  %v888_v31 = vrot.slane %v3970_v10, 7  ;;  %v936_v53 = vrot.slane %v3970_v10, 1 }
 0x264   :  { %v832_v3 = vpop.f32.mrf.mxu1 }
 0x265   :  { %v887_v13 = vrot.slane %v832_v3, 7  ;;  %v935_v14 = vrot.slane %v832_v3, 1  ;;  %983 = vrot.lane.b32.xlu0 %v832_v3, %s4158_s27 }
 0x266   :  { %v3973_v37 = vpop.f32.mrf.mxu1 }
 0x267   :  { %989 = vrot.lane.b32.xlu1 %v3973_v37, %s4158_s27  ;;  %v949_v15 = vsel %vm199_vm0, %v935_v14, %v936_v53  ;;  %v4655_v16 = vsel %vm102_vm1, %v887_v13, %v888_v31  ;;  %v890_v18 = vrot.slane %v3973_v37, 7  ;;  %v938_v7 = vrot.slane %v3973_v37, 1 }
 0x268   :  { %v842_v19 = vpop.f32.mrf.mxu1 }
 0x269   :  { %v889_v21 = vrot.slane %v842_v19, 7  ;;  %1015 = vrot.lane.b32.xlu0 %v949_v15, %s4160_s16  ;;  %v937_v22 = vrot.slane %v842_v19, 1 }
 0x26a   :  { %v4658_v41 = vpop.f32.mrf.mxu1 }
 0x26b   :  { %993 = vrot.lane.b32.xlu1 %v4658_v41, %s4158_s27  ;;  %v892_v60 = vrot.slane %v4658_v41, 7  ;;  %v4665_v40 = vsel %vm102_vm1, %v889_v21, %v890_v18  ;;  %v900_v25 = vsel %vm102_vm1, %v888_v31, %v889_v21  ;;  %v948_v29 = vsel %vm199_vm0, %v936_v53, %v937_v22 }
 0x26c   :  { %v852_v23 = vpop.f32.mrf.mxu1  ;;  %v947_v52 = vsel %vm199_vm0, %v937_v22, %v938_v7  ;;  %v940_v44 = vrot.slane %v4658_v41, 1  ;;  %v875_v31 = vand.u32 31, %v4598_v30  ;;  %v6075_v41 = vmov 0.0  }
 0x26d   :  { %v891_v26 = vrot.slane %v852_v23, 7  ;;  %987 = vrot.lane.b32.xlu0 %v842_v19, %s4158_s27  ;;  %v939_v4 = vrot.slane %v852_v23, 1 }
 0x26e   :  { %v4670_v27 = vpop.f32.mrf.mxu1  ;;  %vm883_vm3 = vcmp.ne.s32.totalorder %v875_v31, 0 }
 0x26f   :  { %v894_v32 = vrot.slane %v4670_v27, 7  ;;  %1017 = vrot.lane.b32.xlu1 %v948_v29, %s4160_s16  ;;  %v897_v33 = vsel %vm102_vm1, %v891_v26, %v892_v60  ;;  %v898_v1 = vsel %vm102_vm1, %v890_v18, %v891_v26  ;;  %v946_v43 = vsel %vm199_vm0, %v938_v7, %v939_v4 }
 0x270   :  { %v4690_v38 = vpop.f32.mrf.mxu1  ;;  %v970_v61 = vsel %vm930_vm5, %v946_v43, 0.0  ;;  %v942_v62 = vrot.slane %v4670_v27, 1  ;;  %v945_v47 = vsel %vm199_vm0, %v939_v4, %v940_v44  ;;  %vm1444_vm5 = vcmask 392192  }
 0x271   :  { %1019 = vrot.lane.b32.xlu0 %v947_v52, %s4160_s16  ;;  %v902_v34 = vsel %vm102_vm1, %v894_v32, %v887_v13  ;;  %v941_v45 = vrot.slane %v4690_v38, 1 }
 0x272   :  { %v950_v12 = vsel %vm199_vm0, %v942_v62, %v935_v14  ;;  %v919_v56 = vsel %vm879_vm9, %v902_v34, 0.0 }
 0x273   :  { %997 = vrot.lane.b32.xlu1 %v4670_v27, %s4158_s27  ;;  %v944_v11 = vsel %vm199_vm0, %v940_v44, %v941_v45  ;;  %v974_v48 = vsel %vm934_vm8, %v950_v12, 0.0  ;;  %v943_v42 = vsel %vm199_vm0, %v941_v45, %v942_v62  ;;  %v3542_v45 = vld [vmem:[%s6062_s4 + $0x2] ss:$0 sm:$0xff] }
 0x275   :  { %991 = vrot.lane.b32.xlu0 %v852_v23, %s4158_s27  ;;  %v893_v23 = vrot.slane %v4690_v38, 7 }
 0x277   :  { %1021 = vrot.lane.b32.xlu1 %v970_v61, %s4160_s16  ;;  %v896_v26 = vsel %vm102_vm1, %v892_v60, %v893_v23  ;;  %v895_v4 = vsel %vm102_vm1, %v893_v23, %v894_v32  ;;  %v4757_v60 = vsel %vm742_vm10, 1.0, %v6075_v41  ;;  %vm1433_vm10 = vcmask 261120  }
 0x278   :  { %4014 = vmatprep.mubr.msk.f32.mxu1 %vm1247_vm4, %v4757_v60 }
 0x279   :  { %1023 = vrot.lane.b32.xlu0 %v945_v47, %s4160_s16 }
 0x27b   :  { %1025 = vrot.lane.b32.xlu1 %v944_v11, %s4160_s16  ;;  %v3543_v11 = vld [vmem:[%s6062_s4 + $0x3] ss:$0 sm:$0xff] }
 0x27d   :  { %995 = vrot.lane.b32.xlu0 %v4690_v38, %s4158_s27 }
 0x27f   :  { %1029 = vrot.lane.b32.xlu1 %v974_v48, %s4160_s16 }
 0x281   :  { %1027 = vrot.lane.b32.xlu0 %v943_v42, %s4160_s16 }
 0x2d5   :  { %v986_v55 = vpop.permute.xlu1 %985 }
 0x2d6   :  { %v1040_v36 = vsel %vm409_vm7, %v4655_v16, %v986_v55  ;;  %v923_v16 = vsel %vm883_vm3, %v898_v1, 0.0 }
 0x2d7   :  { %v984_v2 = vpop.permute.xlu0 %983 }
 0x2d8   :  { %v1039_v58 = vsel %vm409_vm7, %v919_v56, %v984_v2 }
 0x2d9   :  { %v990_v24 = vpop.permute.xlu1 %989 }
 0x2da   :  { %v1042_v37 = vsel %vm409_vm7, %v4665_v40, %v990_v24 }
 0x2db   :  { %v1016_v8 = vpop.permute.xlu0 %1015 }
 0x2dc   :  { %v1048_v59 = vsel %vm1047_vm14, %v1039_v58, %v1016_v8 }
 0x2dd   :  { %v994_v63 = vpop.permute.xlu1 %993  ;;  %3986 = vmatprep.mubr.msk.f32.mxu0 %vm1059_vm15, %v1048_v59 }
 0x2de   :  { %v1044_v22 = vsel %vm409_vm7, %v897_v33, %v994_v63 }
 0x2df   :  { %v988_v35 = vpop.permute.xlu0 %987 }
 0x2e0   :  { %v1041_v10 = vsel %vm409_vm7, %v900_v25, %v988_v35 }
 0x2e1   :  { %v1018_v5 = vpop.permute.xlu1 %1017 }
 0x2e2   :  { %v1049_v9 = vsel %vm1047_vm14, %v1040_v36, %v1018_v5 }
 0x2e3   :  { %v1020_v3 = vpop.permute.xlu0 %1019  ;;  %3987 = vmatmul.mubr.msk.f32.vlgmr.msra.gmra.mxu0 %vm1059_vm15, %v1049_v9 }
 0x2e4   :  { %v1050_v53 = vsel %vm1047_vm14, %v1041_v10, %v1020_v3  ;;  %4021 = vmatpush3.msra.mxu0 %v1443_v28 }
 0x2e5   :  { %v998_v13 = vpop.permute.xlu1 %997  ;;  %3989 = vmatprep.mubr.msk.f32.mxu0 %vm1059_vm15, %v1050_v53  ;;  %4022 = vmatprep.subr.mxu0 %v1442_v57 }
 0x2e6   :  { %v1046_v33 = vsel %vm409_vm7, %v895_v4, %v998_v13  ;;  %4023 = vmatpush3.msra.mxu0 %v1442_v57 }
 0x2e7   :  { %v992_v14 = vpop.permute.xlu0 %991 }
 0x2e8   :  { %v1043_v19 = vsel %vm409_vm7, %v923_v16, %v992_v14 }
 0x2e9   :  { %v1022_v15 = vpop.permute.xlu1 %1021 }
 0x2ea   :  { %v1051_v18 = vsel %vm1047_vm14, %v1042_v37, %v1022_v15 }
 0x2eb   :  { %v1024_v21 = vpop.permute.xlu0 %1023  ;;  %3990 = vmatmul.mubr.msk.f32.gmra.mxu0 %vm1059_vm15, %v1051_v18 }
 0x2ec   :  { %v1052_v30 = vsel %vm1047_vm14, %v1043_v19, %v1024_v21 }
 0x2ed   :  { %3992 = vmatprep.mubr.msk.f32.mxu0 %vm1059_vm15, %v1052_v30  ;;  %v1026_v7 = vpop.permute.xlu1 %1025 }
 0x2ee   :  { %v1053_v40 = vsel %vm1047_vm14, %v1044_v22, %v1026_v7 }
 0x2ef   :  { %v996_v25 = vpop.permute.xlu0 %995  ;;  %3993 = vmatmul.mubr.msk.f32.gmra.mxu0 %vm1059_vm15, %v1053_v40 }
 0x2f0   :  { %v1045_v51 = vsel %vm409_vm7, %v896_v26, %v996_v25 }
 0x2f1   :  { %v1030_v29 = vpop.permute.xlu1 %1029 }
 0x2f2   :  { %v1055_v34 = vsel %vm1047_vm14, %v1046_v33, %v1030_v29 }
 0x2f3   :  { %v1028_v52 = vpop.permute.xlu0 %1027 }
 0x2f4   :  { %v1054_v1 = vsel %vm1047_vm14, %v1045_v51, %v1028_v52 }
 0x2f5   :  { %3995 = vmatprep.mubr.msk.f32.mxu0 %vm1059_vm15, %v1054_v1 }
 0x2f6   :  { %3996 = vmatmul.mubr.msk.f32.gmra.mxu0 %vm1059_vm15, %v1055_v34 }
 0x3a3   :  { %v3988_v27 = vpop.f32.mrf.mxu0 }
 0x3a4   :  { %v1196_v63 = vmul.f32 %v3988_v27, %v3542_v45 }
 0x3a5   :  { %v1150_v32 = vpop.f32.mrf.mxu0 }
 0x3a6   :  { %v1195_v61 = vmul.f32 %v3542_v45, %v1150_v32  ;;  %v1208_v14 = vadd.f32 %v3543_v11, %v1196_v63 }
 0x3a8   :  { %v1207_v12 = vadd.f32 %v3543_v11, %v1195_v61  ;;  %v1216_v40 = vmax.f32 %v1208_v14, 0.0  ;;  %v3520_v61 = vsel %vm4610_vm12, 1.0, %v6075_v41 }
 0x3aa   :  { %v1215_v58 = vmax.f32 %v1207_v12, 0.0  ;;  %v1224_v33 = vrot.slane %v1216_v40, 1 }
 0x3ab   :  { %v3991_v38 = vpop.f32.mrf.mxu0 }
 0x3ac   :  { %v1198_v48 = vmul.f32 %v3991_v38, %v3542_v45  ;;  %v1223_v31 = vrot.slane %v1215_v58, 1 }
 0x3ad   :  { %v1160_v43 = vpop.f32.mrf.mxu0 }
 0x3ae   :  { %v1197_v42 = vmul.f32 %v3542_v45, %v1160_v43  ;;  %v1210_v35 = vadd.f32 %v3543_v11, %v1198_v48  ;;  %v1237_v38 = vsel %vm199_vm0, %v1223_v31, %v1224_v33 }
 0x3af   :  { %v3994_v44 = vpop.f32.mrf.mxu0 }
 0x3b0   :  { %v1200_v46 = vmul.f32 %v3994_v44, %v3542_v45  ;;  %v1209_v36 = vadd.f32 %v3543_v11, %v1197_v42  ;;  %v1218_v37 = vmax.f32 %v1210_v35, 0.0  ;;  %v1239_v44 = vmax.f32 %v1215_v58, %v1237_v38 }
 0x3b1   :  { %v1170_v62 = vpop.f32.mrf.mxu0  ;;  %v1346_v42 = vand.u32 15, %v4582_v0  ;;  %v1348_v35 = vand.u32 15, %v4594_v20 }
 0x3b2   :  { %v1199_v47 = vmul.f32 %v3542_v45, %v1170_v62  ;;  %v1212_v55 = vadd.f32 %v3543_v11, %v1200_v46  ;;  %v1217_v15 = vmax.f32 %v1209_v36, 0.0  ;;  %v1226_v25 = vrot.slane %v1218_v37, 1  ;;  %v1441_v46 = vld [vmem:[%s6060_s2 + $0x40] sm:$0xff] }
 0x3b3   :  { %v3521_v62 = vsel %vm4623_vm13, 1.0, %v6075_v41  ;;  %4024 = vmatprep.subr.mxu0 %v1441_v46  ;;  %vm1376_vm12 = vcmp.ne.s32.totalorder %v1348_v35, 15 }
 0x3b4   :  { %v1211_v2 = vadd.f32 %v3543_v11, %v1199_v47  ;;  %v1220_v5 = vmax.f32 %v1212_v55, 0.0  ;;  %v1225_v26 = vrot.slane %v1217_v15, 1  ;;  %4025 = vmatpush3.msra.mxu0 %v1441_v46  ;;  %v1439_v47 = vld [vmem:[%s6060_s2 + $0x30] sm:$0xff] }
 0x3b5   :  { %4026 = vmatprep.subr.mxu0 %v1440_v39 }
 0x3b6   :  { %v3997_v54 = vpop.f32.mrf.mxu0  ;;  %v1219_v9 = vmax.f32 %v1211_v2, 0.0  ;;  %v1228_v16 = vrot.slane %v1220_v5, 1  ;;  %v1235_v1 = vsel %vm199_vm0, %v1225_v26, %v1226_v25  ;;  %v1236_v27 = vsel %vm199_vm0, %v1224_v33, %v1225_v26  ;;  %4027 = vmatpush3.msra.mxu0 %v1440_v39 }
 0x3b7   :  { %v1202_v24 = vmul.f32 %v3997_v54, %v3542_v45  ;;  %v1241_v32 = vmax.f32 %v1217_v15, %v1235_v1  ;;  %v1240_v43 = vmax.f32 %v1216_v40, %v1236_v27  ;;  %4028 = vmatprep.subr.mxu0 %v1439_v47  ;;  %v3552_v27 = vld [vmem:[%s6062_s4 + $0x4] ss:$0 sm:$0xff] }
 0x3b8   :  { %v1180_v56 = vpop.f32.mrf.mxu0  ;;  %v1227_v18 = vrot.slane %v1219_v9, 1  ;;  %4029 = vmatpush3.msra.mxu0 %v1439_v47 }
 0x3b9   :  { %v1214_v8 = vadd.f32 %v3543_v11, %v1202_v24  ;;  %v1201_v59 = vmul.f32 %v3542_v45, %v1180_v56  ;;  %v4786_v45 = vsel %vm4603_vm11, 1.0, %v6075_v41  ;;  %vm1374_vm11 = vcmp.ne.s32.totalorder %v1346_v42, 15 }
 0x3ba   :  { %v1233_v29 = vsel %vm199_vm0, %v1227_v18, %v1228_v16  ;;  %v1234_v51 = vsel %vm199_vm0, %v1226_v25, %v1227_v18 }
 0x3bb   :  { %v1222_v10 = vmax.f32 %v1214_v8, 0.0  ;;  %v1213_v3 = vadd.f32 %v3543_v11, %v1201_v59  ;;  %v1243_v52 = vmax.f32 %v1219_v9, %v1233_v29  ;;  %v1242_v34 = vmax.f32 %v1218_v37, %v1234_v51  ;;  %v1438_v11 = vld [vmem:[%s6060_s2 + $0x28] sm:$0xff] }
 0x3bc   :  { %4030 = vmatprep.subr.mxu0 %v1438_v11 }
 0x3bd   :  { %v1230_v53 = vrot.slane %v1222_v10, 1  ;;  %v1221_v13 = vmax.f32 %v1213_v3, 0.0  ;;  %4031 = vmatpush3.msra.mxu0 %v1438_v11 }
 0x3bf   :  { %v1229_v19 = vrot.slane %v1221_v13, 1  ;;  %v1238_v21 = vsel %vm199_vm0, %v1230_v53, %v1223_v31 }
 0x3c0   :  { %v1246_v30 = vmax.f32 %v1222_v10, %v1238_v21 }
 0x3c1   :  { %v1231_v22 = vsel %vm199_vm0, %v1229_v19, %v1230_v53  ;;  %v1232_v7 = vsel %vm199_vm0, %v1228_v16, %v1229_v19 }
 0x3c2   :  { %3998 = vmatprep.subr.mxu1 %v1246_v30  ;;  %v1245_v23 = vmax.f32 %v1221_v13, %v1231_v22  ;;  %v1244_v4 = vmax.f32 %v1220_v5, %v1232_v7  ;;  %v1345_v13 = vand.u32 15, %v4212_v6 }
 0x3c3   :  { %3999 = vmatpush3.msra.mxu1 %v1246_v30  ;;  %v1347_v30 = vand.u32 15, %v4585_v17 }
 0x3c4   :  { %4000 = vmatprep.subr.mxu1 %v1245_v23  ;;  %vm1349_vm13 = vcmp.ne.s32.totalorder %v1345_v13, 0  ;;  %v1707_v13 = vld [vmem:[%s6060_s2 + $0x88] sm:$0xff] }
 0x3c5   :  { %4001 = vmatpush3.msra.mxu1 %v1245_v23  ;;  %vm1351_vm8 = vcmp.ne.s32.totalorder %v1347_v30, 0  ;;  %v1655_v30 = vand.u32 7, %v4212_v6 }
 0x3c6   :  { %4002 = vmatprep.subr.mxu1 %v1244_v4 }
 0x3c7   :  { %4003 = vmatpush3.msra.mxu1 %v1244_v4  ;;  %vm4919_vm15 = vcmp.ne.s32.totalorder %v1655_v30, 7 }
 0x3c8   :  { %4004 = vmatprep.subr.mxu1 %v1243_v52 }
 0x3c9   :  { %4005 = vmatpush3.msra.mxu1 %v1243_v52 }
 0x3ca   :  { %4006 = vmatprep.subr.mxu1 %v1242_v34 }
 0x3cb   :  { %4007 = vmatpush3.msra.mxu1 %v1242_v34 }
 0x3cc   :  { %4008 = vmatprep.subr.mxu1 %v1241_v32 }
 0x3cd   :  { %4009 = vmatpush3.msra.mxu1 %v1241_v32 }
 0x3ce   :  { %4010 = vmatprep.subr.mxu1 %v1240_v43 }
 0x3cf   :  { %4011 = vmatpush3.msra.mxu1 %v1240_v43 }
 0x3d0   :  { %4012 = vmatprep.subr.mxu1 %v1239_v44 }
 0x3d1   :  { %4013 = vmatpush3.msra.mxu1 %v1239_v44  ;;  %v3553_v44 = vld [vmem:[%s6062_s4 + $0x5] ss:$0 sm:$0xff] }
 0x3d2   :  { %4015 = vmatmul.mubr.msk.f32.vlgmr.msra.gmra.mxu1 %vm1247_vm4, %v4786_v45 }
 0x3d3   :  { %4017 = vmatprep.mubr.msk.f32.mxu1 %vm1247_vm4, %v3520_v61 }
 0x3d6   :  { %4018 = vmatmul.mubr.msk.f32.gmra.mxu1 %vm1247_vm4, %v3521_v62 }
 0x3d7   :  { %4046 = vmatprep.mubr.msk.f32.mxu1 %vm1433_vm10, %v4757_v60 }
 0x492   :  { %v4016_v12 = vpop.f32.mrf.mxu1 }
 0x493   :  { %1403 = vrot.lane.b32.xlu1 %v4016_v12, %s4160_s16  ;;  %v1354_v54 = vrot.slane %v4016_v12, 7  ;;  %v1378_v55 = vrot.slane %v4016_v12, 1 }
 0x494   :  { %v1326_v48 = vpop.f32.mrf.mxu1 }
 0x495   :  { %v1353_v2 = vrot.slane %v1326_v48, 7  ;;  %v1377_v24 = vrot.slane %v1326_v48, 1  ;;  %1401 = vrot.lane.b32.xlu0 %v1326_v48, %s4160_s16 }
 0x496   :  { %v4019_v56 = vpop.f32.mrf.mxu1 }
 0x497   :  { %v1356_v58 = vrot.slane %v4019_v56, 7  ;;  %1407 = vrot.lane.b32.xlu1 %v4019_v56, %s4160_s16  ;;  %v1383_v8 = vsel %vm199_vm0, %v1377_v24, %v1378_v55  ;;  %v1359_v59 = vsel %vm102_vm1, %v1353_v2, %v1354_v54  ;;  %v1380_v36 = vrot.slane %v4019_v56, 1 }
 0x498   :  { %v1336_v63 = vpop.f32.mrf.mxu1 }
 0x499   :  { %v1379_v5 = vrot.slane %v1336_v63, 1  ;;  %1417 = vrot.lane.b32.xlu0 %v1383_v8, %s4162_s24  ;;  %v1360_v9 = vsel %vm102_vm1, %v1356_v58, %v1353_v2  ;;  %v1384_v20 = vsel %vm199_vm0, %v1380_v36, %v1377_v24  ;;  %v1355_v16 = vrot.slane %v1336_v63, 7 }
 0x49a   :  { %v1396_v31 = vsel %vm1376_vm12, %v1384_v20, 0.0  ;;  %v1369_v15 = vsel %vm1349_vm13, %v1360_v9, 0.0  ;;  %v1711_v20 = vld [vmem:[%s6060_s2 + $0xa8] sm:$0xff]  ;;  %vm4164_vm12 = vmmov 0  }
 0x49b   :  { %v1382_v10 = vsel %vm199_vm0, %v1378_v55, %v1379_v5  ;;  %v1381_v53 = vsel %vm199_vm0, %v1379_v5, %v1380_v36  ;;  %v1358_v40 = vsel %vm102_vm1, %v1354_v54, %v1355_v16  ;;  %v1357_v29 = vsel %vm102_vm1, %v1355_v16, %v1356_v58  ;;  %v1703_v16 = vld [vmem:[%s6060_s2 + $0x68] sm:$0xff] }
 0x49c   :  { %v1394_v3 = vsel %vm1374_vm11, %v1382_v10, 0.0  ;;  %v1371_v17 = vsel %vm1351_vm8, %v1358_v40, 0.0  ;;  %vm4927_vm11 = vcmp.ne.s32.totalorder %v1655_v30, 0  ;;  %v1928_v30 = vld [vmem:[%s6060_s2 + $0x170] sm:$0xff] }
 0x49d   :  { %1405 = vrot.lane.b32.xlu0 %v1336_v63, %s4160_s16  ;;  %1419 = vrot.lane.b32.xlu1 %v1394_v3, %s4162_s24  ;;  %v1712_v3 = vld [vmem:[%s6060_s2 + $0xb0] sm:$0xff] }
 0x49e   :  { %4049 = vmatprep.subr.mxu0 %v1712_v3  ;;  %v1924_v40 = vld [vmem:[%s6060_s2 + $0x150] sm:$0xff] }
 0x4a1   :  { %1423 = vrot.lane.b32.xlu1 %v1396_v31, %s4162_s24  ;;  %1421 = vrot.lane.b32.xlu0 %v1381_v53, %s4162_s24  ;;  %v1710_v31 = vld [vmem:[%s6060_s2 + $0xa0] sm:$0xff]  ;;  %v1708_v53 = vld [vmem:[%s6060_s2 + $0x90] sm:$0xff] }
 0x505   :  { %v1404_v14 = vpop.permute.xlu1 %1403 }
 0x506   :  { %v1430_v7 = vsel %vm1047_vm14, %v1359_v59, %v1404_v14  ;;  %v1706_v14 = vld [vmem:[%s6060_s2 + $0x80] sm:$0xff] }
 0x507   :  { %v1402_v37 = vpop.permute.xlu0 %1401 }
 0x508   :  { %v1429_v18 = vsel %vm1047_vm14, %v1369_v15, %v1402_v37  ;;  %v1705_v37 = vld [vmem:[%s6060_s2 + $0x78] sm:$0xff]  ;;  %v1704_v15 = vld [vmem:[%s6060_s2 + $0x70] sm:$0xff] }
 0x509   :  { %v1408_v19 = vpop.permute.xlu1 %1407 }
 0x50a   :  { %v1432_v4 = vsel %vm1047_vm14, %v1357_v29, %v1408_v19  ;;  %v1701_v19 = vld [vmem:[%s6060_s2 + $0x58] sm:$0xff] }
 0x50b   :  { %v1418_v21 = vpop.permute.xlu0 %1417 }
 0x50c   :  { %v1434_v22 = vsel %vm1433_vm10, %v1429_v18, %v1418_v21  ;;  %v1702_v18 = vld [vmem:[%s6060_s2 + $0x60] sm:$0xff]  ;;  %v1656_v21 = vand.u32 7, %v4582_v0 }
 0x50d   :  { %4032 = vmatprep.mubr.msk.f32.mxu0 %vm1444_vm5, %v1434_v22  ;;  %v1922_v0 = vld [vmem:[%s6060_s2 + $0x140] sm:$0xff] }
 0x50e   :  { %vm4915_vm9 = vcmp.ne.s32.totalorder %v1656_v21, 7  ;;  %vm4923_vm3 = vcmp.ne.s32.totalorder %v1656_v21, 0  ;;  %v1905_v21 = vld [vmem:[%s6060_s2 + $0xb8] sm:$0xff] }
 0x50f   :  { %v1406_v23 = vpop.permute.xlu0 %1405  ;;  %v1420_v25 = vpop.permute.xlu1 %1419 }
 0x510   :  { %v1435_v26 = vsel %vm1433_vm10, %v1430_v7, %v1420_v25  ;;  %v1431_v51 = vsel %vm1047_vm14, %v1371_v17, %v1406_v23  ;;  %v1925_v23 = vld [vmem:[%s6060_s2 + $0x158] sm:$0xff]  ;;  %v1923_v25 = vld [vmem:[%s6060_s2 + $0x148] sm:$0xff] }
 0x511   :  { %4033 = vmatmul.mubr.msk.f32.vlgmr.msra.gmra.mxu0 %vm1444_vm5, %v1435_v26 }
 0x512   :  { %4050 = vmatpush3.msra.mxu0 %v1712_v3  ;;  %v1917_v3 = vld [vmem:[%s6060_s2 + $0x118] sm:$0xff] }
 0x513   :  { %v1424_v52 = vpop.permute.xlu1 %1423  ;;  %v1422_v33 = vpop.permute.xlu0 %1421  ;;  %4051 = vmatprep.subr.mxu0 %v1711_v20 }
 0x514   :  { %v1437_v1 = vsel %vm1433_vm10, %v1432_v4, %v1424_v52  ;;  %v1436_v34 = vsel %vm1433_vm10, %v1431_v51, %v1422_v33  ;;  %4052 = vmatpush3.msra.mxu0 %v1711_v20  ;;  %v1916_v20 = vld [vmem:[%s6060_s2 + $0x110] sm:$0xff] }
 0x515   :  { %4035 = vmatprep.mubr.msk.f32.mxu0 %vm1444_vm5, %v1436_v34  ;;  %4053 = vmatprep.subr.mxu0 %v1710_v31 }
 0x516   :  { %4036 = vmatmul.mubr.msk.f32.gmra.mxu0 %vm1444_vm5, %v1437_v1 }
 0x517   :  { %4054 = vmatpush3.msra.mxu0 %v1710_v31  ;;  %v1915_v31 = vld [vmem:[%s6060_s2 + $0x108] sm:$0xff] }
 0x5d1   :  { %v4034_v32 = vpop.f32.mrf.mxu0 }
 0x5d2   :  { %v1549_v38 = vmul.f32 %v4034_v32, %v3552_v27 }
 0x5d3   :  { %v1523_v43 = vpop.f32.mrf.mxu0 }
 0x5d4   :  { %v1548_v61 = vmul.f32 %v3552_v27, %v1523_v43  ;;  %v1557_v57 = vadd.f32 %v3553_v44, %v1549_v38 }
 0x5d6   :  { %v1556_v62 = vadd.f32 %v3553_v44, %v1548_v61  ;;  %v4037_v28 = vpop.f32.mrf.mxu0  ;;  %v1561_v48 = vmax.f32 %v1557_v57, 0.0 }
 0x5d7   :  { %v1551_v46 = vmul.f32 %v4037_v28, %v3552_v27 }
 0x5d8   :  { %v1533_v39 = vpop.f32.mrf.mxu0  ;;  %v1560_v47 = vmax.f32 %v1556_v62, 0.0  ;;  %v1565_v56 = vrot.slane %v1561_v48, 1 }
 0x5d9   :  { %v1559_v11 = vadd.f32 %v3553_v44, %v1551_v46  ;;  %v1550_v12 = vmul.f32 %v3552_v27, %v1533_v39 }
 0x5da   :  { %v1564_v55 = vrot.slane %v1560_v47, 1 }
 0x5db   :  { %v1563_v42 = vmax.f32 %v1559_v11, 0.0  ;;  %v1558_v54 = vadd.f32 %v3553_v44, %v1550_v12  ;;  %v3559_v12 = vld [vmem:[%s6062_s4 + $0x7] ss:$0 sm:$0xff] }
 0x5dc   :  { %v1570_v5 = vsel %vm199_vm0, %v1564_v55, %v1565_v56 }
 0x5dd   :  { %v1567_v2 = vrot.slane %v1563_v42, 1  ;;  %v1562_v24 = vmax.f32 %v1558_v54, 0.0  ;;  %v1572_v10 = vmax.f32 %v1560_v47, %v1570_v5  ;;  %v3558_v47 = vld [vmem:[%s6062_s4 + $0x6] ss:$0 sm:$0xff]  ;;  %v1920_v5 = vld [vmem:[%s6060_s2 + $0x130] sm:$0xff] }
 0x5df   :  { %v1566_v58 = vrot.slane %v1562_v24, 1  ;;  %v1571_v8 = vsel %vm199_vm0, %v1567_v2, %v1564_v55 }
 0x5e0   :  { %v1575_v59 = vmax.f32 %v1563_v42, %v1571_v8 }
 0x5e1   :  { %v1568_v63 = vsel %vm199_vm0, %v1566_v58, %v1567_v2  ;;  %v1569_v35 = vsel %vm199_vm0, %v1565_v56, %v1566_v58 }
 0x5e2   :  { %4038 = vmatprep.subr.mxu1 %v1575_v59  ;;  %v1574_v36 = vmax.f32 %v1562_v24, %v1568_v63  ;;  %v1573_v9 = vmax.f32 %v1561_v48, %v1569_v35 }
 0x5e3   :  { %4039 = vmatpush3.msra.mxu1 %v1575_v59 }
 0x5e4   :  { %4040 = vmatprep.subr.mxu1 %v1574_v36 }
 0x5e5   :  { %4041 = vmatpush3.msra.mxu1 %v1574_v36 }
 0x5e6   :  { %4042 = vmatprep.subr.mxu1 %v1573_v9 }
 0x5e7   :  { %4043 = vmatpush3.msra.mxu1 %v1573_v9  ;;  %v1919_v9 = vld [vmem:[%s6060_s2 + $0x128] sm:$0xff] }
 0x5e8   :  { %4044 = vmatprep.subr.mxu1 %v1572_v10 }
 0x5e9   :  { %4045 = vmatpush3.msra.mxu1 %v1572_v10  ;;  %v1918_v10 = vld [vmem:[%s6060_s2 + $0x120] sm:$0xff] }
 0x5ea   :  { %4047 = vmatmul.mubr.msk.f32.vlgmr.msra.gmra.mxu1 %vm1433_vm10, %v4786_v45  ;;  %4076 = vmatprep.subr.mxu1 %v6075_v41  ;;  %v1709_v45 = vld [vmem:[%s6060_s2 + $0x98] sm:$0xff] }
 0x5eb   :  { %4055 = vmatprep.subr.mxu0 %v1709_v45  ;;  %4080 = vmatprep.mubr.msk.f32.mxu1 %vm4164_vm12, %v6075_v41 }
 0x5ec   :  { %4056 = vmatpush3.msra.mxu0 %v1709_v45  ;;  %v1914_v45 = vld [vmem:[%s6060_s2 + $0x100] sm:$0xff] }
 0x5ed   :  { %4057 = vmatprep.subr.mxu0 %v1708_v53 }
 0x5ee   :  { %4058 = vmatpush3.msra.mxu0 %v1708_v53  ;;  %v1913_v53 = vld [vmem:[%s6060_s2 + $0xf8] sm:$0xff] }
 0x5ef   :  { %4059 = vmatprep.subr.mxu0 %v1707_v13 }
 0x5f0   :  { %4060 = vmatpush3.msra.mxu0 %v1707_v13  ;;  %v1912_v13 = vld [vmem:[%s6060_s2 + $0xf0] sm:$0xff] }
 0x5f1   :  { %4061 = vmatprep.subr.mxu0 %v1706_v14 }
 0x5f2   :  { %4062 = vmatpush3.msra.mxu0 %v1706_v14  ;;  %v1911_v14 = vld [vmem:[%s6060_s2 + $0xe8] sm:$0xff] }
 0x5f3   :  { %4063 = vmatprep.subr.mxu0 %v1705_v37 }
 0x5f4   :  { %4064 = vmatpush3.msra.mxu0 %v1705_v37  ;;  %v1910_v37 = vld [vmem:[%s6060_s2 + $0xe0] sm:$0xff] }
 0x5f5   :  { %4065 = vmatprep.subr.mxu0 %v1704_v15 }
 0x5f6   :  { %4066 = vmatpush3.msra.mxu0 %v1704_v15  ;;  %v1909_v15 = vld [vmem:[%s6060_s2 + $0xd8] sm:$0xff] }
 0x5f7   :  { %4067 = vmatprep.subr.mxu0 %v1703_v16 }
 0x5f8   :  { %4068 = vmatpush3.msra.mxu0 %v1703_v16  ;;  %v1908_v16 = vld [vmem:[%s6060_s2 + $0xd0] sm:$0xff] }
 0x5f9   :  { %4069 = vmatprep.subr.mxu0 %v1702_v18 }
 0x5fa   :  { %4070 = vmatpush3.msra.mxu0 %v1702_v18  ;;  %v1907_v18 = vld [vmem:[%s6060_s2 + $0xc8] sm:$0xff] }
 0x5fb   :  { %4071 = vmatprep.subr.mxu0 %v1701_v19 }
 0x5fc   :  { %4072 = vmatpush3.msra.mxu0 %v1701_v19  ;;  %v1906_v19 = vld [vmem:[%s6060_s2 + $0xc0] sm:$0xff] }
 0x5fd   :  { %4083 = vmatprep.subr.mxu0 %v6075_v41 }
 0x6aa   :  { %v4048_v22 = vpop.f32.mrf.mxu1 }
 0x6ab   :  { %1685 = vrot.lane.b32.xlu1 %v4048_v22, %s4162_s24  ;;  %v1660_v26 = vrot.slane %v4048_v22, 7  ;;  %v1672_v29 = vrot.slane %v4048_v22, 1  ;;  %v1927_v22 = vld [vmem:[%s6060_s2 + $0x168] sm:$0xff] }
 0x6ac   :  { %v1646_v7 = vpop.f32.mrf.mxu1 }
 0x6ad   :  { %v1659_v17 = vrot.slane %v1646_v7, 7  ;;  %v1671_v4 = vrot.slane %v1646_v7, 1  ;;  %1683 = vrot.lane.b32.xlu0 %v1646_v7, %s4162_s24  ;;  %s4163_s24 = smov 64   ;;  %v1926_v7 = vld [vmem:[%s6060_s2 + $0x160] sm:$0xff] }
 0x6af   :  { %v1674_v51 = vsel %vm199_vm0, %v1672_v29, %v1671_v4  ;;  %v1673_v52 = vsel %vm199_vm0, %v1671_v4, %v1672_v29  ;;  %v1661_v33 = vsel %vm102_vm1, %v1659_v17, %v1660_v26  ;;  %v1662_v1 = vsel %vm102_vm1, %v1660_v26, %v1659_v17  ;;  %v1921_v26 = vld [vmem:[%s6060_s2 + $0x138] sm:$0xff] }
 0x6b0   :  { %v1680_v34 = vsel %vm4915_vm9, %v1674_v51, 0.0  ;;  %v1679_v27 = vsel %vm4919_vm15, %v1673_v52, 0.0  ;;  %v1668_v32 = vsel %vm4923_vm3, %v1661_v33, 0.0  ;;  %v1667_v38 = vsel %vm4927_vm11, %v1662_v1, 0.0 }
 0x6b1   :  { %1693 = vrot.lane.b32.xlu1 %v1680_v34, %s4163_s24  ;;  %1691 = vrot.lane.b32.xlu0 %v1679_v27, %s4163_s24  ;;  %vm1713_vm1 = vcmask 785408   ;;  %v1889_v29 = vand.u32 3, %v4212_v6 }
 0x71d   :  { %v1686_v43 = vpop.permute.xlu1 %1685 }
 0x71e   :  { %v1698_v61 = vsel %vm1433_vm10, %v1668_v32, %v1686_v43  ;;  %v3562_v32 = vld [vmem:[%s6062_s4 + $0x8] ss:$0 sm:$0xff]  ;;  %v3563_v43 = vld [vmem:[%s6062_s4 + $0x9] ss:$0 sm:$0xff] }
 0x71f   :  { %v1684_v44 = vpop.permute.xlu0 %1683 }
 0x720   :  { %v1697_v62 = vsel %vm1433_vm10, %v1667_v38, %v1684_v44  ;;  %vm1890_vm10 = vcmp.ne.s32.totalorder %v1889_v29, 0 }
 0x723   :  { %v1694_v28 = vpop.permute.xlu1 %1693  ;;  %v1692_v57 = vpop.permute.xlu0 %1691 }
 0x724   :  { %v1700_v46 = vsel %vm1247_vm4, %v1698_v61, %v1694_v28  ;;  %v1699_v39 = vsel %vm1247_vm4, %v1697_v62, %v1692_v57 }
 0x725   :  { %4073 = vmatprep.mubr.msk.f32.mxu0 %vm1713_vm1, %v1699_v39  ;;  %v2128_v39 = vld [vmem:[%s6060_s2 + $0x1f0] sm:$0xff] }
 0x726   :  { %4074 = vmatmul.mubr.msk.f32.vlgmr.msra.gmra.mxu0 %vm1713_vm1, %v1700_v46 }
 0x727   :  { %4085 = vmatprep.mubr.msk.f32.mxu0 %vm4164_vm12, %v6075_v41 }
 0x7e6   :  { %v4075_v11 = vpop.f32.mrf.mxu0 }
 0x7e7   :  { %v1802_v48 = vmul.f32 %v4075_v11, %v3558_v47  ;;  %v2126_v11 = vld [vmem:[%s6060_s2 + $0x1e0] sm:$0xff] }
 0x7e8   :  { %v1786_v42 = vpop.f32.mrf.mxu0 }
 0x7e9   :  { %v1808_v54 = vadd.f32 %v3559_v12, %v1802_v48  ;;  %v1801_v55 = vmul.f32 %v3558_v47, %v1786_v42  ;;  %v2127_v47 = vld [vmem:[%s6060_s2 + $0x1e8] sm:$0xff]  ;;  %v2125_v48 = vld [vmem:[%s6060_s2 + $0x1d8] sm:$0xff] }
 0x7eb   :  { %v1810_v2 = vmax.f32 %v1808_v54, 0.0  ;;  %v1807_v24 = vadd.f32 %v3559_v12, %v1801_v55  ;;  %v5098_v12 = vld [vmem:[%s6061_s3 + $0x78] sm:$0xff]  ;;  %v5113_v55 = vld [vmem:[%s6061_s3 + $0xf0] sm:$0xff] }
 0x7ec   :  { %v5108_v54 = vand.u32 4294901760, %v5098_v12 }
 0x7ed   :  { %v1809_v56 = vmax.f32 %v1807_v24, 0.0  ;;  %v1812_v58 = vrot.slane %v1810_v2, 1  ;;  %v5121_v24 = vand.u32 4294901760, %v5113_v55 }
 0x7ee   :  { %6178 = vst [vmem:[#allocation8_spill] sm:$0xff] %v5108_v54 }
 0x7ef   :  { %v1811_v8 = vrot.slane %v1809_v56, 1  ;;  %6179 = vst [vmem:[#allocation9_spill] sm:$0xff] %v5121_v24 }
 0x7f1   :  { %v1813_v59 = vsel %vm199_vm0, %v1811_v8, %v1812_v58  ;;  %v1814_v63 = vsel %vm199_vm0, %v1812_v58, %v1811_v8  ;;  %vm1895_vm0 = vcmp.ne.s32.totalorder %v1889_v29, 3  ;;  %v5129_v58 = vld [vmem:[%s6061_s3 + $0xe8] sm:$0xff]  ;;  %v5262_v29 = vld [vmem:[%s6061_s3 + $0x38] sm:$0xff] }
 0x7f2   :  { %v1816_v35 = vmax.f32 %v1810_v2, %v1814_v63  ;;  %v1815_v36 = vmax.f32 %v1809_v56, %v1813_v59  ;;  %v5118_v2 = vld [vmem:[%s6061_s3 + $0x70] sm:$0xff]  ;;  %v5134_v8 = vld [vmem:[%s6061_s3 + $0x68] sm:$0xff]  ;;  %v5142_v63 = vand.u32 4294901760, %v5129_v58 }
 0x7f3   :  { %v5124_v56 = vand.u32 4294901760, %v5118_v2  ;;  %v2124_v59 = vld [vmem:[%s6060_s2 + $0x1d0] sm:$0xff] }
 0x7f4   :  { %4077 = vmatpush3.msra.mxu1 %v1816_v35  ;;  %6181 = vst [vmem:[#allocation11_spill] sm:$0xff] %v5142_v63  ;;  %v5147_v35 = vld [vmem:[%s6061_s3 + $0xe0] sm:$0xff] }
 0x7f5   :  { %4078 = vmatprep.subr.mxu1 %v6075_v41  ;;  %6180 = vst [vmem:[#allocation10_spill] sm:$0xff] %v5124_v56 }
 0x7f6   :  { %4079 = vmatpush3.msra.mxu1 %v1815_v36  ;;  %v5152_v36 = vld [vmem:[%s6061_s3 + $0x60] sm:$0xff] }
 0x7f7   :  { %4081 = vmatmul.mubr.msk.f32.vlgmr.msra.gmra.mxu1 %vm1047_vm14, %v4757_v60  ;;  %1932 = vmatprep.subr.mxu1 %v6075_v41 }
 0x7f8   :  { %1933 = vmatpush1.msra.mxu1 %v1920_v5  ;;  %v5156_v5 = vand.u32 4294901760, %v5134_v8 }
 0x7f9   :  { %1934 = vmatprep.subr.mxu1 %v6075_v41 }
 0x7fa   :  { %1935 = vmatpush1.msra.mxu1 %v1919_v9  ;;  %6182 = vst [vmem:[#allocation12_spill] sm:$0xff] %v5156_v5  ;;  %v5161_v9 = vld [vmem:[%s6061_s3 + $0xd8] sm:$0xff] }
 0x7fb   :  { %1936 = vmatprep.subr.mxu1 %v6075_v41 }
 0x7fc   :  { %1937 = vmatpush1.msra.mxu1 %v1918_v10  ;;  %v2123_v10 = vld [vmem:[%s6060_s2 + $0x1c8] sm:$0xff] }
 0x7fd   :  { %1938 = vmatprep.subr.mxu1 %v6075_v41 }
 0x7fe   :  { %1939 = vmatpush1.msra.mxu1 %v1917_v3  ;;  %v5169_v3 = vand.u32 4294901760, %v5147_v35 }
 0x7ff   :  { %1940 = vmatprep.subr.mxu1 %v6075_v41 }
 0x800   :  { %1941 = vmatpush1.msra.mxu1 %v1916_v20  ;;  %6183 = vst [vmem:[#allocation13_spill] sm:$0xff] %v5169_v3  ;;  %v5174_v20 = vld [vmem:[%s6061_s3 + $0x58] sm:$0xff] }
 0x801   :  { %1942 = vmatprep.subr.mxu1 %v6075_v41 }
 0x802   :  { %1943 = vmatpush1.msra.mxu1 %v1915_v31  ;;  %v5178_v31 = vand.u32 4294901760, %v5152_v36 }
 0x803   :  { %1944 = vmatprep.subr.mxu1 %v6075_v41 }
 0x804   :  { %1945 = vmatpush1.msra.mxu1 %v1914_v45  ;;  %6184 = vst [vmem:[#allocation14_spill] sm:$0xff] %v5178_v31  ;;  %v5183_v45 = vld [vmem:[%s6061_s3 + $0xd0] sm:$0xff] }
 0x805   :  { %1946 = vmatprep.subr.mxu1 %v6075_v41 }
 0x806   :  { %1947 = vmatpush1.msra.mxu1 %v1913_v53  ;;  %v2122_v53 = vld [vmem:[%s6060_s2 + $0x1c0] sm:$0xff] }
 0x807   :  { %1948 = vmatprep.subr.mxu1 %v6075_v41 }
 0x808   :  { %1949 = vmatpush1.msra.mxu1 %v1912_v13  ;;  %v5191_v13 = vand.u32 4294901760, %v5161_v9 }
 0x809   :  { %1950 = vmatprep.subr.mxu1 %v6075_v41 }
 0x80a   :  { %1951 = vmatpush1.msra.mxu1 %v1911_v14  ;;  %6185 = vst [vmem:[#allocation15_spill] sm:$0xff] %v5191_v13  ;;  %v5196_v14 = vld [vmem:[%s6061_s3 + $0x50] sm:$0xff] }
 0x80b   :  { %1952 = vmatprep.subr.mxu1 %v6075_v41 }
 0x80c   :  { %1953 = vmatpush1.msra.mxu1 %v1910_v37  ;;  %v5200_v37 = vand.u32 4294901760, %v5174_v20 }
 0x80d   :  { %1954 = vmatprep.subr.mxu1 %v6075_v41 }
 0x80e   :  { %1955 = vmatpush1.msra.mxu1 %v1909_v15  ;;  %6186 = vst [vmem:[#allocation16_spill] sm:$0xff] %v5200_v37  ;;  %v5205_v15 = vld [vmem:[%s6061_s3 + $0xc8] sm:$0xff] }
 0x80f   :  { %1956 = vmatprep.subr.mxu1 %v6075_v41 }
 0x810   :  { %1957 = vmatpush1.msra.mxu1 %v1908_v16  ;;  %v2121_v16 = vld [vmem:[%s6060_s2 + $0x1b8] sm:$0xff] }
 0x811   :  { %1958 = vmatprep.subr.mxu1 %v6075_v41 }
 0x812   :  { %1959 = vmatpush1.msra.mxu1 %v1907_v18  ;;  %v5213_v18 = vand.u32 4294901760, %v5183_v45 }
 0x813   :  { %1960 = vmatprep.subr.mxu1 %v6075_v41 }
 0x814   :  { %1961 = vmatpush1.msra.mxu1 %v1906_v19  ;;  %6187 = vst [vmem:[#allocation17_spill] sm:$0xff] %v5213_v18  ;;  %v5218_v19 = vld [vmem:[%s6061_s3 + $0x48] sm:$0xff] }
 0x815   :  { %1962 = vmatprep.subr.mxu1 %v6075_v41 }
 0x816   :  { %1963 = vmatpush1.msra.mxu1 %v1905_v21  ;;  %v5222_v21 = vand.u32 4294901760, %v5196_v14 }
 0x817   :  { %1980 = vmatprep.subr.mxu1 %v6075_v41 }
 0x818   :  { %1981 = vmatpush2.msra.mxu1 %v1928_v30  ;;  %6188 = vst [vmem:[#allocation18_spill] sm:$0xff] %v5222_v21  ;;  %v5227_v30 = vld [vmem:[%s6061_s3 + $0xc0] sm:$0xff] }
 0x819   :  { %1982 = vmatprep.subr.mxu1 %v6075_v41 }
 0x81a   :  { %1983 = vmatpush2.msra.mxu1 %v1927_v22  ;;  %v2120_v22 = vld [vmem:[%s6060_s2 + $0x1b0] sm:$0xff] }
 0x81b   :  { %1984 = vmatprep.subr.mxu1 %v6075_v41 }
 0x81c   :  { %1985 = vmatpush2.msra.mxu1 %v1926_v7  ;;  %v5235_v7 = vand.u32 4294901760, %v5205_v15 }
 0x81d   :  { %1986 = vmatprep.subr.mxu1 %v6075_v41 }
 0x81e   :  { %1987 = vmatpush2.msra.mxu1 %v1925_v23  ;;  %6189 = vst [vmem:[#allocation19_spill] sm:$0xff] %v5235_v7  ;;  %v5240_v23 = vld [vmem:[%s6061_s3 + $0x40] sm:$0xff] }
 0x81f   :  { %1988 = vmatprep.subr.mxu1 %v6075_v41 }
 0x820   :  { %1989 = vmatpush2.msra.mxu1 %v1924_v40  ;;  %v5244_v40 = vand.u32 4294901760, %v5218_v19 }
 0x821   :  { %1990 = vmatprep.subr.mxu1 %v6075_v41 }
 0x822   :  { %1991 = vmatpush2.msra.mxu1 %v1923_v25  ;;  %6190 = vst [vmem:[#allocation20_spill] sm:$0xff] %v5244_v40  ;;  %v5249_v25 = vld [vmem:[%s6061_s3 + $0xb8] sm:$0xff] }
 0x823   :  { %1992 = vmatprep.subr.mxu1 %v6075_v41 }
 0x824   :  { %1993 = vmatpush2.msra.mxu1 %v1922_v0  ;;  %v2119_v0 = vld [vmem:[%s6060_s2 + $0x1a8] sm:$0xff] }
 0x825   :  { %1994 = vmatprep.subr.mxu1 %v6075_v41 }
 0x826   :  { %1995 = vmatpush2.msra.mxu1 %v1921_v26  ;;  %v5257_v26 = vand.u32 4294901760, %v5227_v30 }
 0x828   :  { %6191 = vst [vmem:[#allocation21_spill] sm:$0xff] %v5257_v26 }
 0x8b7   :  { %v1885_v17 = vpop.f32.mrf.mxu1 }
 0x8b8   :  { %v1891_v4 = vrot.slane %v1885_v17, 7  ;;  %v1896_v51 = vrot.slane %v1885_v17, 1  ;;  %1901 = vrot.lane.b32.xlu0 %v1885_v17, %s4163_s24  ;;  %v5266_v17 = vand.u32 4294901760, %v5240_v23 }
 0x8b9   :  { %v4082_v52 = vpop.f32.mrf.mxu1 }
 0x8ba   :  { %v1899_v33 = vsel %vm1895_vm0, %v1896_v51, 0.0  ;;  %v1894_v1 = vsel %vm1890_vm10, %v1891_v4, 0.0  ;;  %6192 = vst [vmem:[#allocation22_spill] sm:$0xff] %v5266_v17  ;;  %v5271_v4 = vld [vmem:[%s6061_s3 + $0xb0] sm:$0xff]  ;;  %v2118_v51 = vld [vmem:[%s6060_s2 + $0x1a0] sm:$0xff]  ;;  %v5279_v52 = vand.u32 4294901760, %v5249_v25 }
 0x8bb   :  { %3561 = vmatprep.mubr.msk.f32.mxu1 %vm1247_vm4, %v1899_v33  ;;  %v5284_v33 = vld [vmem:[%s6061_s3 + $0x30] sm:$0xff] }
 0x8bc   :  { %6193 = vst [vmem:[#allocation23_spill] sm:$0xff] %v5279_v52 }
 0x92a   :  { %v1902_v34 = vpop.permute.xlu0 %1901 }
 0x92b   :  { %v1904_v27 = vsel %vm1247_vm4, %v1894_v1, %v1902_v34  ;;  %v5288_v1 = vand.u32 4294901760, %v5262_v29  ;;  %v5293_v34 = vld [vmem:[%s6061_s3 + $0xa8] sm:$0xff] }
 0x92c   :  { %1997 = vmatmul.mubr.f32.vlgmr.msra.gmra.mxu1 %v1904_v27  ;;  %v2117_v27 = vld [vmem:[%s6060_s2 + $0x198] sm:$0xff] }
 0x92d   :  { %6194 = vst [vmem:[#allocation24_spill] sm:$0xff] %v5288_v1 }
 0x9ec   :  { %v1998_v38 = vpop.f32.mrf.mxu1 }
 0x9ed   :  { %v2008_v44 = vmul.f32 %v3562_v32, %v1998_v38  ;;  %v5301_v32 = vand.u32 4294901760, %v5271_v4  ;;  %v5306_v38 = vld [vmem:[%s6061_s3 + $0x28] sm:$0xff] }
 0x9ee   :  { %v2000_v61 = vpop.f32.mrf.mxu1 }
 0x9ef   :  { %v2013_v62 = vadd.f32 %v3563_v43, %v2008_v44  ;;  %6195 = vst [vmem:[#allocation25_spill] sm:$0xff] %v5301_v32  ;;  %v5310_v43 = vand.u32 4294901760, %v5284_v33  ;;  %v5315_v44 = vld [vmem:[%s6061_s3 + $0xa0] sm:$0xff]  ;;  %v2116_v61 = vld [vmem:[%s6060_s2 + $0x190] sm:$0xff] }
 0x9f1   :  { %v2014_v28 = vmax.f32 %v2013_v62, 0.0  ;;  %6196 = vst [vmem:[#allocation26_spill] sm:$0xff] %v5310_v43  ;;  %v5323_v62 = vand.u32 4294901760, %v5293_v34 }
 0x9f3   :  { %v2015_v57 = vrot.slane %v2014_v28, 1  ;;  %6197 = vst [vmem:[#allocation27_spill] sm:$0xff] %v5323_v62 }
 0x9f5   :  { %v2016_v46 = vmax.f32 %v2014_v28, %v2015_v57  ;;  %v5328_v28 = vld [vmem:[%s6061_s3 + $0x20] sm:$0xff]  ;;  %v5332_v57 = vand.u32 4294901760, %v5306_v38 }
 0x9f7   :  { %4084 = vmatpush3.msra.mxu0 %v2016_v46  ;;  %6198 = vst [vmem:[#allocation28_spill] sm:$0xff] %v5332_v57  ;;  %v5337_v46 = vld [vmem:[%s6061_s3 + $0x98] sm:$0xff] }
 0x9f8   :  { %4086 = vmatmul.mubr.msk.f32.vlgmr.msra.gmra.mxu0 %vm409_vm7, %v4757_v60  ;;  %2145 = vmatprep.subr.mxu0 %v6075_v41  ;;  %v5093_v60 = vld [vmem:[%s6061_s3 + $0xf8] sm:$0xff]  ;;  %vm2091_vm7 = vcmask 1047556  }
 0x9f9   :  { %2146 = vmatpush1.msra.mxu0 %v2128_v39  ;;  %v5105_v42 = vand.u32 4294901760, %v5093_v60  ;;  %v2115_v39 = vld [vmem:[%s6060_s2 + $0x188] sm:$0xff] }
 0x9fa   :  { %2147 = vmatprep.subr.mxu0 %v6075_v41 }
 0x9fb   :  { %2148 = vmatpush1.msra.mxu0 %v2127_v47  ;;  %6177 = vst [vmem:[#allocation7_spill] sm:$0xff] %v5105_v42  ;;  %3682 = vmatprep.subr.mxu1 %v5105_v42  ;;  %v5345_v47 = vand.u32 4294901760, %v5315_v44 }
 0x9fc   :  { %2149 = vmatprep.subr.mxu0 %v6075_v41  ;;  %3683 = vmatpush3.msra.mxu1 %v5108_v54 }
 0x9fd   :  { %2150 = vmatpush1.msra.mxu0 %v2126_v11  ;;  %3684 = vmatprep.subr.mxu1 %v5121_v24  ;;  %6199 = vst [vmem:[#allocation29_spill] sm:$0xff] %v5345_v47  ;;  %v5350_v11 = vld [vmem:[%s6061_s3 + $0x18] sm:$0xff] }
 0x9fe   :  { %2151 = vmatprep.subr.mxu0 %v6075_v41  ;;  %3685 = vmatpush3.msra.mxu1 %v5124_v56 }
 0x9ff   :  { %2152 = vmatpush1.msra.mxu0 %v2125_v48  ;;  %3686 = vmatprep.subr.mxu1 %v5142_v63  ;;  %v5354_v48 = vand.u32 4294901760, %v5328_v28 }
 0xa00   :  { %2153 = vmatprep.subr.mxu0 %v6075_v41  ;;  %3687 = vmatpush3.msra.mxu1 %v5156_v5 }
 0xa01   :  { %2154 = vmatpush1.msra.mxu0 %v2124_v59  ;;  %3688 = vmatprep.subr.mxu1 %v5169_v3  ;;  %6200 = vst [vmem:[#allocation30_spill] sm:$0xff] %v5354_v48  ;;  %v5359_v59 = vld [vmem:[%s6061_s3 + $0x90] sm:$0xff] }
 0xa02   :  { %2155 = vmatprep.subr.mxu0 %v6075_v41  ;;  %3689 = vmatpush3.msra.mxu1 %v5178_v31  ;;  %6201 = vst [vmem:[#allocation31_spill] sm:$0xff] %v5359_v59 }
 0xa03   :  { %2156 = vmatpush1.msra.mxu0 %v2123_v10  ;;  %3690 = vmatprep.subr.mxu1 %v5191_v13  ;;  %v2114_v10 = vld [vmem:[%s6060_s2 + $0x180] sm:$0xff] }
 0xa04   :  { %2157 = vmatprep.subr.mxu0 %v6075_v41  ;;  %3691 = vmatpush3.msra.mxu1 %v5200_v37 }
 0xa05   :  { %2158 = vmatpush1.msra.mxu0 %v2122_v53  ;;  %3692 = vmatprep.subr.mxu1 %v5213_v18  ;;  %v5367_v53 = vand.u32 4294901760, %v5337_v46 }
 0xa06   :  { %2159 = vmatprep.subr.mxu0 %v6075_v41  ;;  %3693 = vmatpush3.msra.mxu1 %v5222_v21 }
 0xa07   :  { %2160 = vmatpush1.msra.mxu0 %v2121_v16  ;;  %3694 = vmatprep.subr.mxu1 %v5235_v7  ;;  %6202 = vst [vmem:[#allocation32_spill] sm:$0xff] %v5367_v53  ;;  %v5372_v16 = vld [vmem:[%s6061_s3 + $0x10] sm:$0xff] }
 0xa08   :  { %2161 = vmatprep.subr.mxu0 %v6075_v41  ;;  %3695 = vmatpush3.msra.mxu1 %v5244_v40 }
 0xa09   :  { %2162 = vmatpush1.msra.mxu0 %v2120_v22  ;;  %3696 = vmatprep.subr.mxu1 %v5257_v26  ;;  %v5376_v22 = vand.u32 4294901760, %v5350_v11 }
 0xa0a   :  { %2163 = vmatprep.subr.mxu0 %v6075_v41  ;;  %3697 = vmatpush3.msra.mxu1 %v5266_v17 }
 0xa0b   :  { %2164 = vmatpush1.msra.mxu0 %v2119_v0  ;;  %3698 = vmatprep.subr.mxu1 %v5279_v52  ;;  %6203 = vst [vmem:[#allocation33_spill] sm:$0xff] %v5376_v22  ;;  %v5381_v0 = vld [vmem:[%s6061_s3 + $0x88] sm:$0xff] }
 0xa0c   :  { %2165 = vmatprep.subr.mxu0 %v6075_v41  ;;  %3699 = vmatpush3.msra.mxu1 %v5288_v1  ;;  %6204 = vst [vmem:[#allocation34_spill] sm:$0xff] %v5381_v0  ;;  %v5406_v49 = vand.u32 4294901760, %v5381_v0  ;;  %v2133_v0 = vld [vmem:[%s6060_s2 + $0x218] sm:$0xff] }
 0xa0d   :  { %2166 = vmatpush1.msra.mxu0 %v2118_v51  ;;  %3700 = vmatprep.subr.mxu1 %v5301_v32  ;;  %v2113_v51 = vld [vmem:[%s6060_s2 + $0x178] sm:$0xff] }
 0xa0e   :  { %2167 = vmatprep.subr.mxu0 %v6075_v41  ;;  %3701 = vmatpush3.msra.mxu1 %v5310_v43  ;;  %6208 = vst [vmem:[#allocation38_spill] sm:$0xff] %v5406_v49 }
 0xa0f   :  { %2168 = vmatpush1.msra.mxu0 %v2117_v27  ;;  %3702 = vmatprep.subr.mxu1 %v5323_v62  ;;  %v5389_v27 = vand.u32 4294901760, %v5359_v59  ;;  %v2135_v59 = vld [vmem:[%s6060_s2 + $0x228] sm:$0xff] }
 0xa10   :  { %2169 = vmatprep.subr.mxu0 %v6075_v41  ;;  %3703 = vmatpush3.msra.mxu1 %v5332_v57 }
 0xa11   :  { %2170 = vmatpush1.msra.mxu0 %v2116_v61  ;;  %3704 = vmatprep.subr.mxu1 %v5345_v47  ;;  %6205 = vst [vmem:[#allocation35_spill] sm:$0xff] %v5389_v27  ;;  %v5394_v61 = vld [vmem:[%s6061_s3 + $0x8] sm:$0xff] }
 0xa12   :  { %2171 = vmatprep.subr.mxu0 %v6075_v41  ;;  %6206 = vst [vmem:[#allocation36_spill] sm:$0xff] %v5394_v61  ;;  %3705 = vmatpush3.msra.mxu1 %v5354_v48 }
 0xa13   :  { %2172 = vmatpush1.msra.mxu0 %v2115_v39  ;;  %v5398_v39 = vand.u32 4294901760, %v5372_v16  ;;  %3706 = vmatprep.subr.mxu1 %v5367_v53 }
 0xa14   :  { %2173 = vmatprep.subr.mxu0 %v6075_v41  ;;  %3707 = vmatpush3.msra.mxu1 %v5376_v22 }
 0xa15   :  { %2174 = vmatpush1.msra.mxu0 %v2114_v10  ;;  %6207 = vst [vmem:[#allocation37_spill] sm:$0xff] %v5398_v39  ;;  %v5410_v10 = vand.u32 4294901760, %v5394_v61  ;;  %3708 = vmatprep.subr.mxu1 %v5389_v27  ;;  %v5450_v27 = vsub.f32 %v5098_v12, %v5108_v54  ;;  %v5470_v12 = vsub.f32 %v5113_v55, %v5121_v24 }
 0xa16   :  { %2175 = vmatprep.subr.mxu0 %v6075_v41  ;;  %3709 = vmatpush3.msra.mxu1 %v5398_v39  ;;  %v5487_v55 = vsub.f32 %v5129_v58, %v5142_v63 }
 0xa17   :  { %2176 = vmatpush1.msra.mxu0 %v2113_v51  ;;  %6209 = vst [vmem:[#allocation39_spill] sm:$0xff] %v5410_v10  ;;  %v2134_v51 = vld [vmem:[%s6060_s2 + $0x220] sm:$0xff]  ;;  %3710 = vmatprep.subr.mxu1 %v5406_v49  ;;  %v6092_v54 = vand.u32 4294901760, %v5450_v27 }
 0xa18   :  { %2193 = vmatprep.subr.mxu0 %v6075_v41  ;;  %3711 = vmatpush3.msra.mxu1 %v5410_v10 }
 0xa19   :  { %2194 = vmatpush2.msra.mxu0 %v2136_v50  ;;  %v2132_v50 = vld [vmem:[%s6060_s2 + $0x210] sm:$0xff] }
 0xa1a   :  { %2195 = vmatprep.subr.mxu0 %v6075_v41 }
 0xa1b   :  { %2196 = vmatpush2.msra.mxu0 %v2135_v59  ;;  %v2131_v59 = vld [vmem:[%s6060_s2 + $0x208] sm:$0xff] }
 0xa1c   :  { %2197 = vmatprep.subr.mxu0 %v6075_v41 }
 0xa1d   :  { %2198 = vmatpush2.msra.mxu0 %v2134_v51  ;;  %v2130_v51 = vld [vmem:[%s6060_s2 + $0x200] sm:$0xff] }
 0xa1e   :  { %2199 = vmatprep.subr.mxu0 %v6075_v41 }
 0xa1f   :  { %2200 = vmatpush2.msra.mxu0 %v2133_v0  ;;  %v2129_v0 = vld [vmem:[%s6060_s2 + $0x1f8] sm:$0xff] }
 0xa20   :  { %2201 = vmatprep.subr.mxu0 %v6075_v41 }
 0xa21   :  { %2202 = vmatpush2.msra.mxu0 %v2132_v50  ;;  %v3569_v50 = vld.sshfl [vmem:[%s6059_s1] sm:$0x33 pattern:$0x76325410] }
 0xa22   :  { %2203 = vmatprep.subr.mxu0 %v6075_v41  ;;  %v2271_v49 = vcombine.high %v3569_v50, %v3569_v50 }
 0xa23   :  { %2204 = vmatpush2.msra.mxu0 %v2131_v59  ;;  %v5454_v59 = vsub.f32 %v5093_v60, %v5105_v42  ;;  %v5474_v60 = vsub.f32 %v5134_v8, %v5156_v5  ;;  %v5491_v8 = vsub.f32 %v5152_v36, %v5178_v31  ;;  %v5511_v36 = vld [vmem:[%s6061_s3] sm:$0xff] }
 0xa24   :  { %2205 = vmatprep.subr.mxu0 %v6075_v41  ;;  %v5456_v61 = vand.u32 4294901760, %v2271_v49 }
 0xa25   :  { %2206 = vmatpush2.msra.mxu0 %v2130_v51  ;;  %v5460_v51 = vsub.f32 %v5118_v2, %v5124_v56 }
 0xa26   :  { %2207 = vmatprep.subr.mxu0 %v6075_v41  ;;  %6210 = vst [vmem:[#allocation40_spill] sm:$0xff] %v5456_v61  ;;  %v6085_v41 = vand.u32 4294901760, %v5454_v59  ;;  %v5466_v10 = vsub.f32 %v2271_v49, %v5456_v61  ;;  %v5523_v49 = vsub.f32 %v5174_v20, %v5200_v37  ;;  %v6103_v20 = vand.u32 4294901760, %v5474_v60 }
 0xa27   :  { %2208 = vmatpush2.msra.mxu0 %v2129_v0  ;;  %v5462_v0 = vand.u32 4294901760, %v3569_v50  ;;  %v5541_v37 = vsub.f32 %v5196_v14, %v5222_v21  ;;  %v5546_v61 = vsub.f32 %v5147_v35, %v5169_v3  ;;  %v6104_v14 = vand.u32 4294901760, %v5491_v8 }
 0xa28   :  { %6212 = vst [vmem:[#allocation42_spill] sm:$0xff] %v5466_v10  ;;  %v2502_v56 = vsub.f32 %v5454_v59, %v6085_v41  ;;  %v5501_v41 = vsub.f32 %v5450_v27, %v6092_v54  ;;  %v6215_v31 = vand.u32 4294901760, %v5466_v10  ;;  %v6216_v54 = vand.u32 4294901760, %v5470_v12 }
 0xa29   :  { %6211 = vst [vmem:[#allocation41_spill] sm:$0xff] %v5462_v0  ;;  %v5478_v2 = vsub.f32 %v3569_v50, %v5462_v0  ;;  %v5496_v50 = vld [vmem:[%s6061_s3 + $0x80] sm:$0xff]  ;;  %v6219_v0 = vand.u32 4294901760, %v5460_v51  ;;  %v6107_v35 = vand.u32 4294901760, %v5546_v61 }
 0xa2a   :  { %6213 = vst [vmem:[#allocation43_spill] sm:$0xff] %v5501_v41  ;;  %v5506_v58 = vand.u32 4294901760, %v5496_v50  ;;  %v2503_v5 = vand.u32 4294901760, %v2502_v56  ;;  %v2373_v63 = vsub.f32 %v5466_v10, %v6215_v31  ;;  %v5519_v24 = vsub.f32 %v5470_v12, %v6216_v54 }
 0xa2b   :  { %v6099_v42 = vand.u32 4294901760, %v5478_v2  ;;  %v5526_v56 = vand.u32 4294901760, %v5511_v36  ;;  %v5534_v31 = vsub.f32 %v5460_v51, %v6219_v0  ;;  %v6110_v0 = vand.u32 4294901760, %v5523_v49 }
 0xa2c   :  { %6214 = vst [vmem:[#allocation44_spill] sm:$0xff] %v5506_v58  ;;  %6217 = vst [vmem:[#allocation45_spill] sm:$0xff] %v5519_v24  ;;  %3712 = vmatprep.subr.mxu1 %v5506_v58  ;;  %3717 = vmatprep.subr.mxu0 %v2503_v5  ;;  %v2374_v54 = vand.u32 4294901760, %v2373_v63  ;;  %v6102_v24 = vand.u32 4294901760, %v5487_v55  ;;  %v5557_v5 = vsub.f32 %v5474_v60, %v6103_v20 }
 0xa2d   :  { %6218 = vst [vmem:[#allocation46_spill] sm:$0xff] %v5526_v56  ;;  %v2379_v41 = vsub.f32 %v5478_v2, %v6099_v42  ;;  %3713 = vmatpush3.msra.mxu1 %v5526_v56  ;;  %v5576_v20 = vsub.f32 %v5240_v23, %v5266_v17 }
 0xa2e   :  { %2375 = vmatprep.mubr.f32.mxu1 %v2374_v54  ;;  %3752 = vmatprep.subr.mxu1 %v5454_v59  ;;  %v5552_v63 = vsub.f32 %v5487_v55, %v6102_v24  ;;  %v5568_v54 = vsub.f32 %v5183_v45, %v5213_v18  ;;  %v5572_v24 = vsub.f32 %v5218_v19, %v5244_v40 }
 0xa2f   :  { %v2380_v42 = vand.u32 4294901760, %v2379_v41  ;;  %v5562_v41 = vsub.f32 %v5161_v9, %v5191_v13  ;;  %v5590_v45 = vsub.f32 %v5546_v61, %v6107_v35  ;;  %v5595_v19 = vsub.f32 %v5523_v49, %v6110_v0 }
 0xa30   :  { %v6116_v23 = vand.u32 4294901760, %v5568_v54  ;;  %v5607_v35 = vsub.f32 %v5205_v15, %v5235_v7  ;;  %v5611_v40 = vsub.f32 %v5227_v30, %v5257_v26  ;;  %v5615_v0 = vsub.f32 %v5262_v29, %v5288_v1 }
 0xa31   :  { %2381 = vmatmul.mubr.f32.vlgmr.msra.gmra.mxu1 %v2380_v42  ;;  %v5582_v42 = vsub.f32 %v5491_v8, %v6104_v14  ;;  %v6111_v9 = vand.u32 4294901760, %v5562_v41  ;;  %v6119_v14 = vand.u32 4294901760, %v5541_v37  ;;  %v5629_v30 = vand.u32 1, %v4212_v6 }
 0xa32   :  { %3753 = vmatpush3.msra.mxu1 %v5450_v27  ;;  %2748 = vmatprep.mubr.f32.mxu1 %v5466_v10  ;;  %v6126_v1 = vand.u32 4294901760, %v5572_v24  ;;  %v5641_v7 = vsub.f32 %v5306_v38, %v5332_v57  ;;  %v6220_v26 = vand.u32 4294901760, %v5607_v35  ;;  %v6221_v57 = vand.u32 4294901760, %v5611_v40 }
 0xa33   :  { %3754 = vmatprep.subr.mxu1 %v5470_v12  ;;  %v5603_v17 = vsub.f32 %v5562_v41, %v6111_v9  ;;  %v5621_v9 = vsub.f32 %v5568_v54, %v6116_v23  ;;  %v5626_v15 = vsub.f32 %v5541_v37, %v6119_v14  ;;  %v5637_v23 = vsub.f32 %v5284_v33, %v5310_v43 }
 0xa34   :  { %3755 = vmatpush3.msra.mxu1 %v5460_v51  ;;  %v5647_v14 = vsub.f32 %v5249_v25, %v5279_v52  ;;  %v5653_v33 = vsub.f32 %v5607_v35, %v6220_v26  ;;  %v5658_v38 = vsub.f32 %v5572_v24, %v6126_v1  ;;  %v5663_v6 = vsub.f32 %v5611_v40, %v6221_v57 }
 0xa35   :  { %3756 = vmatprep.subr.mxu1 %v5487_v55  ;;  %v5667_v25 = vsub.f32 %v5271_v4, %v5301_v32  ;;  %v6222_v26 = vand.u32 4294901760, %v5576_v20  ;;  %v6137_v21 = vand.u32 4294901760, %v5615_v0  ;;  %v5683_v18 = vsub.f32 %v5328_v28, %v5354_v48 }
 0xa36   :  { %3757 = vmatpush3.msra.mxu1 %v5474_v60  ;;  %v6138_v1 = vand.u32 4294901760, %v5647_v14  ;;  %v6142_v28 = vand.u32 4294901760, %v5637_v23  ;;  %v5705_v48 = vsub.f32 %v5293_v34, %v5323_v62  ;;  %vm2102_vm13 = vcmp.ne.s32.totalorder %v5629_v30, 1 }
 0xa37   :  { %3758 = vmatprep.subr.mxu1 %v5546_v61  ;;  %v5674_v52 = vsub.f32 %v5576_v20, %v6222_v26  ;;  %v6139_v4 = vand.u32 4294901760, %v5667_v25  ;;  %vm2090_vm5 = vcmp.ne.s32.totalorder %v5629_v30, 0 }
 0xa38   :  { %3759 = vmatpush3.msra.mxu1 %v5491_v8  ;;  %v5689_v26 = vsub.f32 %v5647_v14, %v6138_v1  ;;  %v5725_v34 = vsub.f32 %v5637_v23, %v6142_v28 }
 0xa39   :  { %3760 = vmatprep.subr.mxu1 %v5562_v41 }
 0xa3a   :  { %3761 = vmatpush3.msra.mxu1 %v5523_v49  ;;  %6223 = vst [vmem:[#allocation47_spill] sm:$0xff] %v5725_v34  ;;  %v2605_v34 = vsub.f32 %v5496_v50, %v5506_v58 }
 0xa3b   :  { %3762 = vmatprep.subr.mxu1 %v5568_v54 }
 0xa3c   :  { %3763 = vmatpush3.msra.mxu1 %v5541_v37 }
 0xa3d   :  { %3764 = vmatprep.subr.mxu1 %v5607_v35 }
 0xa3e   :  { %3765 = vmatpush3.msra.mxu1 %v5572_v24 }
 0xa3f   :  { %3766 = vmatprep.subr.mxu1 %v5611_v40 }
 0xa40   :  { %3767 = vmatpush3.msra.mxu1 %v5576_v20 }
 0xa41   :  { %3768 = vmatprep.subr.mxu1 %v5647_v14 }
 0xa42   :  { %3769 = vmatpush3.msra.mxu1 %v5615_v0 }
 0xa43   :  { %3770 = vmatprep.subr.mxu1 %v5667_v25 }
 0xa44   :  { %3771 = vmatpush3.msra.mxu1 %v5637_v23 }
 0xa45   :  { %3772 = vmatprep.subr.mxu1 %v5705_v48 }
 0xa46   :  { %3773 = vmatpush3.msra.mxu1 %v5641_v7 }
 0xab8   :  { %v2085_v29 = vpop.f32.mrf.mxu0 }
 0xab9   :  { %v2092_v43 = vrot.slane %v2085_v29, 4  ;;  %2109 = vrot.lane.b32.xlu1 %v2085_v29, %s4163_s24 }
 0xaba   :  { %v4087_v57 = vpop.f32.mrf.mxu0 }
 0xabb   :  { %v2093_v32 = vsel %vm2091_vm7, %v2092_v43, %v2085_v29  ;;  %v5694_v57 = vsub.f32 %v5615_v0, %v6137_v21  ;;  %v5700_v43 = vsub.f32 %v5667_v25, %v6139_v4  ;;  %v5719_v4 = vsub.f32 %v5350_v11, %v5376_v22 }
 0xabc   :  { %v2094_v13 = vrot.slane %v2093_v32, 4  ;;  %v5712_v32 = vsub.f32 %v5315_v44, %v5345_v47  ;;  %v6151_v21 = vand.u32 4294901760, %v5705_v48  ;;  %v5731_v44 = vsub.f32 %v5372_v16, %v5398_v39  ;;  %v6228_v47 = vld [vmem:[#allocation36_spill] sm:$0xff] }
 0xabd   :  { %v6156_v22 = vand.u32 4294901760, %v5683_v18  ;;  %v5749_v16 = vsub.f32 %v5337_v46, %v5367_v53  ;;  %v6232_v53 = vld [vmem:[#allocation31_spill] sm:$0xff] }
 0xabe   :  { %v5715_v1 = vsel %vm2091_vm7, %v2094_v13, %v2085_v29  ;;  %v6224_v13 = vand.u32 4294901760, %v5641_v7  ;;  %v6155_v29 = vand.u32 4294901760, %v5712_v32  ;;  %v5744_v28 = vsub.f32 %v5705_v48, %v6151_v21  ;;  %3774 = vmatprep.subr.mxu1 %v5712_v32 }
 0xabf   :  { %v2105_v62 = vrot.slane %v5715_v1, 1  ;;  %v5768_v46 = vsub.f32 %v5683_v18, %v6156_v22  ;;  %3775 = vmatpush3.msra.mxu1 %v5683_v18 }
 0xac0   :  { %v5737_v11 = vsub.f32 %v5641_v7, %v6224_v13  ;;  %6226 = vst [vmem:[#allocation49_spill] sm:$0xff] %v5744_v28  ;;  %v6227_v13 = vld [vmem:[#allocation39_spill] sm:$0xff]  ;;  %v5761_v21 = vsub.f32 %v5712_v32, %v6155_v29  ;;  %v2480_v29 = vand.u32 4294901760, %v5731_v44  ;;  %v2493_v28 = vsub.f32 %v5511_v36, %v5526_v56  ;;  %3776 = vmatprep.subr.mxu1 %v5749_v16 }
 0xac1   :  { %v2107_v39 = vsel %vm2102_vm13, %v2105_v62, 0.0  ;;  %v5755_v3 = vsub.f32 %v6228_v47, %v6227_v13  ;;  %6230 = vst [vmem:[#allocation50_spill] sm:$0xff] %v5768_v46  ;;  %v2585_v62 = vand.u32 4294901760, %v5749_v16  ;;  %v2473_v47 = vand.u32 4294901760, %v5719_v4  ;;  %v6231_v13 = vld [vmem:[#allocation35_spill] sm:$0xff]  ;;  %3777 = vmatpush3.msra.mxu1 %v5719_v4 }
 0xac2   :  { %6225 = vst [vmem:[#allocation48_spill] sm:$0xff] %v5737_v11  ;;  %6229 = vst [vmem:[#allocation36_spill] sm:$0xff] %v5761_v21  ;;  %3566 = vmatprep.mubr.msk.f32.mxu0 %vm1247_vm4, %v2107_v39  ;;  %v2591_v10 = vsub.f32 %v6232_v53, %v6231_v13  ;;  %v6233_v21 = vld [vmem:[#allocation38_spill] sm:$0xff]  ;;  %v5791_v13 = vsub.f32 %v5731_v44, %v2480_v29  ;;  %v2606_v56 = vand.u32 4294901760, %v2605_v34 }
 0xac3   :  { %v6234_v39 = vld [vmem:[#allocation34_spill] sm:$0xff]  ;;  %v5782_v22 = vsub.f32 %v5749_v16, %v2585_v62  ;;  %v5785_v46 = vsub.f32 %v5719_v4, %v2473_v47  ;;  %v2487_v36 = vand.u32 4294901760, %v5755_v3  ;;  %v6242_v16 = vld [vmem:[#allocation40_spill] sm:$0xff]  ;;  %v6243_v4 = vand.u32 4294901760, %v5470_v12 }
 0xac4   :  { %v2598_v11 = vsub.f32 %v6234_v39, %v6233_v21  ;;  %v2592_v53 = vand.u32 4294901760, %v2591_v10  ;;  %6237 = vst [vmem:[#allocation51_spill] sm:$0xff] %v5791_v13  ;;  %v5804_v58 = vsub.f32 %v2605_v34, %v2606_v56  ;;  %v2494_v13 = vand.u32 4294901760, %v2493_v28  ;;  %3778 = vmatprep.subr.mxu1 %v2591_v10 }
 0xac5   :  { %6235 = vst [vmem:[#allocation31_spill] sm:$0xff] %v5782_v22  ;;  %6236 = vst [vmem:[#allocation34_spill] sm:$0xff] %v5785_v46  ;;  %v5801_v50 = vsub.f32 %v5755_v3, %v2487_v36  ;;  %3779 = vmatpush3.msra.mxu1 %v5731_v44  ;;  %v6250_v12 = vand.u32 4294901760, %v5523_v49  ;;  %v6257_v49 = vand.u32 4294901760, %v5647_v14  ;;  %v6264_v14 = vand.u32 4294901760, %v5683_v18  ;;  %v6267_v18 = vld [vmem:[#allocation43_spill] sm:$0xff] }
 0xac6   :  { %v2599_v39 = vand.u32 4294901760, %v2598_v11  ;;  %v5796_v21 = vsub.f32 %v2591_v10, %v2592_v53  ;;  %6239 = vst [vmem:[#allocation53_spill] sm:$0xff] %v5804_v58  ;;  %v5808_v22 = vsub.f32 %v2493_v28, %v2494_v13  ;;  %3780 = vmatprep.subr.mxu1 %v2598_v11  ;;  %v6241_v58 = vand.u32 4294901760, %v5450_v27 }
 0xac7   :  { %6238 = vst [vmem:[#allocation52_spill] sm:$0xff] %v5801_v50  ;;  %3781 = vmatpush3.msra.mxu1 %v5755_v3  ;;  %v6240_v50 = vand.u32 4294901760, %v5454_v59  ;;  %v6244_v10 = vand.u32 4294901760, %v5460_v51  ;;  %v6245_v3 = vand.u32 4294901760, %v5487_v55  ;;  %v6247_v59 = vand.u32 4294901760, %v5546_v61 }
 0xac8   :  { %v5798_v46 = vsub.f32 %v2598_v11, %v2599_v39  ;;  %3782 = vmatprep.subr.mxu1 %v2605_v34  ;;  %v6248_v27 = vand.u32 4294901760, %v5491_v8  ;;  %v6251_v51 = vand.u32 4294901760, %v5568_v54  ;;  %v6252_v55 = vand.u32 4294901760, %v5541_v37  ;;  %v6268_v34 = vld [vmem:[#allocation45_spill] sm:$0xff] }
 0xac9   :  { %3783 = vmatpush3.msra.mxu1 %v2493_v28  ;;  %v6246_v28 = vand.u32 4294901760, %v5474_v60  ;;  %v6253_v60 = vand.u32 4294901760, %v5607_v35  ;;  %v6254_v61 = vand.u32 4294901760, %v5572_v24  ;;  %v6255_v8 = vand.u32 4294901760, %v5611_v40 }
 0xaca   :  { %2751 = vmatmul.mubr.f32.vlgmr.msra.gmra.mxu1 %v5478_v2  ;;  %3822 = vmatprep.subr.mxu1 %v6240_v50  ;;  %v6258_v54 = vand.u32 4294901760, %v5615_v0  ;;  %v6259_v37 = vand.u32 4294901760, %v5667_v25  ;;  %v6260_v35 = vand.u32 4294901760, %v5637_v23  ;;  %v6261_v24 = vand.u32 4294901760, %v5705_v48  ;;  %v6265_v0 = vld [vmem:[#allocation41_spill] sm:$0xff] }
 0xacb   :  { %3823 = vmatpush3.msra.mxu1 %v6241_v58  ;;  %3025 = vmatprep.mubr.f32.mxu1 %v6242_v16  ;;  %v6249_v58 = vand.u32 4294901760, %v5562_v41  ;;  %v6256_v41 = vand.u32 4294901760, %v5576_v20  ;;  %v6262_v40 = vand.u32 4294901760, %v5641_v7  ;;  %v6263_v20 = vand.u32 4294901760, %v5712_v32 }
 0xacc   :  { %3824 = vmatprep.subr.mxu1 %v6243_v4  ;;  %v6266_v48 = vmov 0.0   ;;  %v2099_v7 = vrot.slane %v5715_v1, 3  ;;  %v2391_v23 = vand.u32 4294901760, %v6267_v18  ;;  %v2510_v44 = vand.u32 4294901760, %v6268_v34  ;;  %v6292_v18 = vld [vmem:[#allocation18_spill] sm:$0xff] }
 0xacd   :  { %3825 = vmatpush3.msra.mxu1 %v6244_v10  ;;  %v2398_v11 = vand.u32 4294901760, %v5534_v31  ;;  %v2524_v1 = vand.u32 4294901760, %v5590_v45  ;;  %v2419_v31 = vand.u32 4294901760, %v5595_v19  ;;  %v2433_v45 = vand.u32 4294901760, %v5658_v38  ;;  %v6270_v38 = vld [vmem:[#allocation49_spill] sm:$0xff]  ;;  %v6296_v34 = vld [vmem:[#allocation22_spill] sm:$0xff] }
 0xace   :  { %3826 = vmatprep.subr.mxu1 %v6245_v3  ;;  %v2101_v32 = vsel %vm2090_vm5, %v2099_v7, 0.0  ;;  %v2559_v19 = vand.u32 4294901760, %v5689_v26  ;;  %v6273_v26 = vld [vmem:[#allocation50_spill] sm:$0xff]  ;;  %v6291_v7 = vld [vmem:[#allocation17_spill] sm:$0xff] }
 0xacf   :  { %3827 = vmatpush3.msra.mxu1 %v6246_v28  ;;  %v2468_v10 = vand.u32 4294901760, %v6273_v26 }
 0xad0   :  { %3828 = vmatprep.subr.mxu1 %v6247_v59  ;;  %v2594_v59 = vand.u32 4294901760, %v5796_v21  ;;  %v6279_v21 = vld [vmem:[#allocation7_spill] sm:$0xff] }
 0xad1   :  { %3829 = vmatpush3.msra.mxu1 %v6248_v27  ;;  %v6276_v27 = vld [vmem:[#allocation51_spill] sm:$0xff] }
 0xad2   :  { %3830 = vmatprep.subr.mxu1 %v6249_v58  ;;  %v2482_v58 = vand.u32 4294901760, %v6276_v27 }
 0xad3   :  { %3831 = vmatpush3.msra.mxu1 %v6250_v12  ;;  %v2601_v12 = vand.u32 4294901760, %v5798_v46  ;;  %v6281_v46 = vld [vmem:[#allocation42_spill] sm:$0xff] }
 0xad4   :  { %3832 = vmatprep.subr.mxu1 %v6251_v51  ;;  %v6277_v51 = vld [vmem:[#allocation52_spill] sm:$0xff] }
 0xad5   :  { %3833 = vmatpush3.msra.mxu1 %v6252_v55  ;;  %v2489_v55 = vand.u32 4294901760, %v6277_v51 }
 0xad6   :  { %3834 = vmatprep.subr.mxu1 %v6253_v60  ;;  %v6278_v60 = vld [vmem:[#allocation53_spill] sm:$0xff] }
 0xad7   :  { %3835 = vmatpush3.msra.mxu1 %v6254_v61  ;;  %v2608_v61 = vand.u32 4294901760, %v6278_v60 }
 0xad8   :  { %3836 = vmatprep.subr.mxu1 %v6255_v8  ;;  %v2496_v8 = vand.u32 4294901760, %v5808_v22  ;;  %v6286_v22 = vld [vmem:[#allocation12_spill] sm:$0xff] }
 0xad9   :  { %3837 = vmatpush3.msra.mxu1 %v6256_v41  ;;  %v6280_v41 = vld [vmem:[#allocation8_spill] sm:$0xff] }
 0xada   :  { %3838 = vmatprep.subr.mxu1 %v6257_v49  ;;  %v6282_v49 = vand.u32 4294901760, %v6281_v46 }
 0xadb   :  { %3839 = vmatpush3.msra.mxu1 %v6258_v54  ;;  %v6283_v54 = vld [vmem:[#allocation9_spill] sm:$0xff] }
 0xadc   :  { %3840 = vmatprep.subr.mxu1 %v6259_v37  ;;  %v6284_v37 = vld [vmem:[#allocation10_spill] sm:$0xff] }
 0xadd   :  { %3841 = vmatpush3.msra.mxu1 %v6260_v35  ;;  %v6285_v35 = vld [vmem:[#allocation11_spill] sm:$0xff] }
 0xade   :  { %3842 = vmatprep.subr.mxu1 %v6261_v24  ;;  %v6287_v24 = vld [vmem:[#allocation13_spill] sm:$0xff] }
 0xadf   :  { %3843 = vmatpush3.msra.mxu1 %v6262_v40  ;;  %v6288_v40 = vld [vmem:[#allocation14_spill] sm:$0xff] }
 0xae0   :  { %3844 = vmatprep.subr.mxu1 %v6263_v20  ;;  %v6289_v20 = vld [vmem:[#allocation15_spill] sm:$0xff] }
 0xae1   :  { %3845 = vmatpush3.msra.mxu1 %v6264_v14  ;;  %v6290_v14 = vld [vmem:[#allocation16_spill] sm:$0xff] }
 0xae2   :  { %3846 = vmatprep.subr.mxu1 %v2585_v62  ;;  %v2412_v62 = vand.u32 4294901760, %v5582_v42  ;;  %v2552_v42 = vand.u32 4294901760, %v5663_v6  ;;  %v6271_v6 = vld [vmem:[#allocation48_spill] sm:$0xff] }
 0xae3   :  { %3847 = vmatpush3.msra.mxu1 %v2473_v47  ;;  %v2531_v47 = vand.u32 4294901760, %v5603_v17  ;;  %v2440_v17 = vand.u32 4294901760, %v5674_v52  ;;  %v2461_v50 = vand.u32 4294901760, %v6271_v6  ;;  %v6272_v52 = vld [vmem:[#allocation36_spill] sm:$0xff] }
 0xae4   :  { %3848 = vmatprep.subr.mxu1 %v2592_v53  ;;  %v2545_v53 = vand.u32 4294901760, %v5653_v33  ;;  %v6269_v33 = vld [vmem:[#allocation47_spill] sm:$0xff]  ;;  %v2580_v4 = vand.u32 4294901760, %v6272_v52  ;;  %v3149_v6 = vld [vmem:[%s6061_s3 + $0x100] sm:$0xff] }
 0xae5   :  { %3849 = vmatpush3.msra.mxu1 %v2480_v29  ;;  %v2517_v29 = vand.u32 4294901760, %v5552_v63  ;;  %v2538_v63 = vand.u32 4294901760, %v5621_v9  ;;  %v2447_v9 = vand.u32 4294901760, %v5694_v57  ;;  %v6274_v57 = vld [vmem:[#allocation31_spill] sm:$0xff] }
 0xae6   :  { %3850 = vmatprep.subr.mxu1 %v2599_v39  ;;  %v2454_v39 = vand.u32 4294901760, %v6269_v33  ;;  %v2587_v3 = vand.u32 4294901760, %v6274_v57  ;;  %v3153_v33 = vld [vmem:[%s6061_s3 + $0x120] sm:$0xff] }
 0xae7   :  { %3851 = vmatpush3.msra.mxu1 %v2487_v36  ;;  %v2573_v36 = vand.u32 4294901760, %v6270_v38  ;;  %v3151_v38 = vld [vmem:[%s6061_s3 + $0x110] sm:$0xff] }
 0xae8   :  { %3852 = vmatprep.subr.mxu1 %v2606_v56 }
 0xae9   :  { %3853 = vmatpush3.msra.mxu1 %v2494_v13  ;;  %v2405_v13 = vand.u32 4294901760, %v5557_v5  ;;  %v2426_v5 = vand.u32 4294901760, %v5626_v15  ;;  %v2566_v15 = vand.u32 4294901760, %v5700_v43  ;;  %v6275_v43 = vld [vmem:[#allocation34_spill] sm:$0xff] }
 0xaea   :  { %3027 = vmatmul.mubr.f32.vlgmr.msra.gmra.mxu1 %v6265_v0  ;;  %4088 = vmatprep.subr.mxu1 %v6266_v48  ;;  %v2475_v28 = vand.u32 4294901760, %v6275_v43 }
 0xaeb   :  { %4104 = vmatprep.mubr.msk.f32.mxu1 %vm4164_vm12, %v6266_v48 }
 0xb2b   :  { %v2110_v25 = vpop.permute.xlu1 %2109 }
 0xb2c   :  { %v2112_v56 = vsel %vm1247_vm4, %v2101_v32, %v2110_v25  ;;  %v6294_v25 = vld [vmem:[#allocation20_spill] sm:$0xff]  ;;  %v6295_v32 = vld [vmem:[#allocation21_spill] sm:$0xff] }
 0xb2d   :  { %2210 = vmatmul.mubr.f32.vlgmr.msra.gmra.mxu0 %v2112_v56  ;;  %v6298_v56 = vld [vmem:[#allocation24_spill] sm:$0xff] }
 0xb2e   :  { %3718 = vmatpush3.msra.mxu0 %v2391_v23  ;;  %2611 = vmatprep.mubr.f32.mxu0 %v6242_v16  ;;  %v6293_v23 = vld [vmem:[#allocation19_spill] sm:$0xff] }
 0xb2f   :  { %3719 = vmatprep.subr.mxu0 %v2510_v44  ;;  %v6297_v44 = vld [vmem:[#allocation23_spill] sm:$0xff] }
 0xb30   :  { %3720 = vmatpush3.msra.mxu0 %v2398_v11  ;;  %v6299_v11 = vld [vmem:[#allocation25_spill] sm:$0xff] }
 0xb31   :  { %3721 = vmatprep.subr.mxu0 %v2517_v29  ;;  %v6300_v29 = vld [vmem:[#allocation26_spill] sm:$0xff] }
 0xb32   :  { %3722 = vmatpush3.msra.mxu0 %v2405_v13  ;;  %v6301_v13 = vld [vmem:[#allocation27_spill] sm:$0xff] }
 0xb33   :  { %3723 = vmatprep.subr.mxu0 %v2524_v1  ;;  %v6302_v1 = vld [vmem:[#allocation28_spill] sm:$0xff] }
 0xb34   :  { %3724 = vmatpush3.msra.mxu0 %v2412_v62  ;;  %v6303_v62 = vld [vmem:[#allocation29_spill] sm:$0xff] }
 0xb35   :  { %3725 = vmatprep.subr.mxu0 %v2531_v47  ;;  %v6304_v47 = vld [vmem:[#allocation30_spill] sm:$0xff] }
 0xb36   :  { %3726 = vmatpush3.msra.mxu0 %v2419_v31  ;;  %v6305_v31 = vld [vmem:[#allocation32_spill] sm:$0xff] }
 0xb37   :  { %3727 = vmatprep.subr.mxu0 %v2538_v63  ;;  %v6306_v63 = vld [vmem:[#allocation33_spill] sm:$0xff] }
 0xb38   :  { %3728 = vmatpush3.msra.mxu0 %v2426_v5  ;;  %v6307_v5 = vld [vmem:[#allocation35_spill] sm:$0xff] }
 0xb39   :  { %3729 = vmatprep.subr.mxu0 %v2545_v53  ;;  %v6308_v53 = vld [vmem:[#allocation37_spill] sm:$0xff] }
 0xb3a   :  { %3730 = vmatpush3.msra.mxu0 %v2433_v45  ;;  %v6309_v45 = vld [vmem:[#allocation38_spill] sm:$0xff] }
 0xb3b   :  { %3731 = vmatprep.subr.mxu0 %v2552_v42  ;;  %v6310_v42 = vld [vmem:[#allocation39_spill] sm:$0xff] }
 0xb3c   :  { %3732 = vmatpush3.msra.mxu0 %v2440_v17  ;;  %v6311_v17 = vld [vmem:[#allocation44_spill] sm:$0xff] }
 0xb3d   :  { %3733 = vmatprep.subr.mxu0 %v2559_v19  ;;  %v6312_v19 = vld [vmem:[#allocation46_spill] sm:$0xff] }
 0xb3e   :  { %3734 = vmatpush3.msra.mxu0 %v2447_v9  ;;  %v6313_v9 = vand.u32 4294901760, %v5478_v2  ;;  %v3156_v2 = vld [vmem:[%s6061_s3 + $0x138] sm:$0xff] }
 0xb3f   :  { %3735 = vmatprep.subr.mxu0 %v2566_v15  ;;  %v4165_v15 = vmov 0   ;;  %4089 = vmatpush3.msra.mxu1 %v3156_v2 }
 0xb40   :  { %3736 = vmatpush3.msra.mxu0 %v2454_v39  ;;  %4134 = vset.pattern.permute.xlu0 %v4165_v15  ;;  %v3152_v39 = vld [vmem:[%s6061_s3 + $0x118] sm:$0xff] }
 0xb41   :  { %3737 = vmatprep.subr.mxu0 %v2573_v36  ;;  %4090 = vmatprep.subr.mxu1 %v6266_v48  ;;  %v3150_v36 = vld [vmem:[%s6061_s3 + $0x108] sm:$0xff] }
 0xb42   :  { %3738 = vmatpush3.msra.mxu0 %v2461_v50  ;;  %v3565_v50 = vld [vmem:[%s6062_s4 + $0xa] ss:$0 sm:$0xff] }
 0xb43   :  { %3739 = vmatprep.subr.mxu0 %v2580_v4 }
 0xb44   :  { %3740 = vmatpush3.msra.mxu0 %v2468_v10  ;;  %v3714_v10 = vpop.f32.mrf.mxu1 }
 0xb45   :  { %3741 = vmatprep.subr.mxu0 %v2587_v3 }
 0xb46   :  { %3742 = vmatpush3.msra.mxu0 %v2475_v28  ;;  %v3715_v57 = vpop.f32.mrf.mxu1 }
 0xb47   :  { %3743 = vmatprep.subr.mxu0 %v2594_v59 }
 0xb48   :  { %3744 = vmatpush3.msra.mxu0 %v2482_v58 }
 0xb49   :  { %3745 = vmatprep.subr.mxu0 %v2601_v12  ;;  %v3716_v12 = vadd.f32 %v3715_v57, %v3714_v10 }
 0xb4a   :  { %3746 = vmatpush3.msra.mxu0 %v2489_v55 }
 0xb4b   :  { %3747 = vmatprep.subr.mxu0 %v2608_v61 }
 0xb4c   :  { %3748 = vmatpush3.msra.mxu0 %v2496_v8 }
 0xb4d   :  { %2613 = vmatmul.mubr.f32.vlgmr.msra.gmra.mxu0 %v6265_v0  ;;  %3787 = vmatprep.subr.mxu0 %v6279_v21 }
 0xb4e   :  { %3788 = vmatpush3.msra.mxu0 %v6280_v41  ;;  %2855 = vmatprep.mubr.f32.mxu0 %v6282_v49 }
 0xb4f   :  { %3789 = vmatprep.subr.mxu0 %v6283_v54 }
 0xb50   :  { %3790 = vmatpush3.msra.mxu0 %v6284_v37 }
 0xb51   :  { %3791 = vmatprep.subr.mxu0 %v6285_v35 }
 0xb52   :  { %3792 = vmatpush3.msra.mxu0 %v6286_v22 }
 0xb53   :  { %3793 = vmatprep.subr.mxu0 %v6287_v24 }
 0xb54   :  { %3794 = vmatpush3.msra.mxu0 %v6288_v40 }
 0xb55   :  { %3795 = vmatprep.subr.mxu0 %v6289_v20 }
 0xb56   :  { %3796 = vmatpush3.msra.mxu0 %v6290_v14 }
 0xb57   :  { %3797 = vmatprep.subr.mxu0 %v6291_v7 }
 0xb58   :  { %3798 = vmatpush3.msra.mxu0 %v6292_v18 }
 0xb59   :  { %3799 = vmatprep.subr.mxu0 %v6293_v23 }
 0xb5a   :  { %3800 = vmatpush3.msra.mxu0 %v6294_v25 }
 0xb5b   :  { %3801 = vmatprep.subr.mxu0 %v6295_v32 }
 0xb5c   :  { %3802 = vmatpush3.msra.mxu0 %v6296_v34 }
 0xb5d   :  { %3803 = vmatprep.subr.mxu0 %v6297_v44 }
 0xb5e   :  { %3804 = vmatpush3.msra.mxu0 %v6298_v56 }
 0xb5f   :  { %3805 = vmatprep.subr.mxu0 %v6299_v11 }
 0xb60   :  { %3806 = vmatpush3.msra.mxu0 %v6300_v29 }
 0xb61   :  { %3807 = vmatprep.subr.mxu0 %v6301_v13 }
 0xb62   :  { %3808 = vmatpush3.msra.mxu0 %v6302_v1 }
 0xb63   :  { %3809 = vmatprep.subr.mxu0 %v6303_v62 }
 0xb64   :  { %3810 = vmatpush3.msra.mxu0 %v6304_v47 }
 0xb65   :  { %3811 = vmatprep.subr.mxu0 %v6305_v31 }
 0xb66   :  { %3812 = vmatpush3.msra.mxu0 %v6306_v63 }
 0xb67   :  { %3813 = vmatprep.subr.mxu0 %v6307_v5 }
 0xb68   :  { %3814 = vmatpush3.msra.mxu0 %v6308_v53 }
 0xb69   :  { %3815 = vmatprep.subr.mxu0 %v6309_v45 }
 0xb6a   :  { %3816 = vmatpush3.msra.mxu0 %v6310_v42 }
 0xb6b   :  { %3817 = vmatprep.subr.mxu0 %v6311_v17 }
 0xb6c   :  { %3818 = vmatpush3.msra.mxu0 %v6312_v19 }
 0xb6d   :  { %2859 = vmatmul.mubr.f32.vlgmr.msra.gmra.mxu0 %v6313_v9  ;;  %3857 = vmatprep.subr.mxu0 %v6279_v21 }
 0xb6e   :  { %3858 = vmatpush3.msra.mxu0 %v6280_v41  ;;  %3129 = vmatprep.mubr.f32.mxu0 %v6242_v16  ;;  %v3155_v16 = vld [vmem:[%s6061_s3 + $0x130] sm:$0xff] }
 0xb6f   :  { %3859 = vmatprep.subr.mxu0 %v6283_v54  ;;  %4091 = vmatpush3.msra.mxu1 %v3155_v16 }
 0xb70   :  { %3860 = vmatpush3.msra.mxu0 %v6284_v37  ;;  %4092 = vmatprep.subr.mxu1 %v6266_v48 }
 0xb71   :  { %3861 = vmatprep.subr.mxu0 %v6285_v35 }
 0xb72   :  { %3862 = vmatpush3.msra.mxu0 %v6286_v22 }
 0xb73   :  { %3863 = vmatprep.subr.mxu0 %v6287_v24  ;;  %v3570_v24 = vld [vmem:[%s6062_s4 + $0xb] ss:$0 sm:$0xff] }
 0xb74   :  { %3864 = vmatpush3.msra.mxu0 %v6288_v40 }
 0xb75   :  { %3865 = vmatprep.subr.mxu0 %v6289_v20  ;;  %v3571_v20 = vld [vmem:[%s6062_s4 + $0xc] ss:$0 sm:$0xff] }
 0xb76   :  { %3866 = vmatpush3.msra.mxu0 %v6290_v14 }
 0xb77   :  { %3867 = vmatprep.subr.mxu0 %v6291_v7 }
 0xb78   :  { %3868 = vmatpush3.msra.mxu0 %v6292_v18 }
 0xb79   :  { %3869 = vmatprep.subr.mxu0 %v6293_v23  ;;  %v6314_v23 = vld [vmem:[#allocation5_spill] sm:$0xff] }
 0xb7a   :  { %3870 = vmatpush3.msra.mxu0 %v6294_v25  ;;  %vm2215_vm8 = vcmp.eq.s32.totalorder %v5629_v30, %v6314_v23 }
 0xb7b   :  { %3871 = vmatprep.subr.mxu0 %v6295_v32  ;;  %v3567_v25 = vsel %vm2215_vm8, 1.0, %v6266_v48 }
 0xb7c   :  { %3872 = vmatpush3.msra.mxu0 %v6296_v34 }
 0xb7d   :  { %3873 = vmatprep.subr.mxu0 %v6297_v44  ;;  %v6315_v44 = vld [vmem:[#allocation6_spill] sm:$0xff] }
 0xb7e   :  { %3874 = vmatpush3.msra.mxu0 %v6298_v56  ;;  %v2225_v56 = vadd.s32 2, %v6315_v44 }
 0xb7f   :  { %3875 = vmatprep.subr.mxu0 %v6299_v11  ;;  %v3244_v11 = vld [vmem:[%s6061_s3 + $0x148] sm:$0xff] }
 0xb80   :  { %3876 = vmatpush3.msra.mxu0 %v6300_v29  ;;  %v3243_v29 = vld [vmem:[%s6061_s3 + $0x140] sm:$0xff]  ;;  %vm2226_vm9 = vcmp.lt.s32.totalorder %v6314_v23, %v2225_v56 }
 0xb81   :  { %3877 = vmatprep.subr.mxu0 %v6301_v13  ;;  %v3573_v13 = vld [vmem:[%s6062_s4 + $0xd] ss:$0 sm:$0xff] }
 0xb82   :  { %3878 = vmatpush3.msra.mxu0 %v6302_v1 }
 0xb83   :  { %3879 = vmatprep.subr.mxu0 %v6303_v62  ;;  %v3574_v62 = vld [vmem:[%s6062_s4 + $0xe] ss:$0 sm:$0xff] }
 0xb84   :  { %3880 = vmatpush3.msra.mxu0 %v6304_v47 }
 0xb85   :  { %3881 = vmatprep.subr.mxu0 %v6305_v31 }
 0xb86   :  { %3882 = vmatpush3.msra.mxu0 %v6306_v63 }
 0xb87   :  { %3883 = vmatprep.subr.mxu0 %v6307_v5 }
 0xb88   :  { %3884 = vmatpush3.msra.mxu0 %v6308_v53 }
 0xb89   :  { %3885 = vmatprep.subr.mxu0 %v6309_v45  ;;  %v3323_v45 = vld [vmem:[%s6061_s3 + $0x150] sm:$0x3] }
 0xb8a   :  { %3886 = vmatpush3.msra.mxu0 %v6310_v42  ;;  %v3784_v28 = vpop.f32.mrf.mxu1 }
 0xb8b   :  { %3887 = vmatprep.subr.mxu0 %v6311_v17  ;;  %v3575_v17 = vld [vmem:[%s6062_s4 + $0xf] ss:$0 sm:$0xff] }
 0xb8c   :  { %3888 = vmatpush3.msra.mxu0 %v6312_v19  ;;  %v3785_v58 = vpop.f32.mrf.mxu1 }
 0xb8d   :  { %3131 = vmatmul.mubr.f32.vlgmr.msra.gmra.mxu0 %v6265_v0  ;;  %4114 = vmatprep.subr.mxu0 %v6266_v48  ;;  %v3154_v0 = vld [vmem:[%s6061_s3 + $0x128] sm:$0xff]  ;;  %v3786_v61 = vadd.f32 %v3785_v58, %v3784_v28  ;;  %s4135_s3 = scalar_lea.vmem %s3492_s12, 32 }
 0xb8e   :  { %4116 = vmatprep.mubr.msk.f32.mxu0 %vm4164_vm12, %v6266_v48  ;;  %4093 = vmatpush3.msra.mxu1 %v3154_v0  ;;  %p4136_p0 = scmp.ne.s32.totalorder %s3492_s12, %s4135_s3  ;;  %p4141_p2 = scmp.lt.s32.totalorder %s4135_s3, %s4135_s3 }
 0xb8f   :  { %4094 = vmatprep.subr.mxu1 %v6266_v48 }
 0xb90   :  { %4095 = vmatpush3.msra.mxu1 %v3153_v33  ;;  %p4142_p3 = por %p4141_p2, %p4140_p1 }
 0xb91   :  { %4096 = vmatprep.subr.mxu1 %v6266_v48 }
 0xb92   :  { %4097 = vmatpush3.msra.mxu1 %v3152_v39  ;;  %p4143_p4 = pnand %p4142_p3, %p4136_p0 }
 0xb93   :  { %4098 = vmatprep.subr.mxu1 %v6266_v48 }
 0xb94   :  { %4099 = vmatpush3.msra.mxu1 %v3151_v38 }
 0xb95   :  { %4100 = vmatprep.subr.mxu1 %v6266_v48 }
 0xb96   :  { %4101 = vmatpush3.msra.mxu1 %v3150_v36 }
 0xb97   :  { %4102 = vmatprep.subr.mxu1 %v6266_v48 }
 0xb98   :  { %4103 = vmatpush3.msra.mxu1 %v3149_v6 }
 0xb99   :  { %4107 = vmatprep.subr.mxu1 %v6266_v48 }
 0xbaa   :  { %v3854_v55 = vpop.f32.mrf.mxu1 }
 0xbac   :  { %v3855_v21 = vpop.f32.mrf.mxu1 }
 0xbad   :  { %v3856_v49 = vadd.f32 %v3855_v21, %v3854_v55 }
 0xbed   :  { %v2211_v52 = vpop.f32.mrf.mxu0 }
 0xbee   :  { %v2212_v4 = vadd.f32 %v3565_v50, %v2211_v52 }
 0xbef   :  { %v2213_v26 = vpop.f32.mrf.mxu0 }
 0xbf0   :  { %2220 = vperm.xlu0 %4134, %v2212_v4  }
 0xc0d   :  { %v3749_v3 = vpop.f32.mrf.mxu0 }
 0xc0f   :  { %v3750_v43 = vpop.f32.mrf.mxu0 }
 0xc10   :  { %v3751_v27 = vadd.f32 %v3750_v43, %v3749_v3 }
 0xc12   :  { %v2615_v60 = vadd.f32 %v3751_v27, %v3716_v12 }
 0xc14   :  { %v2753_v41 = vadd.f32 %v3786_v61, %v2615_v60 }
 0xc2d   :  { %v3819_v59 = vpop.f32.mrf.mxu0 }
 0xc2f   :  { %v3820_v51 = vpop.f32.mrf.mxu0 }
 0xc30   :  { %v3821_v8 = vadd.f32 %v3820_v51, %v3819_v59 }
 0xc32   :  { %v2861_v46 = vadd.f32 %v3821_v8, %v2753_v41 }
 0xc34   :  { %v3029_v35 = vadd.f32 %v3856_v49, %v2861_v46 }
 0xc4d   :  { %v3889_v54 = vpop.f32.mrf.mxu0 }
 0xc4f   :  { %v3890_v37 = vpop.f32.mrf.mxu0 }
 0xc50   :  { %v3891_v22 = vadd.f32 %v3890_v37, %v3889_v54 }
 0xc52   :  { %v3133_v40 = vadd.f32 %v3891_v22, %v3029_v35 }
 0xc54   :  { %v3142_v14 = vmul.f32 %v3570_v24, %v3133_v40 }
 0xc56   :  { %v3147_v7 = vadd.f32 %v3571_v20, %v3142_v14 }
 0xc58   :  { %v3148_v18 = vmax.f32 %v3147_v7, 0.0 }
 0xc5a   :  { %4105 = vmatmul.mubr.msk.f32.vlgmr.msra.gmra.mxu1 %vm1247_vm4, %v3148_v18  ;;  %vm2224_vm4 = vcmp.ge.s32.totalorder %v6314_v23, %v6315_v44 }
 0xc5b   :  { %4111 = vmatprep.mubr.msk.f32.mxu1 %vm4164_vm12, %v6266_v48  ;;  %4108 = vmatpush3.msra.mxu1 %v3244_v11  ;;  %vm2227_vm15 = vmand %vm2224_vm4, %vm2226_vm9 }
 0xc5c   :  { %4109 = vmatprep.subr.mxu1 %v6266_v48  ;;  %v3568_v30 = vsel %vm2227_vm15, 1.0, %v6266_v48 }
 0xc5d   :  { %4110 = vmatpush3.msra.mxu1 %v3243_v29 }
 0xc5e   :  { %4119 = vmatprep.subr.mxu1 %v6266_v48 }
 0xc6b   :  { %v2221_v32 = vpop.permute.xlu0 %2220 }
 0xc6c   :  { %v2223_v34 = vmul.f32 %v3567_v25, %v2221_v32 }
 0xc6e   :  { %4115 = vmatpush3.msk.msra.mxu0 %vm477_vm2, %v2223_v34  ;;  %vm3409_vm2 = vcmask 1041408  }
 0xc6f   :  { %4117 = vmatmul.mubr.msk.f32.vlgmr.msra.gmra.mxu0 %vm392_vm6, %v3568_v30  ;;  %vm3405_vm6 = vcmask 15360  }
 0xd1a   :  { %v3226_v1 = vpop.f32.mrf.mxu1 }
 0xd1b   :  { %v3236_v47 = vmul.f32 %v3573_v13, %v3226_v1 }
 0xd1c   :  { %v4106_v31 = vpop.f32.mrf.mxu1 }
 0xd1d   :  { %v3241_v63 = vadd.f32 %v3574_v62, %v3236_v47 }
 0xd1f   :  { %v3242_v5 = vmax.f32 %v3241_v63, 0.0 }
 0xd21   :  { %4112 = vmatmul.mubr.msk.f32.vlgmr.msra.gmra.mxu1 %vm1047_vm14, %v3242_v5  ;;  %vm3483_vm14 = vcmask 58368  }
 0xd22   :  { %4121 = vmatprep.mubr.msk.f32.mxu1 %vm4164_vm12, %v6266_v48  ;;  %4120 = vmatpush3.msk.msra.mxu1 %vm3409_vm2, %v3323_v45  ;;  %v3579_v48 = vld [vmem:[%s6062_s4 + $0x10] ss:$0 sm:$0xff] }
 0xd2f   :  { %v3397_v53 = vpop.f32.mrf.mxu0 }
 0xd31   :  { %v4118_v42 = vpop.f32.mrf.mxu0 }
 0xde1   :  { %v3319_v19 = vpop.f32.mrf.mxu1 }
 0xde2   :  { %v3320_v9 = vadd.f32 %v3575_v17, %v3319_v19 }
 0xde3   :  { %v4113_v15 = vpop.f32.mrf.mxu1 }
 0xde4   :  { %v3398_v2 = vadd.f32 %v3397_v53, %v3320_v9 }
 0xde6   :  { %4122 = vmatmul.mubr.msk.f32.vlgmr.msra.gmra.mxu1 %vm3405_vm6, %v3398_v2 }
 0xea6   :  { %v3479_v16 = vpop.f32.mrf.mxu1 }
 0xea7   :  { %v3480_v0 = vadd.f32 %v3579_v48, %v3479_v16 }
 0xea8   :  { %v4123_v33 = vpop.f32.mrf.mxu1 }
 0xea9   :  { %3484 = vst.msk [vmem:[#allocation2] sm:$0x3] %vm3483_vm14, %v3480_v0 }
 0xeaa   :  { %4146 = shalt.err (!%p4143_p4)
}
 0xeab   :  { %3494 = dma.vmem_to_hbm [thread:$0]  %s3492_s12, 32, %s6063_s5, [#allocation3]  }
 0xeac   :  { %4155 = dma.done.wait [#allocation3], 32  }
 0xead   :  { %4156 = vsyncadd [#allocation3], 4294967264 }
 0xeae   :  { %3498 = vsyncpa [#allocation3], 1 }

</bundles_post_ra>
